<compile_context>
chip_gen: v7x
topology: tpu7x:2x2x1
jax: 0.10.0
libtpu: 0.0.40
codegen_flags: <defaults>
</compile_context>

<pallas_src>
import jax
import jax.numpy as jnp
import numpy as np
from jax import lax
from jax.experimental import pallas as pl
from jax.experimental.pallas import tpu as pltpu

LANE = 128


def _round_up(v, m):
    return (v + m - 1) // m * m


def basic_block_kernel(x_ref, w1_ref, w2_ref, o_ref, patch_ref, out1pad_ref):
    # x_ref      : (NB, H+2, W+2, Cp)  bf16 zero-padded NHWC input (lane-padded C)
    # w1_ref     : (9*Cp, Pp)          bf16 conv1 weight, im2col (tap-major)
    # w2_ref     : (9*Pp, Pp)          bf16 conv2 weight, im2col (tap-major)
    # o_ref      : (NB, H, W, Pp)      f32 output
    # patch_ref  : VMEM (H*W, 9*Cp) bf16   im2col scratch shared by both convs
    # out1pad_ref: VMEM (H+2, W+2, Pp) f32 spatially padded out1 (conv2 input
    #                                      AND exact-f32 residual source)
    NB, Hp2, Wp2, Cp = x_ref.shape
    H, W = Hp2 - 2, Wp2 - 2
    Pp = o_ref.shape[-1]
    HW = H * W

    # Zero ONLY the 1-pixel halo ring of the padded-out1 scratch; the interior
    # is fully rewritten for every image, so no full-buffer clear is needed.
    zrow = jnp.zeros((1, Wp2, Pp), jnp.float32)
    zcol = jnp.zeros((Hp2, 1, Pp), jnp.float32)
    out1pad_ref[0:1, :, :] = zrow
    out1pad_ref[H + 1:H + 2, :, :] = zrow
    out1pad_ref[:, 0:1, :] = zcol
    out1pad_ref[:, W + 1:W + 2, :] = zcol

    def process_image(n):
        # ---- conv1: im2col into lane-aligned 128-wide bf16 column blocks,
        # then a single wide-K MXU matmul (K = 9*Cp, bf16 x bf16 -> f32 acc).
        for dy in range(3):
            for dx in range(3):
                t = dy * 3 + dx
                patch_ref[:, t * Cp:(t + 1) * Cp] = (
                    x_ref[n, dy:dy + H, dx:dx + W, :]
                    .astype(patch_ref.dtype).reshape(HW, Cp))
        # Write conv1's f32 result straight into the padded scratch (it is
        # both the conv2 input and the residual); do NOT keep it live in
        # vregs across the conv2 section.
        out1pad_ref[1:H + 1, 1:W + 1, :] = jnp.dot(
            patch_ref[...], w1_ref[...],
            preferred_element_type=jnp.float32).reshape(H, W, Pp)

        # ---- conv2: same im2col + single wide-K matmul, reusing patch_ref
        # (taps are cast f32 -> bf16 on the way into the scratch).
        for dy in range(3):
            for dx in range(3):
                t = dy * 3 + dx
                patch_ref[:, t * Pp:(t + 1) * Pp] = (
                    out1pad_ref[dy:dy + H, dx:dx + W, :]
                    .astype(patch_ref.dtype).reshape(HW, Pp))
        out2 = jnp.dot(patch_ref[...], w2_ref[...],
                       preferred_element_type=jnp.float32)        # (HW, Pp) f32

        # identity shortcut: re-read the exact f32 out1 from VMEM (relieves
        # vreg pressure vs. holding it through conv2) and add in f32; single
        # lane-dense store, cast after the add.
        o_ref[n] = (out2.reshape(H, W, Pp)
                    + out1pad_ref[1:H + 1, 1:W + 1, :]).astype(o_ref.dtype)

    if NB <= 2:
        for n in range(NB):          # tiny batch block: static unroll is fine
            process_image(n)
    else:
        # larger batch blocks: fori_loop bounds live ranges / i-mem / compile
        def body(n, carry):
            process_image(n)
            return carry
        lax.fori_loop(0, NB, body, 0)


def _vmem_capacity_bytes():
    """Physical VMEM of the current part; conservative (v7x) fallback."""
    try:
        info = pltpu.get_tpu_info()
        cap = getattr(info, "vmem_capacity_bytes", None)
        if cap:
            return int(cap)
    except Exception:
        pass
    return 64 * 1024 * 1024


def _vmem_need_bytes(NB, H, W, Cp, Pp):
    bf16, f32 = 2, 4
    x_blk = NB * (H + 2) * (W + 2) * Cp * bf16
    o_blk = NB * H * W * Pp * f32
    w1 = 9 * Cp * Pp * bf16
    w2 = 9 * Pp * Pp * bf16
    patch = H * W * 9 * Cp * bf16
    out1pad = (H + 2) * (W + 2) * Pp * f32
    # inputs/outputs are double-buffered by the pipeline; count weights 2x too.
    return 2 * (x_blk + o_blk + w1 + w2) + patch + out1pad


def basic_block(x_nchw, w1_oihw, w2_oihw, *, batch_block=None):
    """BasicBlock forward. x: (N,Cin,H,W); w*: (Cout,Cin,3,3) OIHW. NCHW out."""
    N, Cin, H, W = x_nchw.shape
    P = w1_oihw.shape[0]
    assert w1_oihw.shape == (P, Cin, 3, 3) and w2_oihw.shape == (P, P, 3, 3)
    if Cin != P:
        # TODO(synk): the 1x1-conv + BatchNorm shortcut branch of the reference
        # is applied to out1 (not x) and is shape-inconsistent for
        # in_planes != planes, so only the identity-shortcut case is supported.
        raise NotImplementedError(
            "only the identity-shortcut BasicBlock is supported")

    Cp = _round_up(Cin, LANE)          # lane-dense channel padding
    Pp = _round_up(P, LANE)
    assert Cp == Pp                    # im2col scratch is shared by both convs

    # Batch grouping: expose >= 2 "parallel" grid steps whenever the batch
    # allows it, so both TensorCores of a v7x chip get work; a single fat step
    # otherwise. Per-step overhead is ~0.35us, negligible on 1-TC parts.
    if batch_block is None:
        NB = N // 2 if (N >= 2 and N % 2 == 0) else N
    else:
        NB = batch_block
    assert N % NB == 0

    # Budget VMEM against the part actually present (64 MiB/TC on v7x,
    # 128 MiB on v5e/v6e): shrink the batch block until blocks + scratch fit
    # in ~75% of VMEM, then derive vmem_limit_bytes from the real need.
    vmem_cap = _vmem_capacity_bytes()
    budget = int(vmem_cap * 0.75)
    while _vmem_need_bytes(NB, H, W, Cp, Pp) > budget and NB > 1:
        NB = max(d for d in range(1, NB) if N % d == 0)
    G = N // NB
    vmem_need = _vmem_need_bytes(NB, H, W, Cp, Pp)
    vmem_limit = int(min(max(vmem_need * 1.25 + (8 << 20), 16 << 20),
                         vmem_cap * 0.9))
    # TODO(synk): for large spatial stages (e.g. 56x56) also tile the im2col M
    # dimension (row blocks of ~256-512 HW rows) so patch_ref shrinks on v7x.

    # ---- plain-JAX layout glue --------------------------------------------
    # NCHW -> NHWC, bf16 (MXU operand dtype; accumulation stays f32 in-kernel),
    # 1-pixel spatial zero pad, channels zero-padded to 128 lanes.
    x = jnp.transpose(x_nchw, (0, 2, 3, 1)).astype(jnp.bfloat16)
    x = jnp.pad(x, ((0, 0), (1, 1), (1, 1), (0, Cp - Cin)))

    # weights OIHW -> HWIO, bf16, lane-pad, flatten to the tap-major im2col
    # (9*Cin, Cout) layout matching the patch columns built in the kernel.
    w1 = jnp.transpose(w1_oihw, (2, 3, 1, 0)).astype(jnp.bfloat16)   # (3,3,Cin,P)
    w2 = jnp.transpose(w2_oihw, (2, 3, 1, 0)).astype(jnp.bfloat16)   # (3,3,P,P)
    w1 = jnp.pad(w1, ((0, 0), (0, 0), (0, Cp - Cin), (0, Pp - P)))
    w2 = jnp.pad(w2, ((0, 0), (0, 0), (0, Pp - P), (0, Pp - P)))
    w1 = w1.reshape(9 * Cp, Pp)
    w2 = w2.reshape(9 * Pp, Pp)

    # Cost estimate for the padded work the kernel actually performs.
    cost = pl.CostEstimate(
        flops=2 * N * H * W * 9 * (Cp * Pp + Pp * Pp) + N * H * W * Pp,
        transcendentals=0,
        bytes_accessed=(x.size * 2 + w1.size * 2 + w2.size * 2
                        + N * H * W * Pp * 4))

    out_nhwc = pl.pallas_call(
        basic_block_kernel,
        out_shape=jax.ShapeDtypeStruct((N, H, W, Pp), jnp.float32),
        grid_spec=pltpu.PrefetchScalarGridSpec(
            num_scalar_prefetch=0,
            grid=(G,),
            in_specs=[
                pl.BlockSpec((NB, H + 2, W + 2, Cp), lambda g: (g, 0, 0, 0)),
                pl.BlockSpec((9 * Cp, Pp), lambda g: (0, 0)),
                pl.BlockSpec((9 * Pp, Pp), lambda g: (0, 0)),
            ],
            out_specs=pl.BlockSpec((NB, H, W, Pp), lambda g: (g, 0, 0, 0)),
            scratch_shapes=[
                pltpu.VMEM((H * W, 9 * Cp), jnp.bfloat16),     # im2col patches
                pltpu.VMEM((H + 2, W + 2, Pp), jnp.float32),   # padded out1
            ],
        ),
        compiler_params=pltpu.CompilerParams(
            dimension_semantics=("parallel",),
            vmem_limit_bytes=vmem_limit,
        ),
        cost_estimate=cost,
    )(x, w1, w2)

    # drop the lane-padding channels, back to NCHW / the caller's dtype
    return jnp.transpose(out_nhwc[..., :P], (0, 3, 1, 2)).astype(x_nchw.dtype)


def _reference(x_nchw, w1_oihw, w2_oihw):
    dn = jax.lax.conv_dimension_numbers(
        x_nchw.shape, w1_oihw.shape, ('NCHW', 'OIHW', 'NCHW'))
    out1 = jax.lax.conv_general_dilated(
        x_nchw, w1_oihw, (1, 1), ((1, 1), (1, 1)), dimension_numbers=dn,
        precision=jax.lax.Precision.HIGHEST)
    out2 = jax.lax.conv_general_dilated(
        out1, w2_oihw, (1, 1), ((1, 1), (1, 1)), dimension_numbers=dn,
        precision=jax.lax.Precision.HIGHEST)
    return out2 + out1


if __name__ == "__main__":
    key = jax.random.PRNGKey(0)
    k1, k2, k3 = jax.random.split(key, 3)

    # BasicBlock(in_planes=4, planes=4, stride=1)  -> identity shortcut
    N, C, Hs, Ws = 2, 4, 16, 16
    planes = 4

    x = jax.random.normal(k1, (N, C, Hs, Ws), dtype=jnp.float32)

    # Deterministic init mimicking PyTorch Conv2d default
    # (kaiming_uniform(a=sqrt(5)) -> U(-1/sqrt(fan_in), 1/sqrt(fan_in)))
    b1 = 1.0 / np.sqrt(C * 3 * 3)
    w1 = jax.random.uniform(k2, (planes, C, 3, 3), jnp.float32, -b1, b1)
    b2 = 1.0 / np.sqrt(planes * 3 * 3)
    w2 = jax.random.uniform(k3, (planes, planes, 3, 3), jnp.float32, -b2, b2)

    out = basic_block(x, w1, w2)
    out = jax.block_until_ready(out)

    ref = _reference(x, w1, w2)
    assert out.shape == ref.shape == (N, planes, Hs, Ws)
    # bf16 MXU operands (f32 accumulation / f32 residual add) vs. a HIGHEST-
    # precision f32 reference: expected ~1e-3..1e-2 relative error.
    np.testing.assert_allclose(np.asarray(out), np.asarray(ref),
                               rtol=2e-2, atol=2e-2)
    print("KERNEL_OK")
</pallas_src>

<mosaic_0001>
module attributes {stable_mosaic.version = 11 : i64} {
  func.func @basic_block_kernel(%arg0: i32, %arg1: memref<1x18x18x128xbf16, #tpu.memory_space<vmem>>, %arg2: memref<1152x128xbf16, #tpu.memory_space<vmem>>, %arg3: memref<1152x128xbf16, #tpu.memory_space<vmem>>, %arg4: memref<1x16x16x128xf32, #tpu.memory_space<vmem>>, %arg5: memref<256x1152xbf16, #tpu.memory_space<vmem>>, %arg6: memref<18x18x128xf32, #tpu.memory_space<vmem>>) attributes {dimension_semantics = [#tpu.dimension_semantics<parallel>], iteration_bounds = array<i64: 2>, scalar_prefetch = 0 : i64, scratch_operands = 2 : i64, tpu.core_type = #tpu.core_type<tc>, window_params = [{transform_indices = @transform_0, window_bounds = array<i64: 1, 18, 18, 128>}, {pipeline_mode = #tpu.pipeline_mode<synchronous>, transform_indices = @transform_1, window_bounds = array<i64: 1152, 128>}, {pipeline_mode = #tpu.pipeline_mode<synchronous>, transform_indices = @transform_2, window_bounds = array<i64: 1152, 128>}, {transform_indices = @transform_3, window_bounds = array<i64: 1, 16, 16, 128>}]} {
    %cst = arith.constant 0.000000e+00 : f32
    %0 = vector.broadcast %cst : f32 to vector<1x18x128xf32>
    %cst_0 = arith.constant 0.000000e+00 : f32
    %1 = vector.broadcast %cst_0 : f32 to vector<18x1x128xf32>
    %c0 = arith.constant 0 : index
    %c0_1 = arith.constant 0 : index
    %c0_2 = arith.constant 0 : index
    %2 = vector.load %arg6[%c0, %c0_1, %c0_2] : memref<18x18x128xf32, #tpu.memory_space<vmem>>, vector<1x18x128xf32>
    tpu.vector_store %arg6[%c0, %c0_1, %c0_2], %0 {strides = array<i32>} : memref<18x18x128xf32, #tpu.memory_space<vmem>>, vector<1x18x128xf32>,
    %c17 = arith.constant 17 : index
    %c0_3 = arith.constant 0 : index
    %c0_4 = arith.constant 0 : index
    %3 = vector.load %arg6[%c17, %c0_3, %c0_4] : memref<18x18x128xf32, #tpu.memory_space<vmem>>, vector<1x18x128xf32>
    tpu.vector_store %arg6[%c17, %c0_3, %c0_4], %0 {strides = array<i32>} : memref<18x18x128xf32, #tpu.memory_space<vmem>>, vector<1x18x128xf32>,
    %c0_5 = arith.constant 0 : index
    %c0_6 = arith.constant 0 : index
    %c0_7 = arith.constant 0 : index
    %4 = vector.load %arg6[%c0_5, %c0_6, %c0_7] : memref<18x18x128xf32, #tpu.memory_space<vmem>>, vector<18x1x128xf32>
    tpu.vector_store %arg6[%c0_5, %c0_6, %c0_7], %1 {strides = array<i32>} : memref<18x18x128xf32, #tpu.memory_space<vmem>>, vector<18x1x128xf32>,
    %c0_8 = arith.constant 0 : index
    %c17_9 = arith.constant 17 : index
    %c0_10 = arith.constant 0 : index
    %5 = vector.load %arg6[%c0_8, %c17_9, %c0_10] : memref<18x18x128xf32, #tpu.memory_space<vmem>>, vector<18x1x128xf32>
    tpu.vector_store %arg6[%c0_8, %c17_9, %c0_10], %1 {strides = array<i32>} : memref<18x18x128xf32, #tpu.memory_space<vmem>>, vector<18x1x128xf32>,
    %c0_11 = arith.constant 0 : index
    %c0_12 = arith.constant 0 : index
    %c0_13 = arith.constant 0 : index
    %c0_14 = arith.constant 0 : index
    %6 = vector.load %arg1[%c0_11, %c0_12, %c0_13, %c0_14] : memref<1x18x18x128xbf16, #tpu.memory_space<vmem>>, vector<1x16x16x128xbf16>
    %7 = vector.shape_cast %6 : vector<1x16x16x128xbf16> to vector<16x16x128xbf16>
    %8 = vector.shape_cast %7 : vector<16x16x128xbf16> to vector<256x128xbf16>
    %c0_15 = arith.constant 0 : index
    %c0_16 = arith.constant 0 : index
    %9 = vector.load %arg5[%c0_15, %c0_16] : memref<256x1152xbf16, #tpu.memory_space<vmem>>, vector<256x128xbf16>
    tpu.vector_store %arg5[%c0_15, %c0_16], %8 {strides = array<i32>} : memref<256x1152xbf16, #tpu.memory_space<vmem>>, vector<256x128xbf16>,
    %c0_17 = arith.constant 0 : index
    %c0_18 = arith.constant 0 : index
    %c1 = arith.constant 1 : index
    %c0_19 = arith.constant 0 : index
    %10 = vector.load %arg1[%c0_17, %c0_18, %c1, %c0_19] : memref<1x18x18x128xbf16, #tpu.memory_space<vmem>>, vector<1x16x16x128xbf16>
    %11 = vector.shape_cast %10 : vector<1x16x16x128xbf16> to vector<16x16x128xbf16>
    %12 = vector.shape_cast %11 : vector<16x16x128xbf16> to vector<256x128xbf16>
    %c0_20 = arith.constant 0 : index
    %c128 = arith.constant 128 : index
    %13 = vector.load %arg5[%c0_20, %c128] : memref<256x1152xbf16, #tpu.memory_space<vmem>>, vector<256x128xbf16>
    tpu.vector_store %arg5[%c0_20, %c128], %12 {strides = array<i32>} : memref<256x1152xbf16, #tpu.memory_space<vmem>>, vector<256x128xbf16>,
    %c0_21 = arith.constant 0 : index
    %c0_22 = arith.constant 0 : index
    %c2 = arith.constant 2 : index
    %c0_23 = arith.constant 0 : index
    %14 = vector.load %arg1[%c0_21, %c0_22, %c2, %c0_23] : memref<1x18x18x128xbf16, #tpu.memory_space<vmem>>, vector<1x16x16x128xbf16>
    %15 = vector.shape_cast %14 : vector<1x16x16x128xbf16> to vector<16x16x128xbf16>
    %16 = vector.shape_cast %15 : vector<16x16x128xbf16> to vector<256x128xbf16>
    %c0_24 = arith.constant 0 : index
    %c256 = arith.constant 256 : index
    %17 = vector.load %arg5[%c0_24, %c256] : memref<256x1152xbf16, #tpu.memory_space<vmem>>, vector<256x128xbf16>
    tpu.vector_store %arg5[%c0_24, %c256], %16 {strides = array<i32>} : memref<256x1152xbf16, #tpu.memory_space<vmem>>, vector<256x128xbf16>,
    %c0_25 = arith.constant 0 : index
    %c1_26 = arith.constant 1 : index
    %c0_27 = arith.constant 0 : index
    %c0_28 = arith.constant 0 : index
    %18 = vector.load %arg1[%c0_25, %c1_26, %c0_27, %c0_28] : memref<1x18x18x128xbf16, #tpu.memory_space<vmem>>, vector<1x16x16x128xbf16>
    %19 = vector.shape_cast %18 : vector<1x16x16x128xbf16> to vector<16x16x128xbf16>
    %20 = vector.shape_cast %19 : vector<16x16x128xbf16> to vector<256x128xbf16>
    %c0_29 = arith.constant 0 : index
    %c384 = arith.constant 384 : index
    %21 = vector.load %arg5[%c0_29, %c384] : memref<256x1152xbf16, #tpu.memory_space<vmem>>, vector<256x128xbf16>
    tpu.vector_store %arg5[%c0_29, %c384], %20 {strides = array<i32>} : memref<256x1152xbf16, #tpu.memory_space<vmem>>, vector<256x128xbf16>,
    %c0_30 = arith.constant 0 : index
    %c1_31 = arith.constant 1 : index
    %c1_32 = arith.constant 1 : index
    %c0_33 = arith.constant 0 : index
    %22 = vector.load %arg1[%c0_30, %c1_31, %c1_32, %c0_33] : memref<1x18x18x128xbf16, #tpu.memory_space<vmem>>, vector<1x16x16x128xbf16>
    %23 = vector.shape_cast %22 : vector<1x16x16x128xbf16> to vector<16x16x128xbf16>
    %24 = vector.shape_cast %23 : vector<16x16x128xbf16> to vector<256x128xbf16>
    %c0_34 = arith.constant 0 : index
    %c512 = arith.constant 512 : index
    %25 = vector.load %arg5[%c0_34, %c512] : memref<256x1152xbf16, #tpu.memory_space<vmem>>, vector<256x128xbf16>
    tpu.vector_store %arg5[%c0_34, %c512], %24 {strides = array<i32>} : memref<256x1152xbf16, #tpu.memory_space<vmem>>, vector<256x128xbf16>,
    %c0_35 = arith.constant 0 : index
    %c1_36 = arith.constant 1 : index
    %c2_37 = arith.constant 2 : index
    %c0_38 = arith.constant 0 : index
    %26 = vector.load %arg1[%c0_35, %c1_36, %c2_37, %c0_38] : memref<1x18x18x128xbf16, #tpu.memory_space<vmem>>, vector<1x16x16x128xbf16>
    %27 = vector.shape_cast %26 : vector<1x16x16x128xbf16> to vector<16x16x128xbf16>
    %28 = vector.shape_cast %27 : vector<16x16x128xbf16> to vector<256x128xbf16>
    %c0_39 = arith.constant 0 : index
    %c640 = arith.constant 640 : index
    %29 = vector.load %arg5[%c0_39, %c640] : memref<256x1152xbf16, #tpu.memory_space<vmem>>, vector<256x128xbf16>
    tpu.vector_store %arg5[%c0_39, %c640], %28 {strides = array<i32>} : memref<256x1152xbf16, #tpu.memory_space<vmem>>, vector<256x128xbf16>,
    %c0_40 = arith.constant 0 : index
    %c2_41 = arith.constant 2 : index
    %c0_42 = arith.constant 0 : index
    %c0_43 = arith.constant 0 : index
    %30 = vector.load %arg1[%c0_40, %c2_41, %c0_42, %c0_43] : memref<1x18x18x128xbf16, #tpu.memory_space<vmem>>, vector<1x16x16x128xbf16>
    %31 = vector.shape_cast %30 : vector<1x16x16x128xbf16> to vector<16x16x128xbf16>
    %32 = vector.shape_cast %31 : vector<16x16x128xbf16> to vector<256x128xbf16>
    %c0_44 = arith.constant 0 : index
    %c768 = arith.constant 768 : index
    %33 = vector.load %arg5[%c0_44, %c768] : memref<256x1152xbf16, #tpu.memory_space<vmem>>, vector<256x128xbf16>
    tpu.vector_store %arg5[%c0_44, %c768], %32 {strides = array<i32>} : memref<256x1152xbf16, #tpu.memory_space<vmem>>, vector<256x128xbf16>,
    %c0_45 = arith.constant 0 : index
    %c2_46 = arith.constant 2 : index
    %c1_47 = arith.constant 1 : index
    %c0_48 = arith.constant 0 : index
    %34 = vector.load %arg1[%c0_45, %c2_46, %c1_47, %c0_48] : memref<1x18x18x128xbf16, #tpu.memory_space<vmem>>, vector<1x16x16x128xbf16>
    %35 = vector.shape_cast %34 : vector<1x16x16x128xbf16> to vector<16x16x128xbf16>
    %36 = vector.shape_cast %35 : vector<16x16x128xbf16> to vector<256x128xbf16>
    %c0_49 = arith.constant 0 : index
    %c896 = arith.constant 896 : index
    %37 = vector.load %arg5[%c0_49, %c896] : memref<256x1152xbf16, #tpu.memory_space<vmem>>, vector<256x128xbf16>
    tpu.vector_store %arg5[%c0_49, %c896], %36 {strides = array<i32>} : memref<256x1152xbf16, #tpu.memory_space<vmem>>, vector<256x128xbf16>,
    %c0_50 = arith.constant 0 : index
    %c2_51 = arith.constant 2 : index
    %c2_52 = arith.constant 2 : index
    %c0_53 = arith.constant 0 : index
    %38 = vector.load %arg1[%c0_50, %c2_51, %c2_52, %c0_53] : memref<1x18x18x128xbf16, #tpu.memory_space<vmem>>, vector<1x16x16x128xbf16>
    %39 = vector.shape_cast %38 : vector<1x16x16x128xbf16> to vector<16x16x128xbf16>
    %40 = vector.shape_cast %39 : vector<16x16x128xbf16> to vector<256x128xbf16>
    %c0_54 = arith.constant 0 : index
    %c1024 = arith.constant 1024 : index
    %41 = vector.load %arg5[%c0_54, %c1024] : memref<256x1152xbf16, #tpu.memory_space<vmem>>, vector<256x128xbf16>
    tpu.vector_store %arg5[%c0_54, %c1024], %40 {strides = array<i32>} : memref<256x1152xbf16, #tpu.memory_space<vmem>>, vector<256x128xbf16>,
    %c0_55 = arith.constant 0 : index
    %c0_56 = arith.constant 0 : index
    %42 = vector.load %arg5[%c0_55, %c0_56] : memref<256x1152xbf16, #tpu.memory_space<vmem>>, vector<256x1152xbf16>
    %c0_57 = arith.constant 0 : index
    %c0_58 = arith.constant 0 : index
    %43 = vector.load %arg2[%c0_57, %c0_58] : memref<1152x128xbf16, #tpu.memory_space<vmem>>, vector<1152x128xbf16>
    %cst_59 = arith.constant dense<0.000000e+00> : vector<256x128xf32>
    %44 = tpu.matmul %42, %43, %cst_59 {dimension_numbers = #tpu.dot_dimension_numbers<[1], [0], [0], [1], [0, 0, 1, 1], [], []>} : vector<256x1152xbf16>, vector<1152x128xbf16>, vector<256x128xf32> -> vector<256x128xf32>
    %45 = vector.shape_cast %44 : vector<256x128xf32> to vector<16x16x128xf32>
    %c1_60 = arith.constant 1 : index
    %c1_61 = arith.constant 1 : index
    %c0_62 = arith.constant 0 : index
    %46 = vector.load %arg6[%c1_60, %c1_61, %c0_62] : memref<18x18x128xf32, #tpu.memory_space<vmem>>, vector<16x16x128xf32>
    tpu.vector_store %arg6[%c1_60, %c1_61, %c0_62], %45 {strides = array<i32>} : memref<18x18x128xf32, #tpu.memory_space<vmem>>, vector<16x16x128xf32>,
    %c0_63 = arith.constant 0 : index
    %c0_64 = arith.constant 0 : index
    %c0_65 = arith.constant 0 : index
    %47 = vector.load %arg6[%c0_63, %c0_64, %c0_65] : memref<18x18x128xf32, #tpu.memory_space<vmem>>, vector<16x16x128xf32>
    %48 = arith.truncf %47 : vector<16x16x128xf32> to vector<16x16x128xbf16>
    %49 = vector.shape_cast %48 : vector<16x16x128xbf16> to vector<256x128xbf16>
    %c0_66 = arith.constant 0 : index
    %c0_67 = arith.constant 0 : index
    %50 = vector.load %arg5[%c0_66, %c0_67] : memref<256x1152xbf16, #tpu.memory_space<vmem>>, vector<256x128xbf16>
    tpu.vector_store %arg5[%c0_66, %c0_67], %49 {strides = array<i32>} : memref<256x1152xbf16, #tpu.memory_space<vmem>>, vector<256x128xbf16>,
    %c0_68 = arith.constant 0 : index
    %c1_69 = arith.constant 1 : index
    %c0_70 = arith.constant 0 : index
    %51 = vector.load %arg6[%c0_68, %c1_69, %c0_70] : memref<18x18x128xf32, #tpu.memory_space<vmem>>, vector<16x16x128xf32>
    %52 = arith.truncf %51 : vector<16x16x128xf32> to vector<16x16x128xbf16>
    %53 = vector.shape_cast %52 : vector<16x16x128xbf16> to vector<256x128xbf16>
    %c0_71 = arith.constant 0 : index
    %c128_72 = arith.constant 128 : index
    %54 = vector.load %arg5[%c0_71, %c128_72] : memref<256x1152xbf16, #tpu.memory_space<vmem>>, vector<256x128xbf16>
    tpu.vector_store %arg5[%c0_71, %c128_72], %53 {strides = array<i32>} : memref<256x1152xbf16, #tpu.memory_space<vmem>>, vector<256x128xbf16>,
    %c0_73 = arith.constant 0 : index
    %c2_74 = arith.constant 2 : index
    %c0_75 = arith.constant 0 : index
    %55 = vector.load %arg6[%c0_73, %c2_74, %c0_75] : memref<18x18x128xf32, #tpu.memory_space<vmem>>, vector<16x16x128xf32>
    %56 = arith.truncf %55 : vector<16x16x128xf32> to vector<16x16x128xbf16>
    %57 = vector.shape_cast %56 : vector<16x16x128xbf16> to vector<256x128xbf16>
    %c0_76 = arith.constant 0 : index
    %c256_77 = arith.constant 256 : index
    %58 = vector.load %arg5[%c0_76, %c256_77] : memref<256x1152xbf16, #tpu.memory_space<vmem>>, vector<256x128xbf16>
    tpu.vector_store %arg5[%c0_76, %c256_77], %57 {strides = array<i32>} : memref<256x1152xbf16, #tpu.memory_space<vmem>>, vector<256x128xbf16>,
    %c1_78 = arith.constant 1 : index
    %c0_79 = arith.constant 0 : index
    %c0_80 = arith.constant 0 : index
    %59 = vector.load %arg6[%c1_78, %c0_79, %c0_80] : memref<18x18x128xf32, #tpu.memory_space<vmem>>, vector<16x16x128xf32>
    %60 = arith.truncf %59 : vector<16x16x128xf32> to vector<16x16x128xbf16>
    %61 = vector.shape_cast %60 : vector<16x16x128xbf16> to vector<256x128xbf16>
    %c0_81 = arith.constant 0 : index
    %c384_82 = arith.constant 384 : index
    %62 = vector.load %arg5[%c0_81, %c384_82] : memref<256x1152xbf16, #tpu.memory_space<vmem>>, vector<256x128xbf16>
    tpu.vector_store %arg5[%c0_81, %c384_82], %61 {strides = array<i32>} : memref<256x1152xbf16, #tpu.memory_space<vmem>>, vector<256x128xbf16>,
    %c1_83 = arith.constant 1 : index
    %c1_84 = arith.constant 1 : index
    %c0_85 = arith.constant 0 : index
    %63 = vector.load %arg6[%c1_83, %c1_84, %c0_85] : memref<18x18x128xf32, #tpu.memory_space<vmem>>, vector<16x16x128xf32>
    %64 = arith.truncf %63 : vector<16x16x128xf32> to vector<16x16x128xbf16>
    %65 = vector.shape_cast %64 : vector<16x16x128xbf16> to vector<256x128xbf16>
    %c0_86 = arith.constant 0 : index
    %c512_87 = arith.constant 512 : index
    %66 = vector.load %arg5[%c0_86, %c512_87] : memref<256x1152xbf16, #tpu.memory_space<vmem>>, vector<256x128xbf16>
    tpu.vector_store %arg5[%c0_86, %c512_87], %65 {strides = array<i32>} : memref<256x1152xbf16, #tpu.memory_space<vmem>>, vector<256x128xbf16>,
    %c1_88 = arith.constant 1 : index
    %c2_89 = arith.constant 2 : index
    %c0_90 = arith.constant 0 : index
    %67 = vector.load %arg6[%c1_88, %c2_89, %c0_90] : memref<18x18x128xf32, #tpu.memory_space<vmem>>, vector<16x16x128xf32>
    %68 = arith.truncf %67 : vector<16x16x128xf32> to vector<16x16x128xbf16>
    %69 = vector.shape_cast %68 : vector<16x16x128xbf16> to vector<256x128xbf16>
    %c0_91 = arith.constant 0 : index
    %c640_92 = arith.constant 640 : index
    %70 = vector.load %arg5[%c0_91, %c640_92] : memref<256x1152xbf16, #tpu.memory_space<vmem>>, vector<256x128xbf16>
    tpu.vector_store %arg5[%c0_91, %c640_92], %69 {strides = array<i32>} : memref<256x1152xbf16, #tpu.memory_space<vmem>>, vector<256x128xbf16>,
    %c2_93 = arith.constant 2 : index
    %c0_94 = arith.constant 0 : index
    %c0_95 = arith.constant 0 : index
    %71 = vector.load %arg6[%c2_93, %c0_94, %c0_95] : memref<18x18x128xf32, #tpu.memory_space<vmem>>, vector<16x16x128xf32>
    %72 = arith.truncf %71 : vector<16x16x128xf32> to vector<16x16x128xbf16>
    %73 = vector.shape_cast %72 : vector<16x16x128xbf16> to vector<256x128xbf16>
    %c0_96 = arith.constant 0 : index
    %c768_97 = arith.constant 768 : index
    %74 = vector.load %arg5[%c0_96, %c768_97] : memref<256x1152xbf16, #tpu.memory_space<vmem>>, vector<256x128xbf16>
    tpu.vector_store %arg5[%c0_96, %c768_97], %73 {strides = array<i32>} : memref<256x1152xbf16, #tpu.memory_space<vmem>>, vector<256x128xbf16>,
    %c2_98 = arith.constant 2 : index
    %c1_99 = arith.constant 1 : index
    %c0_100 = arith.constant 0 : index
    %75 = vector.load %arg6[%c2_98, %c1_99, %c0_100] : memref<18x18x128xf32, #tpu.memory_space<vmem>>, vector<16x16x128xf32>
    %76 = arith.truncf %75 : vector<16x16x128xf32> to vector<16x16x128xbf16>
    %77 = vector.shape_cast %76 : vector<16x16x128xbf16> to vector<256x128xbf16>
    %c0_101 = arith.constant 0 : index
    %c896_102 = arith.constant 896 : index
    %78 = vector.load %arg5[%c0_101, %c896_102] : memref<256x1152xbf16, #tpu.memory_space<vmem>>, vector<256x128xbf16>
    tpu.vector_store %arg5[%c0_101, %c896_102], %77 {strides = array<i32>} : memref<256x1152xbf16, #tpu.memory_space<vmem>>, vector<256x128xbf16>,
    %c2_103 = arith.constant 2 : index
    %c2_104 = arith.constant 2 : index
    %c0_105 = arith.constant 0 : index
    %79 = vector.load %arg6[%c2_103, %c2_104, %c0_105] : memref<18x18x128xf32, #tpu.memory_space<vmem>>, vector<16x16x128xf32>
    %80 = arith.truncf %79 : vector<16x16x128xf32> to vector<16x16x128xbf16>
    %81 = vector.shape_cast %80 : vector<16x16x128xbf16> to vector<256x128xbf16>
    %c0_106 = arith.constant 0 : index
    %c1024_107 = arith.constant 1024 : index
    %82 = vector.load %arg5[%c0_106, %c1024_107] : memref<256x1152xbf16, #tpu.memory_space<vmem>>, vector<256x128xbf16>
    tpu.vector_store %arg5[%c0_106, %c1024_107], %81 {strides = array<i32>} : memref<256x1152xbf16, #tpu.memory_space<vmem>>, vector<256x128xbf16>,
    %c0_108 = arith.constant 0 : index
    %c0_109 = arith.constant 0 : index
    %83 = vector.load %arg5[%c0_108, %c0_109] : memref<256x1152xbf16, #tpu.memory_space<vmem>>, vector<256x1152xbf16>
    %c0_110 = arith.constant 0 : index
    %c0_111 = arith.constant 0 : index
    %84 = vector.load %arg3[%c0_110, %c0_111] : memref<1152x128xbf16, #tpu.memory_space<vmem>>, vector<1152x128xbf16>
    %cst_112 = arith.constant dense<0.000000e+00> : vector<256x128xf32>
    %85 = tpu.matmul %83, %84, %cst_112 {dimension_numbers = #tpu.dot_dimension_numbers<[1], [0], [0], [1], [0, 0, 1, 1], [], []>} : vector<256x1152xbf16>, vector<1152x128xbf16>, vector<256x128xf32> -> vector<256x128xf32>
    %86 = vector.shape_cast %85 : vector<256x128xf32> to vector<16x16x128xf32>
    %c1_113 = arith.constant 1 : index
    %c1_114 = arith.constant 1 : index
    %c0_115 = arith.constant 0 : index
    %87 = vector.load %arg6[%c1_113, %c1_114, %c0_115] : memref<18x18x128xf32, #tpu.memory_space<vmem>>, vector<16x16x128xf32>
    %88 = arith.addf %86, %87 : vector<16x16x128xf32>
    %c0_116 = arith.constant 0 : index
    %c0_117 = arith.constant 0 : index
    %c0_118 = arith.constant 0 : index
    %c0_119 = arith.constant 0 : index
    %89 = vector.load %arg4[%c0_116, %c0_117, %c0_118, %c0_119] : memref<1x16x16x128xf32, #tpu.memory_space<vmem>>, vector<1x16x16x128xf32>
    %90 = vector.shape_cast %89 : vector<1x16x16x128xf32> to vector<16x16x128xf32>
    %91 = vector.shape_cast %88 : vector<16x16x128xf32> to vector<1x16x16x128xf32>
    tpu.vector_store %arg4[%c0_116, %c0_117, %c0_118, %c0_119], %91 {strides = array<i32>} : memref<1x16x16x128xf32, #tpu.memory_space<vmem>>, vector<1x16x16x128xf32>,
    return
  }
  func.func @transform_0(%arg0: i32) -> (i32, i32, i32, i32) {
    %c0_i32 = arith.constant 0 : i32
    %c0_i32_0 = arith.constant 0 : i32
    %c0_i32_1 = arith.constant 0 : i32
    %c0_i32_2 = arith.constant 0 : i32
    return %arg0, %c0_i32, %c0_i32_0, %c0_i32_1 : i32, i32, i32, i32
  }
  func.func @transform_1(%arg0: i32) -> (i32, i32) {
    %c0_i32 = arith.constant 0 : i32
    %c0_i32_0 = arith.constant 0 : i32
    %c0_i32_1 = arith.constant 0 : i32
    return %c0_i32, %c0_i32_0 : i32, i32
  }
  func.func @transform_2(%arg0: i32) -> (i32, i32) {
    %c0_i32 = arith.constant 0 : i32
    %c0_i32_0 = arith.constant 0 : i32
    %c0_i32_1 = arith.constant 0 : i32
    return %c0_i32, %c0_i32_0 : i32, i32
  }
  func.func @transform_3(%arg0: i32) -> (i32, i32, i32, i32) {
    %c0_i32 = arith.constant 0 : i32
    %c0_i32_0 = arith.constant 0 : i32
    %c0_i32_1 = arith.constant 0 : i32
    %c0_i32_2 = arith.constant 0 : i32
    return %arg0, %c0_i32, %c0_i32_0, %c0_i32_1 : i32, i32, i32, i32
  }
}

</mosaic_0001>

<bundles_post_ra>
// kernel: tpu_custom_call.1
= control target key start
LH: loop header
LB: loop body
LE: loop exit
PB: predicated region body
PF: predicated region fallthrough
CT: control target
= control target key end

     0   :  { %8 = vsyncpa [#allocation5], 0  ;;  %s11234_s0 = inlined_call_operand.vmem [shape: bf16[2,18,18,128], index: 0, kind: input, shape index: {}]   ;;  %s11235_s1 = inlined_call_operand.vmem [shape: bf16[1152,128], index: 1, kind: input, shape index: {}]   ;;  %s11236_s2 = inlined_call_operand.hbm [shape: bf16[1152,128], index: 2, kind: input, shape index: {}]   ;;  %s11237_s3 = inlined_call_operand.hbm [shape: f32[2,16,16,128], index: 3, kind: output, shape index: {}]  }
   0x1   :  { %9 = vsyncpa [#allocation6], 0 }
   0x2   :  { %11 = vsyncpa [#allocation6 + $0x1], 0  ;;  %s8930_s12 = smov 0   ;;  %s8932_s13 = smov 0  }
   0x3   :  { %s8934_s14 = smov 0   ;;  %s8936_s15 = smov 0  }
   0x4 LB: > { %s8951_s16 = sadd.s32 4294967295, %s8901_s15   ;;  %s6912_s17 = sadd.s32 4294967294, %s8901_s15   ;;  %s8901_s15 = sphi %s8936_s15, %s11295_s15   ;;  %s8897_s14 = sphi %s8934_s14, %s11294_s14   ;;  %s8893_s13 = sphi %s8932_s13, %s11293_s13   ;;  %s8889_s12 = sphi %s8930_s12, %s11292_s12  }
   0x5   : > { %s8955_s18 = sadd.s32 1, %s8901_s15   ;;  %s92_s19 = sadd.s32 1, %s8897_s14 }
   0x6   : > { %s89_s20 = ssub.s32 %s8901_s15, %s8955_s18  ;;  %p102_p0 = scmp.ne.s32.totalorder %s8897_s14, %s8893_s13 }
   0x7   : > { %p90_p1 = scmp.eq.s32.totalorder %s89_s20, 0  ;;  %p103_p2 = scmp.eq.s32.totalorder %s8951_s16, 1 }
   0x8   : > { %p108_p3 = scmp.ne.s32.totalorder %s8893_s13, %s8889_s12  ;;  %p109_p4 = scmp.eq.s32.totalorder %s6912_s17, 1 }
   0x9   : > { %s8966_s21 = scalar_select %p90_p1, %s8897_s14, %s92_s19  }
   0xa   : > { %p8968_p5 = por %p103_p2, %p102_p0  ;;  %p8972_p6 = por %p109_p4, %p108_p3 }
   0xb   : > { %p6913_p7 = scmp.ge.s32.totalorder %s8901_s15, 1  ;;  %p116_p8 = scmp.lt.s32.totalorder %s8901_s15, 3 }
   0xc   : > { %s11241_s22 = scalar_select %p8968_p5, 1, 0 }
   0xd   : > { %s11242_s23 = scalar_select %p8972_p6, 1, 0 }
   0xe   : > { %p11238_p9 = scmp.eq.s32.totalorder %s8951_s16, 0  ;;  %p8979_p10 = pnand %p6913_p7, %p116_p8 }
   0xf   : > { %s8903_s25 = smov [#allocation4]   ;;  %s8807_s30 = scalar_lea.hbm %s11236_s2, 9216 }
  0x10   : > { %s11243_s24 = scalar_select %p8979_p10, 1, 0 }
  0x11   : > { %s131_s26 = sshll.u32 %s8903_s25, 4  ;;  %p8565_p11 = pneg %p8979_p10  ;;  %s132_s26 = int_to_ptr.vmem [resolvable:$true] %s131_s26 }
  0x12   : > { %p8808_p13 = scmp.ne.s32.totalorder %s11236_s2, %s8807_s30  ;;  %p8814_p3 = scmp.lt.u32.totalorder %s8807_s30, %s11236_s2 }
  0x13   : > { %p8987_p12 = pnand %p11238_p9, %p8565_p11 }
  0x15   : > { %p8809_p0 = pneg %p8987_p12 }
  0x17   : > { %p8810_p1 = pnand %p8809_p0, %p8808_p13 }
  0x19   : > { %p8811_p2 = pneg %p8810_p1 }
  0x1b   : > { %p8816_p4 = pnand %p8814_p3, %p8811_p2 }
  0x1d   : > { %8819 = shalt.err (!%p8816_p4)
}
  0x1e   : > { %s8820_s8 = scalar_lea.vmem %s132_s26, 9216  ;;  %p8828_p9 = scmp.lt.s32.totalorder %s132_s26, %s132_s26 }
  0x1f   : > { %p8821_p7 = scmp.ne.s32.totalorder %s132_s26, %s8820_s8  ;;  %p8829_p6 = scmp.lt.s32.totalorder %s8820_s8, %s8820_s8 }
  0x21   : > { %p8823_p8 = pnand %p8821_p7, %p8809_p0  ;;  %p8830_p5 = por %p8829_p6, %p8828_p9 }
  0x23   : > { %p8824_p11 = pneg %p8823_p8 }
  0x25   : > { %p8831_p10 = pnand %p8830_p5, %p8824_p11 }
  0x27   : > { %8834 = shalt.err (!%p8831_p10)
}
  0x28   : > { %s8904_s9 = smov 64   ;;  %s8905_s10 = smov 4  }
  0x29   : > { %8568 = dma.hbm_to_vmem [thread:$0]  (!%p8987_p12), %s11236_s2, 9216, %s132_s26, [#allocation5], %s8904_s9, %s8904_s9, %s8905_s10  }
  0x2a   : > { %p11245_p13 = scmp.ne.s32.totalorder %s11243_s24, 0 }
  0x2c   : > { %155 = sbr.rel (%p11245_p13) target bundleno = 1134 (0x46e), region = 32 }
  0x33   : > { %p11246_p1 = scmp.eq.s32.totalorder %s8951_s16, 0 }
  0x35   : > { %8880 = dma.done.wait (%p11246_p1), [#allocation5], 9216   ;;  %p11247_p0 = pmov %p11246_p1 }
  0x36   : > { %v8614_v0 = vld [vmem:[%s11235_s1 + $0x40] sm:$0xff]   ;;  %v8618_v4 = vld [vmem:[%s11235_s1 + $0x48] sm:$0xff]   ;;  %v8622_v8 = vld [vmem:[%s11235_s1 + $0x50] sm:$0xff]   ;;  %p179_p5 = scmp.lt.s32.totalorder %s8951_s16, 1  ;;  %vm420_vm0 = vsmask.f32 3328 }
  0x37   : > { %8882 = vsyncadd (%p11247_p0), [#allocation5], 4294958080  ;;  %v8615_v1 = vld [vmem:[%s11235_s1 + $0xc0] sm:$0xff]   ;;  %7518 = vmatprep.subr.bf16.mxu0 %v8614_v0  ;;  %v8619_v5 = vld [vmem:[%s11235_s1 + $0xc8] sm:$0xff]   ;;  %vm421_vm1 = vsmask.f32 7440 }
  0x38   : > { %v8616_v2 = vld [vmem:[%s11235_s1] sm:$0xff]   ;;  %7630 = vmatprep.subr.bf16.mxu1 %v8615_v1  ;;  %v8620_v6 = vld [vmem:[%s11235_s1 + $0x8] sm:$0xff]   ;;  %v8623_v9 = vld [vmem:[%s11235_s1 + $0xd0] sm:$0xff]   ;;  %s180_s30 = scalar_select %p179_p5, %s8951_s16, 1  ;;  %vm983_vm2 = vcmask 1042432   ;;  %vm984_vm3 = vcmask 1046532  }
  0x39   : > { %v8617_v3 = vld [vmem:[%s11235_s1 + $0x80] sm:$0xff]   ;;  %7519 = vmatpush3.bf16.msra.mxu0 %v8616_v2  ;;  %v8621_v7 = vld [vmem:[%s11235_s1 + $0x88] sm:$0xff]   ;;  %v8624_v10 = vld [vmem:[%s11235_s1 + $0x10] sm:$0xff]   ;;  %s7517_s7 = sshll.u32 %s8951_s16, 12  ;;  %p11290_p9 = scmp.ne.s32.totalorder %s11241_s22, 0 }
  0x3a   : > { %7631 = vmatpush3.bf16.msra.mxu1 %v8617_v3  ;;  %7520 = vmatprep.subr.bf16.mxu0 %v8618_v4  ;;  %v8625_v11 = vld [vmem:[%s11235_s1 + $0x90] sm:$0xff]   ;;  %v8626_v12 = vld [vmem:[%s11235_s1 + $0x58] sm:$0xff]   ;;  %v8630_v16 = vld [vmem:[%s11235_s1 + $0x60] sm:$0xff]   ;;  %s8558_s17 = smul.u32 216, %s180_s30  ;;  %s11184_s16 = scalar_lea.hbm %s11237_s3, %s7517_s7 }
  0x3b   : > { %7632 = vmatprep.subr.bf16.mxu1 %v8619_v5  ;;  %v8627_v13 = vld [vmem:[%s11235_s1 + $0xd8] sm:$0xff]   ;;  %v8631_v17 = vld [vmem:[%s11235_s1 + $0xe0] sm:$0xff]   ;;  %v8634_v20 = vld [vmem:[%s11235_s1 + $0x68] sm:$0xff]   ;;  %s8907_s19 = smov [#allocation7]  }
  0x3c   : > { %v8628_v14 = vld [vmem:[%s11235_s1 + $0x18] sm:$0xff]   ;;  %v8632_v18 = vld [vmem:[%s11235_s1 + $0x20] sm:$0xff]   ;;  %v8635_v21 = vld [vmem:[%s11235_s1 + $0xe8] sm:$0xff]   ;;  %s9108_s5 = scalar_lea.vmem %s11234_s0, %s8558_s17  ;;  %s8839_s20 = sshll.u32 %s8907_s19, 4  ;;  %s8840_s20 = int_to_ptr.vmem [resolvable:$false] %s8839_s20 }
  0x3d   : > { %7521 = vmatpush3.bf16.msra.mxu0 %v8620_v6  ;;  %v8629_v15 = vld [vmem:[%s11235_s1 + $0x98] sm:$0xff]   ;;  %v8633_v19 = vld [vmem:[%s11235_s1 + $0xa0] sm:$0xff]   ;;  %v8636_v22 = vld [vmem:[%s11235_s1 + $0x28] sm:$0xff]   ;;  %s8841_s25 = scalar_lea.vmem %s8840_s20, 8192 }
  0x3e   : > { %7633 = vmatpush3.bf16.msra.mxu1 %v8621_v7  ;;  %7522 = vmatprep.subr.bf16.mxu0 %v8622_v8  ;;  %v8637_v23 = vld [vmem:[%s11235_s1 + $0xa8] sm:$0xff]   ;;  %v8638_v24 = vld [vmem:[%s11235_s1 + $0x70] sm:$0xff]   ;;  %v8642_v28 = vld [vmem:[%s11235_s1 + $0x78] sm:$0xff]  }
  0x3f   : > { %7634 = vmatprep.subr.bf16.mxu1 %v8623_v9  ;;  %v8639_v25 = vld [vmem:[%s11235_s1 + $0xf0] sm:$0xff]   ;;  %v8643_v29 = vld [vmem:[%s11235_s1 + $0xf8] sm:$0xff]   ;;  %v372_v32 = vld [vmem:[%s9108_s5] sm:$0xf] }
  0x40   : > { %v8640_v26 = vld [vmem:[%s11235_s1 + $0x30] sm:$0xff]   ;;  %v8644_v30 = vld [vmem:[%s11235_s1 + $0x38] sm:$0xff]   ;;  %v373_v33 = vld [vmem:[%s9108_s5 + $0x4] sm:$0xf]  ;;  %v424_v35 = vshrl.u32 %v372_v32, 16  ;;  %v427_v36 = vshll.u32 %v372_v32, 16 }
  0x41   : > { %7523 = vmatpush3.bf16.msra.mxu0 %v8624_v10  ;;  %v8641_v27 = vld [vmem:[%s11235_s1 + $0xb0] sm:$0xff]   ;;  %v8645_v31 = vld [vmem:[%s11235_s1 + $0xb8] sm:$0xff]   ;;  %v374_v34 = vld [vmem:[%s9108_s5 + $0x8] sm:$0x1]  ;;  %v433_v37 = vshll.u32 %v373_v33, 16  ;;  %v437_v38 = vshrl.u32 %v373_v33, 16 }
  0x42   : > { %7635 = vmatpush3.bf16.msra.mxu1 %v8625_v11  ;;  %7524 = vmatprep.subr.bf16.mxu0 %v8626_v12  ;;  %v443_v39 = vshll.u32 %v374_v34, 16  ;;  %v8646_v40 = vld [vmem:[%s9108_s5 + $0xc] sm:$0xff]   ;;  %v426_v41 = vrot.slane %v424_v35, 4  ;;  %v429_v42 = vrot.slane %v427_v36, 5  ;;  %v887_v46 = vld [vmem:[%s9108_s5] sm:$0xe]  ;;  %vm9124_vm4 = vmor %vm983_vm2, %vm984_vm3 }
  0x43   : > { %7636 = vmatprep.subr.bf16.mxu1 %v8627_v13  ;;  %v435_v43 = vrot.slane %v433_v37, 5  ;;  %v439_v44 = vrot.slane %v437_v38, 4  ;;  %3981 = vmatprep.mubr.bf16.mxu1 %v8646_v40  ;;  %v888_v47 = vld [vmem:[%s9108_s5 + $0x4] sm:$0xf]  ;;  %vm9130_vm5 = vmor %vm420_vm0, %vm421_vm1  ;;  %v889_v52 = vld [vmem:[%s9108_s5 + $0x8] sm:$0x1] }
  0x44   : > { %v445_v45 = vrot.slane %v443_v39, 5  ;;  %v430_v50 = vor.u32 %v429_v42, %v426_v41  ;;  %v6952_v53 = vrot.slane %v887_v46, 9  ;;  %v988_v54 = vrot.slane %v888_v47, 5  ;;  %v8648_v56 = vld [vmem:[%s11235_s1 + $0x140] sm:$0xff]   ;;  %v375_v63 = vld [vmem:[%s9108_s5 + $0xc] sm:$0xf] }
  0x45   : > { %7525 = vmatpush3.bf16.msra.mxu0 %v8628_v14  ;;  %v440_v51 = vor.u32 %v439_v44, %v435_v43  ;;  %v991_v55 = vrot.slane %v889_v52, 5  ;;  %v8647_v59 = vld [vmem:[%s9108_s5] sm:$0xff]   ;;  %v376_v0 = vld [vmem:[%s9108_s5 + $0x10] sm:$0xf]  ;;  %v377_v1 = vld [vmem:[%s9108_s5 + $0x14] sm:$0x1] }
  0x46   : > { %7637 = vmatpush3.bf16.msra.mxu1 %v8629_v15  ;;  %7526 = vmatprep.subr.bf16.mxu0 %v8630_v16  ;;  %v431_v57 = vrot.slane %v430_v50, 4  ;;  %v989_v60 = vsel %vm9124_vm4, %v6952_v53, %v988_v54  ;;  %v990_v61 = vrot.slane %v988_v54, 4  ;;  %v8649_v62 = vld [vmem:[%s11235_s1 + $0x100] sm:$0xff]   ;;  %v448_v5 = vshrl.u32 %v375_v63, 16  ;;  %v8650_v6 = vld [vmem:[%s9108_s5 + $0x18] sm:$0xff]   ;;  %v8651_v39 = vld [vmem:[%s9108_s5 + $0xc] sm:$0xff]  }
  0x47   : > { %7638 = vmatprep.subr.bf16.mxu1 %v8631_v17  ;;  %v441_v58 = vrot.slane %v440_v51, 4  ;;  %v451_v9 = vshll.u32 %v375_v63, 16  ;;  %v457_v10 = vshll.u32 %v376_v0, 16  ;;  %v461_v12 = vshrl.u32 %v376_v0, 16  ;;  %v890_v14 = vld [vmem:[%s9108_s5 + $0xc] sm:$0xe] }
  0x48   : > { %v436_v2 = vsel %vm9130_vm5, %v431_v57, %v435_v43  ;;  %v992_v4 = vsel %vm9124_vm4, %v990_v61, %v991_v55  ;;  %v450_v11 = vrot.slane %v448_v5, 4  ;;  %v467_v13 = vshll.u32 %v377_v1, 16  ;;  %v891_v17 = vld [vmem:[%s9108_s5 + $0x10] sm:$0xf]  ;;  %v8652_v37 = vld [vmem:[%s9108_s5 + $0x24] sm:$0xff]  }
  0x49   : > { %7527 = vmatpush3.bf16.msra.mxu0 %v8632_v18  ;;  %v446_v3 = vsel %vm9130_vm5, %v441_v58, %v445_v45  ;;  %v6968_v8 = vcombine.low %v989_v60, %v992_v4  ;;  %v453_v15 = vrot.slane %v451_v9, 5  ;;  %v459_v16 = vrot.slane %v457_v10, 5  ;;  %v892_v18 = vld [vmem:[%s9108_s5 + $0x14] sm:$0x1]  ;;  %v8654_v43 = vld [vmem:[%s11235_s1 + $0x148] sm:$0xff]  }
  0x4a   : > { %7639 = vmatpush3.bf16.msra.mxu1 %v8633_v19  ;;  %7528 = vmatprep.subr.bf16.mxu0 %v8634_v20  ;;  %v6936_v7 = vcombine.low %v436_v2, %v446_v3  ;;  %v463_v19 = vrot.slane %v461_v12, 4  ;;  %v469_v20 = vrot.slane %v467_v13, 5  ;;  %v893_v50 = vld [vmem:[%s9108_s5 + $0x18] sm:$0xe]  ;;  %v894_v54 = vld [vmem:[%s9108_s5 + $0x1c] sm:$0xf] }
  0x4b   : > { %7640 = vmatprep.subr.bf16.mxu1 %v8635_v21  ;;  %v6953_v21 = vrot.slane %v890_v14, 9  ;;  %v895_v55 = vld [vmem:[%s9108_s5 + $0x20] sm:$0x1]  ;;  %v381_v2 = vld [vmem:[%s9108_s5 + $0x24] sm:$0xf]  ;;  %v8656_v9 = vld [vmem:[%s9108_s5 + $0x30] sm:$0xff]  }
  0x4c   : > { %3820 = vmatprep.mubr.bf16.mxu0 %v6936_v7  ;;  %v1005_v60 = vrot.slane %v895_v55, 5  ;;  %v382_v3 = vld [vmem:[%s9108_s5 + $0x28] sm:$0xf]  ;;  %v383_v5 = vld [vmem:[%s9108_s5 + $0x2c] sm:$0x1]  ;;  %v499_v7 = vshll.u32 %v381_v2, 16 }
  0x4d   : > { %7529 = vmatpush3.bf16.msra.mxu0 %v8636_v22  ;;  %v995_v22 = vrot.slane %v891_v17, 5  ;;  %v509_v12 = vshrl.u32 %v382_v3, 16  ;;  %v515_v13 = vshll.u32 %v383_v5, 16  ;;  %v387_v5 = vld [vmem:[%s9108_s5 + $0x3c] sm:$0xf]  ;;  %v8746_v48 = vld [vmem:[#allocation4 + $0x70] sm:$0xff]  }
  0x4e   : > { %7641 = vmatpush3.bf16.msra.mxu1 %v8637_v23  ;;  %7530 = vmatprep.subr.bf16.mxu0 %v8638_v24  ;;  %v378_v23 = vld [vmem:[%s9108_s5 + $0x18] sm:$0xf]  ;;  %v454_v24 = vor.u32 %v453_v15, %v450_v11  ;;  %v501_v17 = vrot.slane %v499_v7, 5 }
  0x4f   : > { %7642 = vmatprep.subr.bf16.mxu1 %v8639_v25  ;;  %v998_v25 = vrot.slane %v892_v18, 5  ;;  %v475_v32 = vshll.u32 %v378_v23, 16  ;;  %v8653_v18 = vld [vmem:[%s9108_s5 + $0x18] sm:$0xff]  }
  0x50   : > { %v455_v33 = vrot.slane %v454_v24, 4  ;;  %v897_v24 = vld [vmem:[%s9108_s5 + $0x28] sm:$0xf] }
  0x51   : > { %7531 = vmatpush3.bf16.msra.mxu0 %v8640_v26  ;;  %v379_v26 = vld [vmem:[%s9108_s5 + $0x1c] sm:$0xf]  ;;  %v477_v41 = vrot.slane %v475_v32, 5 }
  0x52   : > { %7643 = vmatpush3.bf16.msra.mxu1 %v8641_v27  ;;  %7532 = vmatprep.subr.bf16.mxu0 %v8642_v28  ;;  %v380_v27 = vld [vmem:[%s9108_s5 + $0x20] sm:$0x1]  ;;  %v472_v28 = vshrl.u32 %v378_v23, 16  ;;  %v481_v35 = vshll.u32 %v379_v26, 16  ;;  %v485_v36 = vshrl.u32 %v379_v26, 16  ;;  %v460_v44 = vsel %vm9130_vm5, %v455_v33, %v459_v16 }
  0x53   : > { %7644 = vmatprep.subr.bf16.mxu1 %v8643_v29  ;;  %v464_v29 = vor.u32 %v463_v19, %v459_v16  ;;  %v491_v42 = vshll.u32 %v380_v27, 16  ;;  %v517_v23 = vrot.slane %v515_v13, 5  ;;  %v386_v33 = vld [vmem:[%s9108_s5 + $0x38] sm:$0x1] }
  0x54   : > { %v474_v34 = vrot.slane %v472_v28, 4  ;;  %v483_v46 = vrot.slane %v481_v35, 5  ;;  %v487_v47 = vrot.slane %v485_v36, 4  ;;  %v1009_v28 = vrot.slane %v897_v24, 5 }
  0x55   : > { %7533 = vmatpush3.bf16.msra.mxu0 %v8644_v30  ;;  %v996_v30 = vsel %vm9124_vm4, %v6953_v21, %v995_v22  ;;  %v465_v38 = vrot.slane %v464_v29, 4  ;;  %v493_v53 = vrot.slane %v491_v42, 5  ;;  %v896_v21 = vld [vmem:[%s9108_s5 + $0x24] sm:$0xe] }
  0x56   : > { %7645 = vmatpush3.bf16.msra.mxu1 %v8645_v31  ;;  %7742 = vmatprep.subr.bf16.mxu0 %v8648_v56  ;;  %v997_v31 = vrot.slane %v995_v22, 4  ;;  %v478_v52 = vor.u32 %v477_v41, %v474_v34  ;;  %v6954_v56 = vrot.slane %v893_v50, 9  ;;  %v488_v58 = vor.u32 %v487_v47, %v483_v46 }
  0x57   : > { %v470_v51 = vsel %vm9130_vm5, %v465_v38, %v469_v20  ;;  %v511_v20 = vrot.slane %v509_v12, 4  ;;  %v6955_v26 = vrot.slane %v896_v21, 9 }
  0x58   : > { %3821 = vmatmul.mubr.bf16.vlgmr.msra.gmra.mrb[0].mxu0 %v8647_v59  ;;  %v999_v40 = vsel %vm9124_vm4, %v997_v31, %v998_v25  ;;  %v6937_v57 = vcombine.low %v460_v44, %v470_v51  ;;  %v1002_v59 = vrot.slane %v894_v54, 5  ;;  %v479_v61 = vrot.slane %v478_v52, 4  ;;  %v898_v25 = vld [vmem:[%s9108_s5 + $0x2c] sm:$0x1]  ;;  %v385_v31 = vld [vmem:[%s9108_s5 + $0x34] sm:$0xf] }
  0x59   : > { %3982 = vmatmul.mubr.bf16.vlgmr.msra.gmra.mrb[0].mxu1 %v6968_v8  ;;  %7743 = vmatpush3.bf16.msra.mxu0 %v8649_v62  ;;  %v6969_v45 = vcombine.low %v996_v30, %v999_v40  ;;  %v8655_v62 = vld [vmem:[%s11235_s1 + $0x108] sm:$0xff]   ;;  %v489_v63 = vrot.slane %v488_v58, 4  ;;  %v505_v8 = vshll.u32 %v382_v3, 16  ;;  %v1012_v29 = vrot.slane %v898_v25, 5  ;;  %v384_v30 = vld [vmem:[%s9108_s5 + $0x30] sm:$0xf] }
  0x5a   : > { %3989 = vmatprep.mubr.bf16.mxu1 %v8650_v6  ;;  %7744 = vmatprep.subr.bf16.mxu0 %v8654_v43  ;;  %v1003_v0 = vsel %vm9124_vm4, %v6954_v56, %v1002_v59  ;;  %v1004_v1 = vrot.slane %v1002_v59, 4  ;;  %v484_v4 = vsel %vm9130_vm5, %v479_v61, %v483_v46  ;;  %v496_v6 = vshrl.u32 %v381_v2, 16  ;;  %v8660_v46 = vld [vmem:[%s11235_s1 + $0x150] sm:$0xff]   ;;  %v8657_v54 = vld [vmem:[%s9108_s5 + $0x24] sm:$0xff]   ;;  %v901_v59 = vld [vmem:[%s9108_s5 + $0x38] sm:$0x1] }
  0x5b   : > { %3828 = vmatprep.mubr.bf16.mxu0 %v6937_v57  ;;  %v494_v10 = vsel %vm9130_vm5, %v489_v63, %v493_v53  ;;  %v507_v19 = vrot.slane %v505_v8, 5  ;;  %v520_v34 = vshrl.u32 %v384_v30, 16  ;;  %v523_v35 = vshll.u32 %v384_v30, 16  ;;  %v899_v57 = vld [vmem:[%s9108_s5 + $0x30] sm:$0xe] }
  0x5c   : > { %v1006_v11 = vsel %vm9124_vm4, %v1004_v1, %v1005_v60  ;;  %v6938_v14 = vcombine.low %v484_v4, %v494_v10  ;;  %v498_v16 = vrot.slane %v496_v6, 4  ;;  %v529_v36 = vshll.u32 %v385_v31, 16  ;;  %v900_v58 = vld [vmem:[%s9108_s5 + $0x34] sm:$0xf]  ;;  %v388_v8 = vld [vmem:[%s9108_s5 + $0x40] sm:$0xf] }
  0x5d   : > { %7745 = vmatpush3.bf16.msra.mxu0 %v8655_v62  ;;  %v6970_v15 = vcombine.low %v1003_v0, %v1006_v11  ;;  %v512_v27 = vor.u32 %v511_v20, %v507_v19  ;;  %v1010_v38 = vsel %vm9124_vm4, %v6955_v26, %v1009_v28  ;;  %v533_v40 = vshrl.u32 %v385_v31, 16  ;;  %v8661_v0 = vld [vmem:[%s11235_s1 + $0x110] sm:$0xff]   ;;  %v902_v25 = vld [vmem:[%s9108_s5 + $0x3c] sm:$0xe]  ;;  %v903_v26 = vld [vmem:[%s9108_s5 + $0x40] sm:$0xf] }
  0x5e   : > { %v502_v22 = vor.u32 %v501_v17, %v498_v16  ;;  %v522_v42 = vrot.slane %v520_v34, 4  ;;  %v525_v43 = vrot.slane %v523_v35, 5  ;;  %v531_v44 = vrot.slane %v529_v36, 5  ;;  %7746 = vmatprep.subr.bf16.mxu0 %v8660_v46  ;;  %v391_v36 = vld [vmem:[%s9108_s5 + $0x4c] sm:$0xf] }
  0x5f   : > { %v535_v51 = vrot.slane %v533_v40, 4  ;;  %v539_v52 = vshll.u32 %v386_v33, 16  ;;  %v6956_v62 = vrot.slane %v899_v57, 9  ;;  %v1016_v63 = vrot.slane %v900_v58, 5  ;;  %v390_v33 = vld [vmem:[%s9108_s5 + $0x48] sm:$0xf] }
  0x60   : > { %3829 = vmatmul.mubr.bf16.gmra.mrb[4].mxu0 %v8651_v39  ;;  %v503_v32 = vrot.slane %v502_v22, 4  ;;  %v1011_v39 = vrot.slane %v1009_v28, 4  ;;  %v526_v56 = vor.u32 %v525_v43, %v522_v42  ;;  %v1019_v2 = vrot.slane %v901_v59, 5  ;;  %v8659_v28 = vld [vmem:[%s9108_s5 + $0x30] sm:$0xff]   ;;  %v8666_v42 = vld [vmem:[%s11235_s1 + $0x158] sm:$0xff]  }
  0x61   : > { %3990 = vmatmul.mubr.bf16.gmra.mrb[4].mxu1 %v6969_v45  ;;  %3836 = vmatprep.mubr.bf16.mxu0 %v6938_v14  ;;  %v8658_v45 = vld [vmem:[%s9108_s5 + $0x3c] sm:$0xff]   ;;  %v536_v60 = vor.u32 %v535_v51, %v531_v44  ;;  %v541_v61 = vrot.slane %v539_v52, 5  ;;  %v1018_v4 = vrot.slane %v1016_v63, 4  ;;  %v1017_v7 = vsel %vm9124_vm4, %v6956_v62, %v1016_v63  ;;  %v905_v57 = vld [vmem:[%s9108_s5 + $0x48] sm:$0xe] }
  0x62   : > { %3997 = vmatprep.mubr.bf16.mxu1 %v8652_v37  ;;  %v513_v37 = vrot.slane %v512_v27, 4  ;;  %v508_v41 = vsel %vm9130_vm5, %v503_v32, %v507_v19  ;;  %v1013_v50 = vsel %vm9124_vm4, %v1011_v39, %v1012_v29  ;;  %v527_v1 = vrot.slane %v526_v56, 4  ;;  %7747 = vmatpush3.bf16.msra.mxu0 %v8661_v0  ;;  %v904_v27 = vld [vmem:[%s9108_s5 + $0x44] sm:$0x1]  ;;  %v906_v58 = vld [vmem:[%s9108_s5 + $0x4c] sm:$0xf] }
  0x63   : > { %v6971_v55 = vcombine.low %v1010_v38, %v1013_v50  ;;  %v537_v3 = vrot.slane %v536_v60, 4  ;;  %v544_v10 = vshrl.u32 %v387_v5, 16  ;;  %v547_v11 = vshll.u32 %v387_v5, 16  ;;  %7748 = vmatprep.subr.bf16.mxu0 %v8666_v42  ;;  %v398_v42 = vld [vmem:[%s9108_s5 + $0x68] sm:$0x1] }
  0x64   : > { %v518_v47 = vsel %vm9130_vm5, %v513_v37, %v517_v23  ;;  %v532_v6 = vsel %vm9130_vm5, %v527_v1, %v531_v44  ;;  %v1020_v13 = vsel %vm9124_vm4, %v1018_v4, %v1019_v2  ;;  %v553_v14 = vshll.u32 %v388_v8, 16  ;;  %v8662_v23 = vld [vmem:[%s9108_s5 + $0x48] sm:$0xff]   ;;  %v392_v37 = vld [vmem:[%s9108_s5 + $0x50] sm:$0x1]  ;;  %v8664_v1 = vld [vmem:[%s9108_s5 + $0x54] sm:$0xff]  }
  0x65   : > { %v6939_v53 = vcombine.low %v508_v41, %v518_v47  ;;  %v542_v12 = vsel %vm9130_vm5, %v537_v3, %v541_v61  ;;  %v546_v17 = vrot.slane %v544_v10, 4  ;;  %v6972_v19 = vcombine.low %v1017_v7, %v1020_v13  ;;  %v8667_v47 = vld [vmem:[%s11235_s1 + $0x118] sm:$0xff]   ;;  %v907_v61 = vld [vmem:[%s9108_s5 + $0x50] sm:$0x1] }
  0x66   : > { %v6940_v16 = vcombine.low %v532_v6, %v542_v12  ;;  %v555_v20 = vrot.slane %v553_v14, 5  ;;  %v6957_v31 = vrot.slane %v902_v25, 9  ;;  %v1023_v32 = vrot.slane %v903_v26, 5  ;;  %7749 = vmatpush3.bf16.msra.mxu0 %v8667_v47  ;;  %v8663_v6 = vld [vmem:[%s9108_s5 + $0x3c] sm:$0xff]  }
  0x67   : > { %v1026_v35 = vrot.slane %v904_v27, 5  ;;  %v568_v41 = vshrl.u32 %v390_v33, 16  ;;  %v571_v44 = vshll.u32 %v390_v33, 16  ;;  %v581_v46 = vshrl.u32 %v391_v36, 16  ;;  %v395_v12 = vld [vmem:[%s9108_s5 + $0x5c] sm:$0x1] }
  0x68   : > { %3837 = vmatmul.mubr.bf16.gmra.mrb[8].mxu0 %v8653_v18  ;;  %v549_v18 = vrot.slane %v547_v11, 5  ;;  %v1024_v39 = vsel %vm9124_vm4, %v6957_v31, %v1023_v32  ;;  %v1025_v40 = vrot.slane %v1023_v32, 4  ;;  %v6958_v62 = vrot.slane %v905_v57, 9  ;;  %v8668_v27 = vld [vmem:[%s9108_s5 + $0x60] sm:$0xff]   ;;  %v909_v32 = vld [vmem:[%s9108_s5 + $0x58] sm:$0xf] }
  0x69   : > { %3998 = vmatmul.mubr.bf16.gmra.mrb[8].mxu1 %v6970_v15  ;;  %3844 = vmatprep.mubr.bf16.mxu0 %v6939_v53  ;;  %v557_v15 = vshrl.u32 %v388_v8, 16  ;;  %v570_v52 = vrot.slane %v568_v41, 4  ;;  %v587_v53 = vshll.u32 %v392_v37, 16  ;;  %v583_v60 = vrot.slane %v581_v46, 4  ;;  %v393_v8 = vld [vmem:[%s9108_s5 + $0x54] sm:$0xf] }
  0x6a   : > { %4005 = vmatprep.mubr.bf16.mxu1 %v8656_v9  ;;  %v389_v9 = vld [vmem:[%s9108_s5 + $0x44] sm:$0x1]  ;;  %v550_v24 = vor.u32 %v549_v18, %v546_v17  ;;  %v1027_v51 = vsel %vm9124_vm4, %v1025_v40, %v1026_v35  ;;  %v1030_v63 = vrot.slane %v906_v58, 5  ;;  %v1033_v2 = vrot.slane %v907_v61, 5  ;;  %v910_v33 = vld [vmem:[%s9108_s5 + $0x5c] sm:$0x1] }
  0x6b   : > { %v559_v21 = vrot.slane %v557_v15, 4  ;;  %v563_v22 = vshll.u32 %v389_v9, 16  ;;  %v6973_v59 = vcombine.low %v1024_v39, %v1027_v51  ;;  %v589_v4 = vrot.slane %v587_v53, 5  ;;  %v394_v9 = vld [vmem:[%s9108_s5 + $0x58] sm:$0xf]  ;;  %v8665_v35 = vld [vmem:[%s9108_s5 + $0x48] sm:$0xff]  }
  0x6c   : > { %v551_v34 = vrot.slane %v550_v24, 4  ;;  %v1032_v5 = vrot.slane %v1030_v63, 4  ;;  %v1031_v11 = vsel %vm9124_vm4, %v6958_v62, %v1030_v63  ;;  %v592_v13 = vshrl.u32 %v393_v8, 16  ;;  %v396_v39 = vld [vmem:[%s9108_s5 + $0x60] sm:$0xf] }
  0x6d   : > { %v560_v29 = vor.u32 %v559_v21, %v555_v20  ;;  %v565_v30 = vrot.slane %v563_v22, 5  ;;  %v595_v14 = vshll.u32 %v393_v8, 16  ;;  %v601_v17 = vshll.u32 %v394_v9, 16  ;;  %v397_v40 = vld [vmem:[%s9108_s5 + $0x64] sm:$0xf] }
  0x6e   : > { %v556_v43 = vsel %vm9130_vm5, %v551_v34, %v555_v20  ;;  %v605_v18 = vshrl.u32 %v394_v9, 16  ;;  %v594_v20 = vrot.slane %v592_v13, 4  ;;  %v611_v22 = vshll.u32 %v395_v12, 16  ;;  %v911_v63 = vld [vmem:[%s9108_s5 + $0x60] sm:$0xe] }
  0x6f   : > { %v561_v38 = vrot.slane %v560_v29, 4  ;;  %v597_v21 = vrot.slane %v595_v14, 5  ;;  %v603_v25 = vrot.slane %v601_v17, 5  ;;  %v1037_v37 = vrot.slane %v909_v32, 5  ;;  %v399_v13 = vld [vmem:[%s9108_s5 + $0x6c] sm:$0xf] }
  0x70   : > { %3845 = vmatmul.mubr.bf16.gmra.mrb[12].mxu0 %v8657_v54  ;;  %v607_v26 = vrot.slane %v605_v18, 4  ;;  %v613_v31 = vrot.slane %v611_v22, 5  ;;  %v629_v51 = vshrl.u32 %v397_v40, 16  ;;  %v640_v17 = vshrl.u32 %v399_v13, 16  ;;  %v915_v32 = vld [vmem:[%s9108_s5 + $0x70] sm:$0xf] }
  0x71   : > { %4006 = vmatmul.mubr.bf16.gmra.mrb[12].mxu1 %v6971_v55  ;;  %3852 = vmatprep.mubr.bf16.mxu0 %v6940_v16  ;;  %v566_v50 = vsel %vm9130_vm5, %v561_v38, %v565_v30  ;;  %v573_v55 = vrot.slane %v571_v44, 5  ;;  %v1034_v16 = vsel %vm9124_vm4, %v1032_v5, %v1033_v2  ;;  %v598_v30 = vor.u32 %v597_v21, %v594_v20 }
  0x72   : > { %4013 = vmatprep.mubr.bf16.mxu1 %v8658_v45  ;;  %v577_v45 = vshll.u32 %v391_v36, 16  ;;  %v6941_v54 = vcombine.low %v556_v43, %v566_v50  ;;  %v6974_v29 = vcombine.low %v1031_v11, %v1034_v16  ;;  %v608_v36 = vor.u32 %v607_v26, %v603_v25  ;;  %v401_v16 = vld [vmem:[%s9108_s5 + $0x74] sm:$0x1] }
  0x73   : > { %v574_v0 = vor.u32 %v573_v55, %v570_v52  ;;  %v1040_v38 = vrot.slane %v910_v33, 5  ;;  %v599_v41 = vrot.slane %v598_v30, 4  ;;  %v616_v43 = vshrl.u32 %v396_v39, 16  ;;  %v8673_v52 = vld [vmem:[%s11235_s1 + $0x120] sm:$0xff]   ;;  %v914_v30 = vld [vmem:[%s9108_s5 + $0x6c] sm:$0xe] }
  0x74   : > { %v579_v56 = vrot.slane %v577_v45, 5  ;;  %v619_v44 = vshll.u32 %v396_v39, 16  ;;  %v625_v45 = vshll.u32 %v397_v40, 16  ;;  %v609_v46 = vrot.slane %v608_v36, 4  ;;  %v916_v33 = vld [vmem:[%s9108_s5 + $0x74] sm:$0x1] }
  0x75   : > { %v575_v7 = vrot.slane %v574_v0, 4  ;;  %v1039_v50 = vrot.slane %v1037_v37, 4  ;;  %v604_v53 = vsel %vm9130_vm5, %v599_v41, %v603_v25  ;;  %v912_v0 = vld [vmem:[%s9108_s5 + $0x64] sm:$0xf]  ;;  %v6960_v5 = vrot.slane %v911_v63, 9  ;;  %v8678_v41 = vld [vmem:[%s11235_s1 + $0x168] sm:$0xff]  }
  0x76   : > { %v584_v3 = vor.u32 %v583_v60, %v579_v56  ;;  %v621_v55 = vrot.slane %v619_v44, 5  ;;  %v614_v57 = vsel %vm9130_vm5, %v609_v46, %v613_v31  ;;  %v635_v60 = vshll.u32 %v398_v42, 16  ;;  %v402_v40 = vld [vmem:[%s9108_s5 + $0x78] sm:$0xf]  ;;  %v403_v44 = vld [vmem:[%s9108_s5 + $0x7c] sm:$0xf] }
  0x77   : > { %v580_v15 = vsel %vm9130_vm5, %v575_v7, %v579_v56  ;;  %v627_v56 = vrot.slane %v625_v45, 5  ;;  %v1041_v58 = vsel %vm9124_vm4, %v1039_v50, %v1040_v38  ;;  %v6943_v61 = vcombine.low %v604_v53, %v614_v57  ;;  %v404_v45 = vld [vmem:[%s9108_s5 + $0x80] sm:$0x1] }
  0x78   : > { %3853 = vmatmul.mubr.bf16.gmra.mrb[16].mxu0 %v8659_v28  ;;  %v585_v10 = vrot.slane %v584_v3, 4  ;;  %v908_v28 = vld [vmem:[%s9108_s5 + $0x54] sm:$0xe]  ;;  %v637_v3 = vrot.slane %v635_v60, 5  ;;  %v643_v18 = vshll.u32 %v399_v13, 16  ;;  %v1051_v38 = vrot.slane %v915_v32, 5 }
  0x79   : > { %4014 = vmatmul.mubr.bf16.gmra.mrb[16].mxu1 %v6972_v19  ;;  %3860 = vmatprep.mubr.bf16.mxu0 %v6941_v54  ;;  %v6959_v34 = vrot.slane %v908_v28, 9  ;;  %v618_v54 = vrot.slane %v616_v43, 4  ;;  %v1054_v39 = vrot.slane %v916_v33, 5  ;;  %v664_v46 = vshrl.u32 %v402_v40, 16  ;;  %v8671_v53 = vld [vmem:[%s9108_s5 + $0x60] sm:$0xff]  }
  0x7a   : > { %4021 = vmatprep.mubr.bf16.mxu1 %v8662_v23  ;;  %v590_v19 = vsel %vm9130_vm5, %v585_v10, %v589_v4  ;;  %v8672_v23 = vld [vmem:[%s11235_s1 + $0x160] sm:$0xff]   ;;  %v8670_v4 = vld [vmem:[%s9108_s5 + $0x6c] sm:$0xff]   ;;  %v8669_v10 = vld [vmem:[%s9108_s5 + $0x54] sm:$0xff]   ;;  %v645_v25 = vrot.slane %v643_v18, 5  ;;  %v1053_v50 = vrot.slane %v1051_v38, 4  ;;  %v677_v57 = vshrl.u32 %v403_v44, 16 }
  0x7b   : > { %v6942_v24 = vcombine.low %v580_v15, %v590_v19  ;;  %7750 = vmatprep.subr.bf16.mxu0 %v8672_v23  ;;  %v1038_v47 = vsel %vm9124_vm4, %v6959_v34, %v1037_v37  ;;  %v622_v62 = vor.u32 %v621_v55, %v618_v54  ;;  %v400_v15 = vld [vmem:[%s9108_s5 + $0x70] sm:$0xf]  ;;  %v6961_v34 = vrot.slane %v914_v30, 9  ;;  %v8674_v37 = vld [vmem:[%s9108_s5 + $0x78] sm:$0xff]  }
  0x7c   : > { %7751 = vmatpush3.bf16.msra.mxu0 %v8673_v52  ;;  %v6975_v7 = vcombine.low %v1038_v47, %v1041_v58  ;;  %v649_v20 = vshll.u32 %v400_v15, 16  ;;  %v653_v21 = vshrl.u32 %v400_v15, 16  ;;  %v8679_v52 = vld [vmem:[%s11235_s1 + $0x128] sm:$0xff]   ;;  %v666_v55 = vrot.slane %v664_v46, 4  ;;  %v8684_v30 = vld [vmem:[%s11235_s1 + $0x170] sm:$0xff]  }
  0x7d   : > { %v623_v8 = vrot.slane %v622_v62, 4  ;;  %7752 = vmatprep.subr.bf16.mxu0 %v8678_v41  ;;  %v683_v60 = vshll.u32 %v404_v45, 16  ;;  %v679_v63 = vrot.slane %v677_v57, 4  ;;  %v8675_v18 = vld [vmem:[%s9108_s5 + $0x6c] sm:$0xff]   ;;  %v409_v46 = vld [vmem:[%s9108_s5 + $0x94] sm:$0xf] }
  0x7e   : > { %v655_v28 = vrot.slane %v653_v21, 4  ;;  %v408_v45 = vld [vmem:[%s9108_s5 + $0x90] sm:$0xf] }
  0x7f   : > { %v628_v14 = vsel %vm9130_vm5, %v623_v8, %v627_v56  ;;  %v685_v8 = vrot.slane %v683_v60, 5  ;;  %v725_v60 = vshrl.u32 %v409_v46, 16 }
  0x80   : > { %3861 = vmatmul.mubr.bf16.gmra.mrb[20].mxu0 %v8663_v6  ;;  %v1044_v6 = vrot.slane %v912_v0, 5  ;;  %v917_v0 = vld [vmem:[%s9108_s5 + $0x78] sm:$0xe] }
  0x81   : > { %4022 = vmatmul.mubr.bf16.gmra.mrb[20].mxu1 %v6973_v59  ;;  %3868 = vmatprep.mubr.bf16.mxu0 %v6942_v24  ;;  %v631_v59 = vrot.slane %v629_v51, 4  ;;  %v642_v24 = vrot.slane %v640_v17, 4  ;;  %v667_v51 = vshll.u32 %v402_v40, 16  ;;  %v406_v17 = vld [vmem:[%s9108_s5 + $0x88] sm:$0xf] }
  0x82   : > { %4029 = vmatprep.mubr.bf16.mxu1 %v8664_v1  ;;  %v913_v1 = vld [vmem:[%s9108_s5 + $0x68] sm:$0x1]  ;;  %v1046_v12 = vrot.slane %v1044_v6, 4  ;;  %v1045_v23 = vsel %vm9124_vm4, %v6960_v5, %v1044_v6  ;;  %7753 = vmatpush3.bf16.msra.mxu0 %v8679_v52  ;;  %v919_v5 = vld [vmem:[%s9108_s5 + $0x80] sm:$0x1]  ;;  %v8680_v52 = vld [vmem:[%s9108_s5 + $0x90] sm:$0xff]  }
  0x83   : > { %v632_v2 = vor.u32 %v631_v59, %v627_v56  ;;  %v1047_v9 = vrot.slane %v913_v1, 5  ;;  %v646_v31 = vor.u32 %v645_v25, %v642_v24  ;;  %v673_v56 = vshll.u32 %v403_v44, 16  ;;  %v918_v1 = vld [vmem:[%s9108_s5 + $0x7c] sm:$0xf]  ;;  %7754 = vmatprep.subr.bf16.mxu0 %v8684_v30 }
  0x84   : > { %v669_v59 = vrot.slane %v667_v51, 5  ;;  %v1058_v6 = vrot.slane %v918_v1, 5  ;;  %v697_v24 = vshll.u32 %v406_v17, 16  ;;  %v701_v25 = vshrl.u32 %v406_v17, 16 }
  0x85   : > { %v633_v11 = vrot.slane %v632_v2, 4  ;;  %v1048_v26 = vsel %vm9124_vm4, %v1046_v12, %v1047_v9  ;;  %v647_v43 = vrot.slane %v646_v31, 4  ;;  %v675_v62 = vrot.slane %v673_v56, 5  ;;  %v8687_v56 = vld [vmem:[%s11235_s1 + $0x180] sm:$0xff]  }
  0x86   : > { %v6976_v42 = vcombine.low %v1045_v23, %v1048_v26  ;;  %v1052_v2 = vsel %vm9124_vm4, %v6961_v34, %v1051_v38  ;;  %v6962_v9 = vrot.slane %v917_v0, 9  ;;  %v1061_v12 = vrot.slane %v919_v5, 5 }
  0x87   : > { %v638_v19 = vsel %vm9130_vm5, %v633_v11, %v637_v3  ;;  %v1055_v3 = vsel %vm9124_vm4, %v1053_v50, %v1054_v39  ;;  %v8676_v11 = vld [vmem:[%s9108_s5 + $0x84] sm:$0xff]   ;;  %v1060_v15 = vrot.slane %v1058_v6, 4  ;;  %v699_v33 = vrot.slane %v697_v24, 5  ;;  %v922_v39 = vld [vmem:[%s9108_s5 + $0x8c] sm:$0x1] }
  0x88   : > { %3869 = vmatmul.mubr.bf16.gmra.mrb[24].mxu0 %v8665_v35  ;;  %v6944_v22 = vcombine.low %v628_v14, %v638_v19  ;;  %v6977_v13 = vcombine.low %v1052_v2, %v1055_v3  ;;  %v1059_v26 = vsel %vm9124_vm4, %v6962_v9, %v1058_v6  ;;  %v703_v34 = vrot.slane %v701_v25, 4  ;;  %v923_v3 = vld [vmem:[%s9108_s5 + $0x90] sm:$0xe]  ;;  %v8681_v24 = vld [vmem:[%s9108_s5 + $0x84] sm:$0xff]  }
  0x89   : > { %4030 = vmatmul.mubr.bf16.gmra.mrb[24].mxu1 %v6974_v29  ;;  %3876 = vmatprep.mubr.bf16.mxu0 %v6943_v61  ;;  %v659_v29 = vshll.u32 %v401_v16, 16  ;;  %v405_v16 = vld [vmem:[%s9108_s5 + $0x84] sm:$0xf]  ;;  %v1062_v32 = vsel %vm9124_vm4, %v1060_v15, %v1061_v12  ;;  %v1068_v44 = vrot.slane %v922_v39, 5  ;;  %v727_v6 = vrot.slane %v725_v60, 4 }
  0x8a   : > { %4037 = vmatprep.mubr.bf16.mxu1 %v8668_v27  ;;  %v651_v27 = vrot.slane %v649_v20, 5  ;;  %v407_v20 = vld [vmem:[%s9108_s5 + $0x8c] sm:$0x1]  ;;  %v688_v21 = vshrl.u32 %v405_v16, 16  ;;  %v6978_v50 = vcombine.low %v1059_v26, %v1062_v32 }
  0x8b   : > { %v661_v36 = vrot.slane %v659_v29, 5  ;;  %v707_v29 = vshll.u32 %v407_v20, 16  ;;  %v8682_v20 = vld [vmem:[%s9108_s5 + $0x9c] sm:$0xff]  }
  0x8c   : > { %v656_v35 = vor.u32 %v655_v28, %v651_v27  ;;  %v652_v54 = vsel %vm9130_vm5, %v647_v43, %v651_v27  ;;  %v690_v27 = vrot.slane %v688_v21, 4  ;;  %v704_v43 = vor.u32 %v703_v34, %v699_v33  ;;  %v8690_v34 = vld [vmem:[%s11235_s1 + $0x188] sm:$0xff]  }
  0x8d   : > { %v709_v38 = vrot.slane %v707_v29, 5 }
  0x8e   : > { %v657_v47 = vrot.slane %v656_v35, 4  ;;  %v920_v35 = vld [vmem:[%s9108_s5 + $0x84] sm:$0xe]  ;;  %v705_v57 = vrot.slane %v704_v43, 4  ;;  %v926_v43 = vld [vmem:[%s9108_s5 + $0x9c] sm:$0xe] }
  0x8f   : > { %v6963_v40 = vrot.slane %v920_v35, 9 }
  0x90   : > { %3877 = vmatmul.mubr.bf16.gmra.mrb[28].mxu0 %v8669_v10  ;;  %v662_v58 = vsel %vm9130_vm5, %v657_v47, %v661_v36  ;;  %v921_v36 = vld [vmem:[%s9108_s5 + $0x88] sm:$0xf]  ;;  %v8686_v47 = vld [vmem:[%s11235_s1 + $0x1c0] sm:$0xff]   ;;  %v710_v0 = vsel %vm9130_vm5, %v705_v57, %v709_v38 }
  0x91   : > { %4038 = vmatmul.mubr.bf16.gmra.mrb[28].mxu1 %v6975_v7  ;;  %3884 = vmatprep.mubr.bf16.mxu0 %v6944_v22  ;;  %v6945_v61 = vcombine.low %v652_v54, %v662_v58  ;;  %v680_v7 = vor.u32 %v679_v63, %v675_v62  ;;  %v691_v22 = vshll.u32 %v405_v16, 16  ;;  %v1065_v41 = vrot.slane %v921_v36, 5  ;;  %v410_v54 = vld [vmem:[%s9108_s5 + $0x98] sm:$0x1] }
  0x92   : > { %4045 = vmatprep.mubr.bf16.mxu1 %v8670_v4  ;;  %v670_v4 = vor.u32 %v669_v59, %v666_v55  ;;  %v712_v55 = vshrl.u32 %v408_v45, 16  ;;  %v715_v58 = vshll.u32 %v408_v45, 16  ;;  %v721_v59 = vshll.u32 %v409_v46, 16  ;;  %7854 = vmatprep.subr.bf16.mxu1 %v8686_v47  ;;  %v927_v46 = vld [vmem:[%s9108_s5 + $0xa0] sm:$0xf] }
  0x93   : > { %v681_v14 = vrot.slane %v680_v7, 4  ;;  %v693_v28 = vrot.slane %v691_v22, 5  ;;  %v731_v63 = vshll.u32 %v410_v54, 16  ;;  %7855 = vmatpush3.bf16.msra.mxu1 %v8687_v56  ;;  %v924_v7 = vld [vmem:[%s9108_s5 + $0x94] sm:$0xf]  ;;  %v1079_v54 = vrot.slane %v927_v46, 5 }
  0x94   : > { %v671_v10 = vrot.slane %v670_v4, 4  ;;  %v717_v1 = vrot.slane %v715_v58, 5  ;;  %v723_v2 = vrot.slane %v721_v59, 5  ;;  %v8677_v4 = vld [vmem:[%s9108_s5 + $0x78] sm:$0xff]   ;;  %v1072_v12 = vrot.slane %v924_v7, 5  ;;  %v8683_v59 = vld [vmem:[%s9108_s5 + $0x90] sm:$0xff]  }
  0x95   : > { %v686_v23 = vsel %vm9130_vm5, %v681_v14, %v685_v8  ;;  %v925_v8 = vld [vmem:[%s9108_s5 + $0x98] sm:$0x1]  ;;  %v1066_v14 = vsel %vm9124_vm4, %v6963_v40, %v1065_v41  ;;  %v928_v47 = vld [vmem:[%s9108_s5 + $0xa4] sm:$0x1] }
  0x96   : > { %v676_v19 = vsel %vm9130_vm5, %v671_v10, %v675_v62  ;;  %v714_v62 = vrot.slane %v712_v55, 4  ;;  %v733_v10 = vrot.slane %v731_v63, 5  ;;  %v728_v16 = vor.u32 %v727_v6, %v723_v2  ;;  %v8693_v55 = vld [vmem:[%s11235_s1 + $0x190] sm:$0xff]   ;;  %v8694_v58 = vld [vmem:[%s11235_s1 + $0x1d8] sm:$0xff]  }
  0x97   : > { %v6946_v31 = vcombine.low %v676_v19, %v686_v23  ;;  %v1074_v21 = vrot.slane %v1072_v12, 4  ;;  %v411_v23 = vld [vmem:[%s9108_s5 + $0x9c] sm:$0xf] }
  0x98   : > { %3885 = vmatmul.mubr.bf16.gmra.mrb[32].mxu0 %v8671_v53  ;;  %v1067_v53 = vrot.slane %v1065_v41, 4  ;;  %v718_v9 = vor.u32 %v717_v1, %v714_v62  ;;  %v729_v19 = vrot.slane %v728_v16, 4  ;;  %v736_v29 = vshrl.u32 %v411_v23, 16  ;;  %v415_v1 = vld [vmem:[%s9108_s5 + $0xac] sm:$0xf] }
  0x99   : > { %4046 = vmatmul.mubr.bf16.gmra.mrb[32].mxu1 %v6976_v42  ;;  %3892 = vmatprep.mubr.bf16.mxu0 %v6945_v61  ;;  %v8685_v42 = vld [vmem:[%s11235_s1 + $0x130] sm:$0xff]   ;;  %v739_v30 = vshll.u32 %v411_v23, 16  ;;  %v1082_v62 = vrot.slane %v928_v47, 5  ;;  %v769_v6 = vshll.u32 %v415_v1, 16  ;;  %v773_v7 = vshrl.u32 %v415_v1, 16 }
  0x9a   : > { %4053 = vmatprep.mubr.bf16.mxu1 %v8674_v37  ;;  %v694_v37 = vor.u32 %v693_v28, %v690_v27  ;;  %7755 = vmatpush3.bf16.msra.mxu0 %v8685_v42  ;;  %v1069_v15 = vsel %vm9124_vm4, %v1067_v53, %v1068_v44  ;;  %v719_v17 = vrot.slane %v718_v9, 4  ;;  %v734_v26 = vsel %vm9130_vm5, %v729_v19, %v733_v10  ;;  %v412_v27 = vld [vmem:[%s9108_s5 + $0xa0] sm:$0xf]  ;;  %v413_v28 = vld [vmem:[%s9108_s5 + $0xa4] sm:$0x1]  ;;  %v8696_v9 = vld [vmem:[%s11235_s1 + $0x198] sm:$0xff]  }
  0x9b   : > { %v6979_v22 = vcombine.low %v1066_v14, %v1069_v15  ;;  %v749_v32 = vshrl.u32 %v412_v27, 16  ;;  %v738_v35 = vrot.slane %v736_v29, 4  ;;  %v741_v36 = vrot.slane %v739_v30, 5  ;;  %v929_v19 = vld [vmem:[%s9108_s5 + $0xa8] sm:$0xe]  ;;  %v8698_v29 = vld [vmem:[%s11235_s1 + $0x178] sm:$0xff]  }
  0x9c   : > { %v695_v51 = vrot.slane %v694_v37, 4  ;;  %v724_v25 = vsel %vm9130_vm5, %v719_v17, %v723_v2  ;;  %v6965_v53 = vrot.slane %v926_v43, 9  ;;  %v416_v2 = vld [vmem:[%s9108_s5 + $0xb0] sm:$0x1]  ;;  %v771_v14 = vrot.slane %v769_v6, 5  ;;  %v8699_v30 = vld [vmem:[%s11235_s1 + $0x138] sm:$0xff]   ;;  %7756 = vmatprep.subr.bf16.mxu0 %v8698_v29 }
  0x9d   : > { %v6948_v37 = vcombine.low %v724_v25, %v734_v26  ;;  %v751_v39 = vrot.slane %v749_v32, 4  ;;  %v742_v42 = vor.u32 %v741_v36, %v738_v35  ;;  %v775_v15 = vrot.slane %v773_v7, 4  ;;  %v931_v23 = vld [vmem:[%s9108_s5 + $0xb0] sm:$0x1]  ;;  %v8691_v26 = vld [vmem:[%s9108_s5 + $0x9c] sm:$0xff]  }
  0x9e   : > { %v700_v61 = vsel %vm9130_vm5, %v695_v51, %v699_v33  ;;  %v755_v33 = vshll.u32 %v413_v28, 16  ;;  %v1080_v10 = vsel %vm9124_vm4, %v6965_v53, %v1079_v54  ;;  %v1089_v28 = vrot.slane %v931_v23, 5  ;;  %7757 = vmatpush3.bf16.msra.mxu0 %v8699_v30  ;;  %v8701_v36 = vld [vmem:[%s11235_s1 + $0x1a0] sm:$0xff]   ;;  %v419_v43 = vld [vmem:[%s9108_s5 + $0xbc] sm:$0x1]  ;;  %v8706_v6 = vld [vmem:[%s11235_s1 + $0x1f0] sm:$0xff]  }
  0x9f   : > { %v6947_v5 = vcombine.low %v700_v61, %v710_v0  ;;  %v743_v51 = vrot.slane %v742_v42, 4  ;;  %v1081_v61 = vrot.slane %v1079_v54, 4  ;;  %v414_v0 = vld [vmem:[%s9108_s5 + $0xa8] sm:$0xf]  ;;  %v418_v42 = vld [vmem:[%s9108_s5 + $0xb8] sm:$0xf] }
  0xa0   : > { %3893 = vmatmul.mubr.bf16.gmra.mrb[36].mxu0 %v8675_v18  ;;  %v1075_v18 = vrot.slane %v925_v8, 5  ;;  %v757_v45 = vrot.slane %v755_v33, 5  ;;  %v779_v8 = vshll.u32 %v416_v2, 16  ;;  %v793_v46 = vshll.u32 %v418_v42, 16  ;;  %v8709_v23 = vld [vmem:[%s11235_s1 + $0x1b8] sm:$0xff]  }
  0xa1   : > { %4054 = vmatmul.mubr.bf16.gmra.mrb[36].mxu1 %v6977_v13  ;;  %3900 = vmatprep.mubr.bf16.mxu0 %v6946_v31  ;;  %v8688_v13 = vld [vmem:[%s11235_s1 + $0x1c8] sm:$0xff]   ;;  %v745_v31 = vshll.u32 %v412_v27, 16  ;;  %v797_v47 = vshrl.u32 %v418_v42, 16 }
  0xa2   : > { %4061 = vmatprep.mubr.bf16.mxu1 %v8676_v11  ;;  %v6964_v11 = vrot.slane %v923_v3, 9  ;;  %7856 = vmatprep.subr.bf16.mxu1 %v8688_v13  ;;  %v1076_v41 = vsel %vm9124_vm4, %v1074_v21, %v1075_v18  ;;  %v760_v3 = vshrl.u32 %v414_v0, 16  ;;  %v781_v16 = vrot.slane %v779_v8, 5  ;;  %v8695_v18 = vld [vmem:[%s9108_s5 + $0xb4] sm:$0xff]  }
  0xa3   : > { %v747_v38 = vrot.slane %v745_v31, 5  ;;  %7857 = vmatpush3.bf16.msra.mxu1 %v8690_v34  ;;  %v8700_v34 = vld [vmem:[%s11235_s1 + $0x1e0] sm:$0xff]  }
  0xa4   : > { %v1073_v40 = vsel %vm9124_vm4, %v6964_v11, %v1072_v12  ;;  %v1083_v11 = vsel %vm9124_vm4, %v1081_v61, %v1082_v62  ;;  %v762_v12 = vrot.slane %v760_v3, 4  ;;  %v932_v62 = vld [vmem:[%s9108_s5 + $0xb4] sm:$0xe] }
  0xa5   : > { %v752_v44 = vor.u32 %v751_v39, %v747_v38  ;;  %v6980_v56 = vcombine.low %v1073_v40, %v1076_v41  ;;  %v748_v60 = vsel %vm9130_vm5, %v743_v51, %v747_v38  ;;  %v6981_v21 = vcombine.low %v1080_v10, %v1083_v11  ;;  %v8702_v40 = vld [vmem:[%s11235_s1 + $0x1e8] sm:$0xff]   ;;  %v417_v41 = vld [vmem:[%s9108_s5 + $0xb4] sm:$0xf] }
  0xa6   : > { %v803_v51 = vshll.u32 %v419_v43, 16  ;;  %v6967_v1 = vrot.slane %v932_v62, 9  ;;  %v7225_v43 = vld [vmem:[%s9108_s5 + $0x1c] sm:$0xf] }
  0xa7   : > { %v753_v57 = vrot.slane %v752_v44, 4  ;;  %v784_v44 = vshrl.u32 %v417_v41, 16 }
  0xa8   : > { %3901 = vmatmul.mubr.bf16.gmra.mrb[40].mxu0 %v8677_v4  ;;  %v763_v4 = vshll.u32 %v414_v0, 16  ;;  %v805_v61 = vrot.slane %v803_v51, 5  ;;  %v934_v0 = vld [vmem:[%s9108_s5 + $0xbc] sm:$0x1] }
  0xa9   : > { %4062 = vmatmul.mubr.bf16.gmra.mrb[40].mxu1 %v6978_v50  ;;  %3908 = vmatprep.mubr.bf16.mxu0 %v6947_v5  ;;  %v8692_v50 = vld [vmem:[%s11235_s1 + $0x1d0] sm:$0xff]   ;;  %v758_v63 = vsel %vm9130_vm5, %v753_v57, %v757_v45  ;;  %v787_v45 = vshll.u32 %v417_v41, 16  ;;  %v786_v53 = vrot.slane %v784_v44, 4  ;;  %v8704_v57 = vld [vmem:[%s11235_s1 + $0x1a8] sm:$0xff]  }
  0xaa   : > { %4069 = vmatprep.mubr.bf16.mxu1 %v8680_v52  ;;  %v8689_v52 = vld [vmem:[%s9108_s5 + $0xa8] sm:$0xff]   ;;  %7858 = vmatprep.subr.bf16.mxu1 %v8692_v50  ;;  %v6949_v5 = vcombine.low %v748_v60, %v758_v63  ;;  %v765_v13 = vrot.slane %v763_v4, 5  ;;  %v933_v63 = vld [vmem:[%s9108_s5 + $0xb8] sm:$0xf] }
  0xab   : > { %7859 = vmatpush3.bf16.msra.mxu1 %v8693_v55  ;;  %v789_v54 = vrot.slane %v787_v45, 5  ;;  %v795_v55 = vrot.slane %v793_v46, 5  ;;  %v1093_v2 = vrot.slane %v933_v63, 5  ;;  %v7226_v45 = vld [vmem:[%s9108_s5 + $0x20] sm:$0x1] }
  0xac   : > { %7860 = vmatprep.subr.bf16.mxu1 %v8694_v58  ;;  %v766_v17 = vor.u32 %v765_v13, %v762_v12  ;;  %v8697_v58 = vld [vmem:[%s9108_s5 + $0xa8] sm:$0xff]   ;;  %v8708_v12 = vld [vmem:[%s11235_s1 + $0x1f8] sm:$0xff]  }
  0xad   : > { %v1094_v7 = vsel %vm9124_vm4, %v6967_v1, %v1093_v2  ;;  %v1095_v8 = vrot.slane %v1093_v2, 4  ;;  %v7101_v2 = vld [vmem:[%s9108_s5 + $0x20] sm:$0x1] }
  0xae   : > { %v767_v27 = vrot.slane %v766_v17, 4  ;;  %v7098_v17 = vld [vmem:[%s9108_s5 + $0x14] sm:$0x1] }
  0xaf   : > { %7861 = vmatpush3.bf16.msra.mxu1 %v8696_v9  ;;  %v8707_v9 = vld [vmem:[%s11235_s1 + $0x1b0] sm:$0xff]  }
  0xb0   : > { %3909 = vmatmul.mubr.bf16.gmra.mrb[44].mxu0 %v8681_v24  ;;  %v6966_v24 = vrot.slane %v929_v19, 9  ;;  %v772_v33 = vsel %vm9130_vm5, %v767_v27, %v771_v14  ;;  %7862 = vmatprep.subr.bf16.mxu1 %v8700_v34 }
  0xb1   : > { %4070 = vmatmul.mubr.bf16.gmra.mrb[44].mxu1 %v6979_v22  ;;  %3916 = vmatprep.mubr.bf16.mxu0 %v6948_v37  ;;  %v776_v22 = vor.u32 %v775_v15, %v771_v14  ;;  %v7096_v15 = vld [vmem:[%s9108_s5 + $0xc] sm:$0xe] }
  0xb2   : > { %4077 = vmatprep.mubr.bf16.mxu1 %v8682_v20  ;;  %v930_v20 = vld [vmem:[%s9108_s5 + $0xac] sm:$0xf] }
  0xb3   : > { %v1086_v25 = vrot.slane %v930_v20, 5  ;;  %v777_v31 = vrot.slane %v776_v22, 4  ;;  %7863 = vmatpush3.bf16.msra.mxu1 %v8701_v36  ;;  %v7144_v20 = vrot.slane %v7096_v15, 9  ;;  %v1936_v22 = vrot.slane %v7098_v17, 5  ;;  %v7227_v15 = vld [vmem:[%s9108_s5 + $0x24] sm:$0xf] }
  0xb4   : > { %7864 = vmatprep.subr.bf16.mxu1 %v8702_v40 }
  0xb5   : > { %v1088_v32 = vrot.slane %v1086_v25, 4  ;;  %v782_v35 = vsel %vm9130_vm5, %v777_v31, %v781_v16  ;;  %v1087_v38 = vsel %vm9124_vm4, %v6966_v24, %v1086_v25  ;;  %v7097_v16 = vld [vmem:[%s9108_s5 + $0x10] sm:$0xf]  ;;  %v7032_v24 = vld [vmem:[%s9108_s5 + $0xc] sm:$0xf]  ;;  %v9491_v31 = vld [vmem:[%s11235_s1 + $0x200] sm:$0xff]  }
  0xb6   : > { %v6950_v37 = vcombine.low %v772_v33, %v782_v35  ;;  %v7033_v25 = vld [vmem:[%s9108_s5 + $0x10] sm:$0xf]  ;;  %v1372_v29 = vshrl.u32 %v7032_v24, 16  ;;  %v1375_v30 = vshll.u32 %v7032_v24, 16  ;;  %8462 = vmatprep.subr.bf16.mxu0 %v9491_v31 }
  0xb7   : > { %v1090_v39 = vsel %vm9124_vm4, %v1088_v32, %v1089_v28  ;;  %7865 = vmatpush3.bf16.msra.mxu1 %v8704_v57  ;;  %v7034_v28 = vld [vmem:[%s9108_s5 + $0x14] sm:$0x1]  ;;  %v1381_v32 = vshll.u32 %v7033_v25, 16  ;;  %v1385_v33 = vshrl.u32 %v7033_v25, 16 }
  0xb8   : > { %3917 = vmatmul.mubr.bf16.gmra.mrb[48].mxu0 %v8683_v59  ;;  %v6982_v50 = vcombine.low %v1087_v38, %v1090_v39  ;;  %v790_v59 = vor.u32 %v789_v54, %v786_v53  ;;  %7866 = vmatprep.subr.bf16.mxu1 %v8706_v6  ;;  %v1391_v34 = vshll.u32 %v7034_v28, 16  ;;  %v1374_v36 = vrot.slane %v1372_v29, 4  ;;  %v7224_v38 = vld [vmem:[%s9108_s5 + $0x18] sm:$0xf] }
  0xb9   : > { %4078 = vmatmul.mubr.bf16.gmra.mrb[48].mxu1 %v6980_v56  ;;  %3924 = vmatprep.mubr.bf16.mxu0 %v6949_v5  ;;  %v799_v56 = vrot.slane %v797_v47, 4  ;;  %v1096_v5 = vrot.slane %v934_v0, 5  ;;  %v1383_v40 = vrot.slane %v1381_v32, 5  ;;  %v1387_v41 = vrot.slane %v1385_v33, 4  ;;  %v7229_v32 = vld [vmem:[%s9108_s5 + $0x2c] sm:$0x1] }
  0xba   : > { %4085 = vmatprep.mubr.bf16.mxu1 %v8689_v52  ;;  %v8703_v52 = vld [vmem:[%s9108_s5 + $0xc0] sm:$0xff]   ;;  %v791_v3 = vrot.slane %v790_v59, 4  ;;  %v1393_v42 = vrot.slane %v1391_v34, 5  ;;  %v2317_v46 = vshrl.u32 %v7224_v38, 16  ;;  %v2320_v47 = vshll.u32 %v7224_v38, 16 }
  0xbb   : > { %v800_v60 = vor.u32 %v799_v56, %v795_v55  ;;  %v1097_v14 = vsel %vm9124_vm4, %v1095_v8, %v1096_v5  ;;  %7867 = vmatpush3.bf16.msra.mxu1 %v8707_v9  ;;  %v1388_v51 = vor.u32 %v1387_v41, %v1383_v40  ;;  %v2336_v53 = vshll.u32 %v7226_v45, 16  ;;  %v7036_v8 = vld [vmem:[%s9108_s5 + $0x1c] sm:$0xf]  ;;  %v7037_v9 = vld [vmem:[%s9108_s5 + $0x20] sm:$0x1] }
  0xbc   : > { %v796_v10 = vsel %vm9130_vm5, %v791_v3, %v795_v55  ;;  %v6983_v19 = vcombine.low %v1094_v7, %v1097_v14  ;;  %7868 = vmatprep.subr.bf16.mxu1 %v8708_v12  ;;  %v2319_v55 = vrot.slane %v2317_v46, 4  ;;  %v2322_v56 = vrot.slane %v2320_v47, 5  ;;  %v7102_v33 = vld [vmem:[%s9108_s5 + $0x24] sm:$0xe]  ;;  %v7103_v38 = vld [vmem:[%s9108_s5 + $0x28] sm:$0xf] }
  0xbd   : > { %v801_v4 = vrot.slane %v800_v60, 4  ;;  %v1389_v59 = vrot.slane %v1388_v51, 4  ;;  %v2338_v1 = vrot.slane %v2336_v53, 5  ;;  %v1943_v7 = vrot.slane %v7101_v2, 5 }
  0xbe   : > { %v2323_v0 = vor.u32 %v2322_v56, %v2319_v55  ;;  %v1409_v25 = vshrl.u32 %v7036_v8, 16  ;;  %v2360_v46 = vshll.u32 %v7229_v32, 16  ;;  %v7146_v47 = vrot.slane %v7102_v33, 9  ;;  %v7039_v55 = vld [vmem:[%s9108_s5 + $0x28] sm:$0xf] }
  0xbf   : > { %v806_v11 = vsel %vm9130_vm5, %v801_v4, %v805_v61  ;;  %7869 = vmatpush3.bf16.msra.mxu1 %v8709_v23  ;;  %v7100_v61 = vld [vmem:[%s9108_s5 + $0x1c] sm:$0xf]  ;;  %v7035_v4 = vld [vmem:[%s9108_s5 + $0x18] sm:$0xf]  ;;  %v1394_v5 = vsel %vm9130_vm5, %v1389_v59, %v1393_v42 }
  0xc0   : > { %3925 = vmatmul.mubr.bf16.gmra.mrb[52].mxu0 %v8691_v26  ;;  %v6951_v13 = vcombine.low %v796_v10, %v806_v11  ;;  %v1940_v3 = vrot.slane %v7100_v61, 5  ;;  %v1396_v10 = vshrl.u32 %v7035_v4, 16  ;;  %v2324_v12 = vrot.slane %v2323_v0, 4  ;;  %v7107_v33 = vld [vmem:[%s9108_s5 + $0x38] sm:$0x1] }
  0xc1   : > { %4086 = vmatmul.mubr.bf16.gmra.mrb[52].mxu1 %v6981_v21  ;;  %3932 = vmatprep.mubr.bf16.mxu0 %v6950_v37  ;;  %v1933_v21 = vrot.slane %v7097_v16, 5  ;;  %v1377_v37 = vrot.slane %v1375_v30, 5  ;;  %v8713_v16 = vld [vmem:[%s11235_s1 + $0x208] sm:$0xff]  }
  0xc2   : > { %4093 = vmatprep.mubr.bf16.mxu1 %v8695_v18  ;;  %v8705_v18 = vld [vmem:[%s9108_s5 + $0xb4] sm:$0xff]   ;;  %v1942_v14 = vrot.slane %v1940_v3, 4 }
  0xc3   : > { %v1934_v26 = vsel %vm9124_vm4, %v7144_v20, %v1933_v21  ;;  %v1935_v27 = vrot.slane %v1933_v21, 4  ;;  %v1378_v44 = vor.u32 %v1377_v37, %v1374_v36  ;;  %v1399_v20 = vshll.u32 %v7035_v4, 16 }
  0xc4   : > { %v1405_v21 = vshll.u32 %v7036_v8, 16  ;;  %v1944_v24 = vsel %vm9124_vm4, %v1942_v14, %v1943_v7  ;;  %v2341_v37 = vshrl.u32 %v7227_v15, 16  ;;  %v1429_v14 = vshll.u32 %v7039_v55, 16 }
  0xc5   : > { %v1937_v35 = vsel %vm9124_vm4, %v1935_v27, %v1936_v22  ;;  %v1379_v54 = vrot.slane %v1378_v44, 4  ;;  %v7228_v22 = vld [vmem:[%s9108_s5 + $0x28] sm:$0xf]  ;;  %v1401_v29 = vrot.slane %v1399_v20, 5 }
  0xc6   : > { %v7160_v39 = vcombine.low %v1934_v26, %v1937_v35  ;;  %v1415_v26 = vshll.u32 %v7037_v9, 16  ;;  %v1407_v30 = vrot.slane %v1405_v21, 5  ;;  %v1411_v35 = vrot.slane %v1409_v25, 4  ;;  %v7232_v21 = vld [vmem:[%s9108_s5 + $0x38] sm:$0x1] }
  0xc7   : > { %v1384_v63 = vsel %vm9130_vm5, %v1379_v54, %v1383_v40  ;;  %v2344_v40 = vshll.u32 %v7227_v15, 16  ;;  %v2350_v41 = vshll.u32 %v7228_v22, 16  ;;  %v2354_v42 = vshrl.u32 %v7228_v22, 16 }
  0xc8   : > { %3933 = vmatmul.mubr.bf16.gmra.mrb[56].mxu0 %v8697_v58  ;;  %v7099_v58 = vld [vmem:[%s9108_s5 + $0x18] sm:$0xe]  ;;  %v7080_v11 = vcombine.low %v1384_v63, %v1394_v5  ;;  %v1417_v36 = vrot.slane %v1415_v26, 5  ;;  %v1412_v44 = vor.u32 %v1411_v35, %v1407_v30  ;;  %v2343_v45 = vrot.slane %v2341_v37, 4  ;;  %v7040_v63 = vld [vmem:[%s9108_s5 + $0x2c] sm:$0x1] }
  0xc9   : > { %4094 = vmatmul.mubr.bf16.gmra.mrb[56].mxu1 %v6982_v50  ;;  %3940 = vmatprep.mubr.bf16.mxu0 %v6951_v13  ;;  %v2326_v50 = vshll.u32 %v7225_v43, 16  ;;  %v7145_v62 = vrot.slane %v7099_v58, 9  ;;  %v2352_v53 = vrot.slane %v2350_v41, 5  ;;  %v2356_v54 = vrot.slane %v2354_v42, 4  ;;  %v7230_v5 = vld [vmem:[%s9108_s5 + $0x30] sm:$0xf] }
  0xca   : > { %4101 = vmatprep.mubr.bf16.mxu1 %v8703_v52  ;;  %v2330_v52 = vshrl.u32 %v7225_v43, 16  ;;  %v8716_v43 = vld [vmem:[%s11235_s1 + $0x210] sm:$0xff]   ;;  %v1413_v56 = vrot.slane %v1412_v44, 4  ;;  %v1947_v58 = vrot.slane %v7103_v38, 5  ;;  %v1433_v15 = vshrl.u32 %v7039_v55, 16 }
  0xcb   : > { %v2328_v57 = vrot.slane %v2326_v50, 5  ;;  %v1941_v13 = vsel %vm9124_vm4, %v7145_v62, %v1940_v3  ;;  %v7038_v50 = vld [vmem:[%s9108_s5 + $0x24] sm:$0xf]  ;;  %v2357_v62 = vor.u32 %v2356_v54, %v2352_v53  ;;  %v1439_v20 = vshll.u32 %v7040_v63, 16  ;;  %v7105_v26 = vld [vmem:[%s9108_s5 + $0x30] sm:$0xe] }
  0xcc   : > { %v2332_v60 = vrot.slane %v2330_v52, 4  ;;  %v7161_v28 = vcombine.low %v1941_v13, %v1944_v24  ;;  %v2346_v52 = vrot.slane %v2344_v40, 5  ;;  %v1420_v0 = vshrl.u32 %v7038_v50, 16  ;;  %v7041_v38 = vld [vmem:[%s9108_s5 + $0x30] sm:$0xf] }
  0xcd   : > { %v2329_v23 = vsel %vm9130_vm5, %v2324_v12, %v2328_v57  ;;  %v1948_v2 = vsel %vm9124_vm4, %v7146_v47, %v1947_v58  ;;  %v1949_v3 = vrot.slane %v1947_v58, 4  ;;  %v1423_v4 = vshll.u32 %v7038_v50, 16  ;;  %v7233_v63 = vld [vmem:[%s9108_s5 + $0x3c] sm:$0xf] }
  0xce   : > { %v2333_v6 = vor.u32 %v2332_v60, %v2328_v57  ;;  %v2362_v57 = vrot.slane %v2360_v46, 5  ;;  %v2347_v61 = vor.u32 %v2346_v52, %v2343_v45  ;;  %v2358_v9 = vrot.slane %v2357_v62, 4 }
  0xcf   : > { %v1425_v13 = vrot.slane %v1423_v4, 5  ;;  %v1431_v24 = vrot.slane %v1429_v14, 5  ;;  %v1435_v25 = vrot.slane %v1433_v15, 4  ;;  %v2384_v37 = vshll.u32 %v7232_v21, 16 }
  0xd0   : > { %3941 = vmatmul.mubr.bf16.gmra.mrb[60].mxu0 %v8705_v18  ;;  %v2334_v17 = vrot.slane %v2333_v6, 4  ;;  %v8711_v18 = vld [vmem:[%s9108_s5 + $0x18] sm:$0xff]   ;;  %v7231_v6 = vld [vmem:[%s9108_s5 + $0x34] sm:$0xf]  ;;  %v2348_v8 = vrot.slane %v2347_v61, 4  ;;  %v1957_v52 = vrot.slane %v7107_v33, 5 }
  0xd1   : > { %4102 = vmatmul.mubr.bf16.gmra.mrb[60].mxu1 %v6983_v19  ;;  %4142 = vmatprep.mubr.bf16.mxu0 %v7160_v39  ;;  %v1398_v19 = vrot.slane %v1396_v10, 4  ;;  %v1422_v10 = vrot.slane %v1420_v0, 4  ;;  %v2374_v32 = vshll.u32 %v7231_v6, 16  ;;  %v1436_v35 = vor.u32 %v1435_v25, %v1431_v24 }
  0xd2   : > { %v2339_v27 = vsel %vm9130_vm5, %v2334_v17, %v2338_v1  ;;  %v1418_v1 = vsel %vm9130_vm5, %v1413_v56, %v1417_v36  ;;  %v2363_v17 = vsel %vm9130_vm5, %v2358_v9, %v2362_v57  ;;  %v2378_v36 = vshrl.u32 %v7231_v6, 16 }
  0xd3   : > { %v7272_v34 = vcombine.low %v2329_v23, %v2339_v27  ;;  %v1402_v39 = vor.u32 %v1401_v29, %v1398_v19  ;;  %v1426_v23 = vor.u32 %v1425_v13, %v1422_v10  ;;  %v7106_v27 = vld [vmem:[%s9108_s5 + $0x34] sm:$0xf]  ;;  %v2365_v29 = vshrl.u32 %v7230_v5, 16  ;;  %v7235_v10 = vld [vmem:[%s9108_s5 + $0x44] sm:$0x1] }
  0xd4   : > { %v2376_v42 = vrot.slane %v2374_v32, 5  ;;  %v1437_v45 = vrot.slane %v1436_v35, 4  ;;  %v2380_v46 = vrot.slane %v2378_v36, 4  ;;  %v2386_v47 = vrot.slane %v2384_v37, 5  ;;  %v7044_v32 = vld [vmem:[%s9108_s5 + $0x3c] sm:$0xf] }
  0xd5   : > { %4303 = vmatprep.mubr.bf16.mxu1 %v7272_v34  ;;  %v1403_v51 = vrot.slane %v1402_v39, 4  ;;  %v1427_v34 = vrot.slane %v1426_v23, 4  ;;  %v8722_v39 = vld [vmem:[%s11235_s1 + $0x220] sm:$0xff]   ;;  %v2367_v40 = vrot.slane %v2365_v29, 4  ;;  %v1444_v54 = vshrl.u32 %v7041_v38, 16 }
  0xd6   : > { %v2381_v56 = vor.u32 %v2380_v46, %v2376_v42  ;;  %v1447_v57 = vshll.u32 %v7041_v38, 16  ;;  %v2389_v15 = vshrl.u32 %v7233_v63, 16  ;;  %v2392_v21 = vshll.u32 %v7233_v63, 16  ;;  %v7045_v37 = vld [vmem:[%s9108_s5 + $0x40] sm:$0xf]  ;;  %v8728_v38 = vld [vmem:[%s11235_s1 + $0x230] sm:$0xff]  }
  0xd7   : > { %v1408_v60 = vsel %vm9130_vm5, %v1403_v51, %v1407_v30  ;;  %v2368_v30 = vshll.u32 %v7230_v5, 16  ;;  %v1432_v44 = vsel %vm9130_vm5, %v1427_v34, %v1431_v24  ;;  %v1954_v51 = vrot.slane %v7106_v27, 5  ;;  %v7234_v5 = vld [vmem:[%s9108_s5 + $0x40] sm:$0xf] }
  0xd8   : > { %4143 = vmatmul.mubr.bf16.vlgmr.msra.gmra.mrb[64].mxu0 %v7080_v11  ;;  %v7081_v7 = vcombine.low %v1408_v60, %v1418_v1  ;;  %v8719_v11 = vld [vmem:[%s11235_s1 + $0x218] sm:$0xff]   ;;  %v2382_v0 = vrot.slane %v2381_v56, 4  ;;  %v8714_v1 = vld [vmem:[%s9108_s5 + $0x30] sm:$0xff]   ;;  %v2391_v23 = vrot.slane %v2389_v15, 4  ;;  %v2398_v24 = vshll.u32 %v7234_v5, 16 }
  0xd9   : > { %8463 = vmatpush3.bf16.msra.mxu0 %v9491_v31  ;;  %4150 = vmatprep.mubr.bf16.mxu0 %v7161_v28  ;;  %v7104_v31 = vld [vmem:[%s9108_s5 + $0x2c] sm:$0x1]  ;;  %v1441_v28 = vrot.slane %v1439_v20, 5  ;;  %v2370_v41 = vrot.slane %v2368_v30, 5  ;;  %v1956_v62 = vrot.slane %v1954_v51, 4  ;;  %v2402_v25 = vshrl.u32 %v7234_v5, 16 }
  0xda   : > { %8464 = vmatprep.subr.bf16.mxu0 %v8713_v16  ;;  %4304 = vmatmul.mubr.bf16.vlgmr.msra.gmra.mrb[64].mxu1 %v8711_v18  ;;  %v1950_v59 = vrot.slane %v7104_v31, 5  ;;  %v8712_v18 = vld [vmem:[%s9108_s5 + $0x24] sm:$0xff]   ;;  %v7147_v31 = vrot.slane %v7105_v26, 9  ;;  %v2408_v29 = vshll.u32 %v7235_v10, 16  ;;  %v2400_v34 = vrot.slane %v2398_v24, 5 }
  0xdb   : > { %v2371_v50 = vor.u32 %v2370_v41, %v2367_v40  ;;  %v1442_v55 = vsel %vm9130_vm5, %v1437_v45, %v1441_v28  ;;  %v7110_v26 = vld [vmem:[%s9108_s5 + $0x44] sm:$0x1]  ;;  %v2394_v28 = vrot.slane %v2392_v21, 5  ;;  %v2404_v35 = vrot.slane %v2402_v25, 4  ;;  %v7111_v5 = vld [vmem:[%s9108_s5 + $0x48] sm:$0xe] }
  0xdc   : > { %v1951_v12 = vsel %vm9124_vm4, %v1949_v3, %v1950_v59  ;;  %v7082_v59 = vcombine.low %v1432_v44, %v1442_v55  ;;  %v1955_v61 = vsel %vm9124_vm4, %v7147_v31, %v1954_v51  ;;  %v1449_v3 = vrot.slane %v1447_v57, 5  ;;  %v7046_v45 = vld [vmem:[%s9108_s5 + $0x44] sm:$0x1] }
  0xdd   : > { %8465 = vmatpush3.bf16.msra.mxu0 %v8713_v16  ;;  %v2353_v16 = vsel %vm9130_vm5, %v2348_v8, %v2352_v53  ;;  %v7162_v19 = vcombine.low %v1948_v2, %v1951_v12  ;;  %v7043_v53 = vld [vmem:[%s9108_s5 + $0x38] sm:$0x1]  ;;  %v2372_v60 = vrot.slane %v2371_v50, 4  ;;  %v1446_v2 = vrot.slane %v1444_v54, 4 }
  0xde   : > { %8466 = vmatprep.subr.bf16.mxu0 %v8716_v43  ;;  %v7273_v22 = vcombine.low %v2353_v16, %v2363_v17  ;;  %v1463_v9 = vshll.u32 %v7043_v53, 16  ;;  %v2387_v12 = vsel %vm9130_vm5, %v2382_v0, %v2386_v47  ;;  %v7109_v16 = vld [vmem:[%s9108_s5 + $0x40] sm:$0xf]  ;;  %v8725_v17 = vld [vmem:[%s11235_s1 + $0x228] sm:$0xff]   ;;  %v2395_v40 = vor.u32 %v2394_v28, %v2391_v23  ;;  %v7238_v0 = vld [vmem:[%s9108_s5 + $0x50] sm:$0x1] }
  0xdf   : > { %v2377_v6 = vsel %vm9130_vm5, %v2372_v60, %v2376_v42  ;;  %v1450_v14 = vor.u32 %v1449_v3, %v1446_v2  ;;  %v1961_v36 = vrot.slane %v7109_v16, 5  ;;  %v2410_v41 = vrot.slane %v2408_v29, 5  ;;  %v7236_v53 = vld [vmem:[%s9108_s5 + $0x48] sm:$0xf]  ;;  %v8715_v60 = vld [vmem:[%s9108_s5 + $0x3c] sm:$0xff]  }
  0xe0   : > { %4151 = vmatmul.mubr.bf16.gmra.mrb[68].mxu0 %v7081_v7  ;;  %4311 = vmatprep.mubr.bf16.mxu1 %v7273_v22  ;;  %v1958_v7 = vsel %vm9124_vm4, %v1956_v62, %v1957_v52  ;;  %v1465_v20 = vrot.slane %v1463_v9, 5  ;;  %v1964_v42 = vrot.slane %v7110_v26, 5  ;;  %v2405_v31 = vor.u32 %v2404_v35, %v2400_v34  ;;  %v7048_v26 = vld [vmem:[%s9108_s5 + $0x4c] sm:$0xf] }
  0xe1   : > { %8467 = vmatpush3.bf16.msra.mxu0 %v8716_v43  ;;  %4158 = vmatprep.mubr.bf16.mxu0 %v7162_v19  ;;  %v7042_v43 = vld [vmem:[%s9108_s5 + $0x34] sm:$0xf]  ;;  %v7163_v13 = vcombine.low %v1955_v61, %v1958_v7  ;;  %v1451_v22 = vrot.slane %v1450_v14, 4  ;;  %v1963_v44 = vrot.slane %v1961_v36, 4  ;;  %v1468_v46 = vshrl.u32 %v7044_v32, 16 }
  0xe2   : > { %8468 = vmatprep.subr.bf16.mxu0 %v8719_v11  ;;  %4312 = vmatmul.mubr.bf16.gmra.mrb[68].mxu1 %v8712_v18  ;;  %v1453_v58 = vshll.u32 %v7042_v43, 16  ;;  %v1457_v8 = vshrl.u32 %v7042_v43, 16  ;;  %v7274_v18 = vcombine.low %v2377_v6, %v2387_v12  ;;  %v2396_v50 = vrot.slane %v2395_v40, 4  ;;  %v8731_v6 = vld [vmem:[%s11235_s1 + $0x238] sm:$0xff]   ;;  %v7113_v12 = vld [vmem:[%s9108_s5 + $0x50] sm:$0x1] }
  0xe3   : > { %v1471_v51 = vshll.u32 %v7044_v32, 16  ;;  %v1477_v52 = vshll.u32 %v7045_v37, 16  ;;  %v2406_v55 = vrot.slane %v2405_v31, 4  ;;  %v1965_v56 = vsel %vm9124_vm4, %v1963_v44, %v1964_v42 }
  0xe4   : > { %v1455_v4 = vrot.slane %v1453_v58, 5  ;;  %v1459_v19 = vrot.slane %v1457_v8, 4  ;;  %4319 = vmatprep.mubr.bf16.mxu1 %v7274_v18  ;;  %v1470_v57 = vrot.slane %v1468_v46, 4  ;;  %v7237_v58 = vld [vmem:[%s9108_s5 + $0x4c] sm:$0xf]  ;;  %v1481_v2 = vshrl.u32 %v7045_v37, 16 }
  0xe5   : > { %8469 = vmatpush3.bf16.msra.mxu0 %v8719_v11  ;;  %v7108_v11 = vld [vmem:[%s9108_s5 + $0x3c] sm:$0xe]  ;;  %v1473_v62 = vrot.slane %v1471_v51, 5  ;;  %v1479_v63 = vrot.slane %v1477_v52, 5  ;;  %v1487_v3 = vshll.u32 %v7046_v45, 16  ;;  %v2416_v9 = vshll.u32 %v7236_v53, 16 }
  0xe6   : > { %8470 = vmatprep.subr.bf16.mxu0 %v8722_v39  ;;  %v1460_v27 = vor.u32 %v1459_v19, %v1455_v4  ;;  %v7148_v30 = vrot.slane %v7108_v11, 9  ;;  %v1456_v33 = vsel %vm9130_vm5, %v1451_v22, %v1455_v4  ;;  %v2413_v4 = vshrl.u32 %v7236_v53, 16  ;;  %v7112_v11 = vld [vmem:[%s9108_s5 + $0x4c] sm:$0xf]  ;;  %v7240_v51 = vld [vmem:[%s9108_s5 + $0x58] sm:$0xf] }
  0xe7   : > { %v1474_v8 = vor.u32 %v1473_v62, %v1470_v57  ;;  %v2422_v10 = vshll.u32 %v7237_v58, 16  ;;  %v1489_v14 = vrot.slane %v1487_v3, 5  ;;  %v2426_v16 = vshrl.u32 %v7237_v58, 16  ;;  %v7241_v52 = vld [vmem:[%s9108_s5 + $0x5c] sm:$0x1] }
  0xe8   : > { %4159 = vmatmul.mubr.bf16.gmra.mrb[72].mxu0 %v7082_v59  ;;  %v1962_v43 = vsel %vm9124_vm4, %v7148_v30, %v1961_v36  ;;  %v2401_v59 = vsel %vm9130_vm5, %v2396_v50, %v2400_v34  ;;  %v2415_v15 = vrot.slane %v2413_v4, 4  ;;  %v2418_v19 = vrot.slane %v2416_v9, 5  ;;  %v7049_v36 = vld [vmem:[%s9108_s5 + $0x50] sm:$0x1]  ;;  %v7114_v58 = vld [vmem:[%s9108_s5 + $0x54] sm:$0xe] }
  0xe9   : > { %8471 = vmatpush3.bf16.msra.mxu0 %v8722_v39  ;;  %4166 = vmatprep.mubr.bf16.mxu0 %v7163_v13  ;;  %v1461_v39 = vrot.slane %v1460_v27, 4  ;;  %v7164_v61 = vcombine.low %v1962_v43, %v1965_v56  ;;  %v1483_v13 = vrot.slane %v1481_v2, 4  ;;  %v1475_v18 = vrot.slane %v1474_v8, 4  ;;  %v7115_v3 = vld [vmem:[%s9108_s5 + $0x58] sm:$0xf] }
  0xea   : > { %8472 = vmatprep.subr.bf16.mxu0 %v8725_v17  ;;  %4320 = vmatmul.mubr.bf16.gmra.mrb[72].mxu1 %v8714_v1  ;;  %v2411_v1 = vsel %vm9130_vm5, %v2406_v55, %v2410_v41  ;;  %v2432_v21 = vshll.u32 %v7238_v0, 16  ;;  %v2428_v23 = vrot.slane %v2426_v16, 4  ;;  %v7149_v24 = vrot.slane %v7111_v5, 9  ;;  %v7239_v41 = vld [vmem:[%s9108_s5 + $0x54] sm:$0xf] }
  0xeb   : > { %v1466_v47 = vsel %vm9130_vm5, %v1461_v39, %v1465_v20  ;;  %v7275_v7 = vcombine.low %v2401_v59, %v2411_v1  ;;  %v2424_v20 = vrot.slane %v2422_v10, 5  ;;  %v1484_v22 = vor.u32 %v1483_v13, %v1479_v63  ;;  %v7116_v8 = vld [vmem:[%s9108_s5 + $0x5c] sm:$0x1]  ;;  %v7050_v13 = vld [vmem:[%s9108_s5 + $0x54] sm:$0xf] }
  0xec   : > { %v7083_v54 = vcombine.low %v1456_v33, %v1466_v47  ;;  %v1968_v25 = vrot.slane %v7112_v11, 5  ;;  %v1480_v27 = vsel %vm9130_vm5, %v1475_v18, %v1479_v63  ;;  %v2419_v28 = vor.u32 %v2418_v19, %v2415_v15  ;;  %v7051_v18 = vld [vmem:[%s9108_s5 + $0x58] sm:$0xf] }
  0xed   : > { %8473 = vmatpush3.bf16.msra.mxu0 %v8725_v17  ;;  %v7047_v17 = vld [vmem:[%s9108_s5 + $0x48] sm:$0xf]  ;;  %4327 = vmatprep.mubr.bf16.mxu1 %v7275_v7  ;;  %v2434_v29 = vrot.slane %v2432_v21, 5  ;;  %v1971_v30 = vrot.slane %v7113_v12, 5  ;;  %v1485_v32 = vrot.slane %v1484_v22, 4  ;;  %v2429_v33 = vor.u32 %v2428_v23, %v2424_v20 }
  0xee   : > { %8474 = vmatprep.subr.bf16.mxu0 %v8728_v38  ;;  %v1969_v34 = vsel %vm9124_vm4, %v7149_v24, %v1968_v25  ;;  %v1970_v35 = vrot.slane %v1968_v25, 4  ;;  %v2420_v37 = vrot.slane %v2419_v28, 4  ;;  %v1495_v39 = vshll.u32 %v7047_v17, 16  ;;  %v7052_v23 = vld [vmem:[%s9108_s5 + $0x5c] sm:$0x1] }
  0xef   : > { %v1501_v40 = vshll.u32 %v7048_v26, 16  ;;  %v1490_v42 = vsel %vm9130_vm5, %v1485_v32, %v1489_v14  ;;  %v2430_v31 = vrot.slane %v2429_v33, 4  ;;  %v1505_v44 = vshrl.u32 %v7048_v26, 16  ;;  %v7242_v28 = vld [vmem:[%s9108_s5 + $0x60] sm:$0xf] }
  0xf0   : > { %4167 = vmatmul.mubr.bf16.gmra.mrb[76].mxu0 %v7083_v54  ;;  %v1972_v43 = vsel %vm9124_vm4, %v1970_v35, %v1971_v30  ;;  %v7084_v45 = vcombine.low %v1480_v27, %v1490_v42  ;;  %v2425_v46 = vsel %vm9130_vm5, %v2420_v37, %v2424_v20  ;;  %v8717_v54 = vld [vmem:[%s9108_s5 + $0x48] sm:$0xff]   ;;  %v1497_v55 = vrot.slane %v1495_v39, 5  ;;  %v8718_v30 = vld [vmem:[%s9108_s5 + $0x54] sm:$0xff]   ;;  %v7243_v35 = vld [vmem:[%s9108_s5 + $0x64] sm:$0xf] }
  0xf1   : > { %8475 = vmatpush3.bf16.msra.mxu0 %v8728_v38  ;;  %4174 = vmatprep.mubr.bf16.mxu0 %v7164_v61  ;;  %v1492_v38 = vshrl.u32 %v7047_v17, 16  ;;  %v7165_v47 = vcombine.low %v1969_v34, %v1972_v43  ;;  %v2435_v53 = vsel %vm9130_vm5, %v2430_v31, %v2434_v29  ;;  %v1503_v56 = vrot.slane %v1501_v40, 5  ;;  %v7244_v43 = vld [vmem:[%s9108_s5 + $0x68] sm:$0x1] }
  0xf2   : > { %8476 = vmatprep.subr.bf16.mxu0 %v8731_v6  ;;  %4328 = vmatmul.mubr.bf16.gmra.mrb[76].mxu1 %v8715_v60  ;;  %v1507_v57 = vrot.slane %v1505_v44, 4  ;;  %v7276_v59 = vcombine.low %v2425_v46, %v2435_v53  ;;  %v1511_v60 = vshll.u32 %v7049_v36, 16  ;;  %v2437_v61 = vshrl.u32 %v7239_v41, 16  ;;  %v7117_v44 = vld [vmem:[%s9108_s5 + $0x60] sm:$0xe] }
  0xf3   : > { %v1494_v50 = vrot.slane %v1492_v38, 4  ;;  %v2440_v62 = vshll.u32 %v7239_v41, 16  ;;  %v2446_v1 = vshll.u32 %v7240_v51, 16  ;;  %v2450_v2 = vshrl.u32 %v7240_v51, 16  ;;  %v7118_v51 = vld [vmem:[%s9108_s5 + $0x64] sm:$0xf] }
  0xf4   : > { %v1508_v0 = vor.u32 %v1507_v57, %v1503_v56  ;;  %4335 = vmatprep.mubr.bf16.mxu1 %v7276_v59  ;;  %v1513_v4 = vrot.slane %v1511_v60, 5  ;;  %v2439_v5 = vrot.slane %v2437_v61, 4  ;;  %v2456_v7 = vshll.u32 %v7241_v52, 16  ;;  %v7053_v61 = vld [vmem:[%s9108_s5 + $0x60] sm:$0xf] }
  0xf5   : > { %8477 = vmatpush3.bf16.msra.mxu0 %v8731_v6  ;;  %v1498_v63 = vor.u32 %v1497_v55, %v1494_v50  ;;  %v2442_v6 = vrot.slane %v2440_v62, 5  ;;  %v2448_v11 = vrot.slane %v2446_v1, 5  ;;  %v2452_v12 = vrot.slane %v2450_v2, 4 }
  0xf6   : > { %v1509_v10 = vrot.slane %v1508_v0, 4  ;;  %v2458_v15 = vrot.slane %v2456_v7, 5  ;;  %v7150_v16 = vrot.slane %v7114_v58, 9  ;;  %v1975_v17 = vrot.slane %v7115_v3, 5 }
  0xf7   : > { %v1499_v9 = vrot.slane %v1498_v63, 4  ;;  %v2443_v14 = vor.u32 %v2442_v6, %v2439_v5  ;;  %v2453_v21 = vor.u32 %v2452_v12, %v2448_v11  ;;  %v1978_v22 = vrot.slane %v7116_v8, 5 }
  0xf8   : > { %4175 = vmatmul.mubr.bf16.gmra.mrb[80].mxu0 %v7084_v45  ;;  %v1514_v20 = vsel %vm9130_vm5, %v1509_v10, %v1513_v4  ;;  %v1976_v26 = vsel %vm9124_vm4, %v7150_v16, %v1975_v17  ;;  %v1977_v27 = vrot.slane %v1975_v17, 4  ;;  %v1516_v32 = vshrl.u32 %v7050_v13, 16  ;;  %v7245_v16 = vld [vmem:[%s9108_s5 + $0x6c] sm:$0xf] }
  0xf9   : > { %4182 = vmatprep.mubr.bf16.mxu0 %v7165_v47  ;;  %v1504_v19 = vsel %vm9130_vm5, %v1499_v9, %v1503_v56  ;;  %v2444_v25 = vrot.slane %v2443_v14, 4  ;;  %v2454_v29 = vrot.slane %v2453_v21, 4  ;;  %v1519_v33 = vshll.u32 %v7050_v13, 16  ;;  %v7119_v56 = vld [vmem:[%s9108_s5 + $0x68] sm:$0x1] }
  0xfa   : > { %4336 = vmatmul.mubr.bf16.gmra.mrb[80].mxu1 %v8717_v54  ;;  %v7085_v24 = vcombine.low %v1504_v19, %v1514_v20  ;;  %v1525_v34 = vshll.u32 %v7051_v18, 16  ;;  %v1979_v37 = vsel %vm9124_vm4, %v1977_v27, %v1978_v22  ;;  %v1529_v38 = vshrl.u32 %v7051_v18, 16  ;;  %v7054_v9 = vld [vmem:[%s9108_s5 + $0x64] sm:$0xf] }
  0xfb   : > { %v2449_v36 = vsel %vm9130_vm5, %v2444_v25, %v2448_v11  ;;  %v1535_v39 = vshll.u32 %v7052_v23, 16  ;;  %v2459_v40 = vsel %vm9130_vm5, %v2454_v29, %v2458_v15  ;;  %v7166_v41 = vcombine.low %v1976_v26, %v1979_v37  ;;  %v7055_v15 = vld [vmem:[%s9108_s5 + $0x68] sm:$0x1]  ;;  %v7246_v29 = vld [vmem:[%s9108_s5 + $0x70] sm:$0xf] }
  0xfc   : > { %v1518_v42 = vrot.slane %v1516_v32, 4  ;;  %v1521_v31 = vrot.slane %v1519_v33, 5  ;;  %v7277_v45 = vcombine.low %v2449_v36, %v2459_v40  ;;  %v1527_v46 = vrot.slane %v1525_v34, 5  ;;  %v8720_v33 = vld [vmem:[%s9108_s5 + $0x60] sm:$0xff]   ;;  %v7120_v37 = vld [vmem:[%s9108_s5 + $0x6c] sm:$0xe] }
  0xfd   : > { %v1531_v47 = vrot.slane %v1529_v38, 4  ;;  %v1537_v50 = vrot.slane %v1535_v39, 5  ;;  %v2461_v53 = vshrl.u32 %v7242_v28, 16  ;;  %v2464_v54 = vshll.u32 %v7242_v28, 16 }
  0xfe   : > { %v1522_v52 = vor.u32 %v1521_v31, %v1518_v42  ;;  %v2470_v55 = vshll.u32 %v7243_v35, 16  ;;  %4343 = vmatprep.mubr.bf16.mxu1 %v7277_v45  ;;  %v2474_v58 = vshrl.u32 %v7243_v35, 16  ;;  %v2480_v59 = vshll.u32 %v7244_v43, 16  ;;  %v7121_v42 = vld [vmem:[%s9108_s5 + $0x70] sm:$0xf] }
  0xff   : > { %v1532_v57 = vor.u32 %v1531_v47, %v1527_v46  ;;  %v7151_v60 = vrot.slane %v7117_v44, 9  ;;  %v2463_v63 = vrot.slane %v2461_v53, 4  ;;  %v2466_v0 = vrot.slane %v2464_v54, 5 }
 0x100   : > { %4183 = vmatmul.mubr.bf16.gmra.mrb[84].mxu0 %v7085_v24  ;;  %v1523_v62 = vrot.slane %v1522_v52, 4  ;;  %v2472_v1 = vrot.slane %v2470_v55, 5  ;;  %v2476_v3 = vrot.slane %v2474_v58, 4  ;;  %v2482_v4 = vrot.slane %v2480_v59, 5 }
 0x101   : > { %4190 = vmatprep.mubr.bf16.mxu0 %v7166_v41  ;;  %v1533_v2 = vrot.slane %v1532_v57, 4  ;;  %v1982_v5 = vrot.slane %v7118_v51, 5  ;;  %v2467_v7 = vor.u32 %v2466_v0, %v2463_v63  ;;  %v1985_v8 = vrot.slane %v7119_v56, 5  ;;  %v7056_v57 = vld [vmem:[%s9108_s5 + $0x6c] sm:$0xf] }
 0x102   : > { %4344 = vmatmul.mubr.bf16.gmra.mrb[84].mxu1 %v8718_v30  ;;  %v1528_v6 = vsel %vm9130_vm5, %v1523_v62, %v1527_v46  ;;  %v1540_v10 = vshrl.u32 %v7053_v61, 16  ;;  %v2477_v12 = vor.u32 %v2476_v3, %v2472_v1  ;;  %v1543_v20 = vshll.u32 %v7053_v61, 16  ;;  %v7247_v30 = vld [vmem:[%s9108_s5 + $0x74] sm:$0x1]  ;;  %v7057_v62 = vld [vmem:[%s9108_s5 + $0x70] sm:$0xf] }
 0x103   : > { %v1538_v11 = vsel %vm9130_vm5, %v1533_v2, %v1537_v50  ;;  %v1983_v13 = vsel %vm9124_vm4, %v7151_v60, %v1982_v5  ;;  %v1984_v14 = vrot.slane %v1982_v5, 4  ;;  %v2468_v18 = vrot.slane %v2467_v7, 4  ;;  %v7122_v46 = vld [vmem:[%s9108_s5 + $0x74] sm:$0x1] }
 0x104   : > { %v7086_v17 = vcombine.low %v1528_v6, %v1538_v11  ;;  %v1542_v19 = vrot.slane %v1540_v10, 4  ;;  %v2478_v21 = vrot.slane %v2477_v12, 4  ;;  %v1549_v23 = vshll.u32 %v7054_v9, 16  ;;  %v7058_v3 = vld [vmem:[%s9108_s5 + $0x74] sm:$0x1] }
 0x105   : > { %v1986_v22 = vsel %vm9124_vm4, %v1984_v14, %v1985_v8  ;;  %v1553_v24 = vshrl.u32 %v7054_v9, 16  ;;  %v2473_v25 = vsel %vm9130_vm5, %v2468_v18, %v2472_v1  ;;  %v1545_v27 = vrot.slane %v1543_v20, 5  ;;  %v7248_v8 = vld [vmem:[%s9108_s5 + $0x78] sm:$0xf]  ;;  %v7250_v18 = vld [vmem:[%s9108_s5 + $0x80] sm:$0x1] }
 0x106   : > { %v7167_v26 = vcombine.low %v1983_v13, %v1986_v22  ;;  %v1559_v28 = vshll.u32 %v7055_v15, 16  ;;  %v2483_v32 = vsel %vm9130_vm5, %v2478_v21, %v2482_v4  ;;  %v1551_v34 = vrot.slane %v1549_v23, 5  ;;  %v7249_v13 = vld [vmem:[%s9108_s5 + $0x7c] sm:$0xf]  ;;  %v8721_v21 = vld [vmem:[%s9108_s5 + $0x6c] sm:$0xff]  }
 0x107   : > { %v1555_v35 = vrot.slane %v1553_v24, 4  ;;  %v2485_v36 = vshrl.u32 %v7245_v16, 16  ;;  %v7278_v38 = vcombine.low %v2473_v25, %v2483_v32  ;;  %v1546_v39 = vor.u32 %v1545_v27, %v1542_v19  ;;  %v7123_v19 = vld [vmem:[%s9108_s5 + $0x78] sm:$0xe]  ;;  %v7124_v25 = vld [vmem:[%s9108_s5 + $0x7c] sm:$0xf] }
 0x108   : > { %4191 = vmatmul.mubr.bf16.gmra.mrb[88].mxu0 %v7086_v17  ;;  %v1561_v40 = vrot.slane %v1559_v28, 5  ;;  %v2488_v41 = vshll.u32 %v7245_v16, 16  ;;  %v2494_v44 = vshll.u32 %v7246_v29, 16  ;;  %v2498_v45 = vshrl.u32 %v7246_v29, 16 }
 0x109   : > { %4198 = vmatprep.mubr.bf16.mxu0 %v7167_v26  ;;  %v1556_v31 = vor.u32 %v1555_v35, %v1551_v34  ;;  %v2487_v43 = vrot.slane %v2485_v36, 4  ;;  %4351 = vmatprep.mubr.bf16.mxu1 %v7278_v38  ;;  %v1547_v47 = vrot.slane %v1546_v39, 4  ;;  %v2504_v51 = vshll.u32 %v7247_v30, 16  ;;  %v7125_v35 = vld [vmem:[%s9108_s5 + $0x80] sm:$0x1] }
 0x10a   : > { %v2490_v50 = vrot.slane %v2488_v41, 5  ;;  %v7152_v52 = vrot.slane %v7120_v37, 9  ;;  %4352 = vmatmul.mubr.bf16.gmra.mrb[88].mxu1 %v8720_v33  ;;  %v2496_v54 = vrot.slane %v2494_v44, 5  ;;  %v2500_v55 = vrot.slane %v2498_v45, 4  ;;  %v7060_v44 = vld [vmem:[%s9108_s5 + $0x7c] sm:$0xf] }
 0x10b   : > { %v1557_v53 = vrot.slane %v1556_v31, 4  ;;  %v1989_v56 = vrot.slane %v7121_v42, 5  ;;  %v1552_v58 = vsel %vm9130_vm5, %v1547_v47, %v1551_v34  ;;  %v2506_v60 = vrot.slane %v2504_v51, 5 }
 0x10c   : > { %v2491_v59 = vor.u32 %v2490_v50, %v2487_v43  ;;  %v1992_v61 = vrot.slane %v7122_v46, 5  ;;  %v2501_v0 = vor.u32 %v2500_v55, %v2496_v54  ;;  %v1564_v6 = vshrl.u32 %v7056_v57, 16 }
 0x10d   : > { %v1562_v63 = vsel %vm9130_vm5, %v1557_v53, %v1561_v40  ;;  %v1990_v1 = vsel %vm9124_vm4, %v7152_v52, %v1989_v56  ;;  %v1991_v2 = vrot.slane %v1989_v56, 4  ;;  %v1567_v7 = vshll.u32 %v7056_v57, 16  ;;  %v7059_v40 = vld [vmem:[%s9108_s5 + $0x78] sm:$0xf]  ;;  %v7251_v56 = vld [vmem:[%s9108_s5 + $0x84] sm:$0xf] }
 0x10e   : > { %v7087_v4 = vcombine.low %v1552_v58, %v1562_v63  ;;  %v2492_v5 = vrot.slane %v2491_v59, 4  ;;  %v2502_v9 = vrot.slane %v2501_v0, 4  ;;  %v1573_v11 = vshll.u32 %v7057_v62, 16  ;;  %v8723_v0 = vld [vmem:[%s9108_s5 + $0x78] sm:$0xff]  }
 0x10f   : > { %v1993_v10 = vsel %vm9124_vm4, %v1991_v2, %v1992_v61  ;;  %v1577_v12 = vshrl.u32 %v7057_v62, 16  ;;  %v1566_v16 = vrot.slane %v1564_v6, 4  ;;  %v1569_v17 = vrot.slane %v1567_v7, 5  ;;  %v7252_v61 = vld [vmem:[%s9108_s5 + $0x88] sm:$0xf] }
 0x110   : > { %4199 = vmatmul.mubr.bf16.gmra.mrb[92].mxu0 %v7087_v4  ;;  %v2497_v14 = vsel %vm9130_vm5, %v2492_v5, %v2496_v54  ;;  %v7168_v15 = vcombine.low %v1990_v1, %v1993_v10  ;;  %v2507_v20 = vsel %vm9130_vm5, %v2502_v9, %v2506_v60  ;;  %v1575_v22 = vrot.slane %v1573_v11, 5  ;;  %v7061_v54 = vld [vmem:[%s9108_s5 + $0x80] sm:$0x1]  ;;  %v7253_v10 = vld [vmem:[%s9108_s5 + $0x8c] sm:$0x1] }
 0x111   : > { %v1579_v23 = vrot.slane %v1577_v12, 4  ;;  %v1583_v24 = vshll.u32 %v7058_v3, 16  ;;  %v7279_v26 = vcombine.low %v2497_v14, %v2507_v20  ;;  %v1570_v27 = vor.u32 %v1569_v17, %v1566_v16  ;;  %v7126_v17 = vld [vmem:[%s9108_s5 + $0x84] sm:$0xe] }
 0x112   : > { %4206 = vmatprep.mubr.bf16.mxu0 %v7168_v15  ;;  %v2509_v28 = vshrl.u32 %v7248_v8, 16  ;;  %v2512_v29 = vshll.u32 %v7248_v8, 16  ;;  %v2518_v33 = vshll.u32 %v7249_v13, 16  ;;  %v2522_v34 = vshrl.u32 %v7249_v13, 16 }
 0x113   : > { %v1580_v30 = vor.u32 %v1579_v23, %v1575_v22  ;;  %v1585_v32 = vrot.slane %v1583_v24, 5  ;;  %4359 = vmatprep.mubr.bf16.mxu1 %v7279_v26  ;;  %v1571_v36 = vrot.slane %v1570_v27, 4  ;;  %v2528_v39 = vshll.u32 %v7250_v18, 16  ;;  %v7127_v24 = vld [vmem:[%s9108_s5 + $0x88] sm:$0xf] }
 0x114   : > { %v2511_v37 = vrot.slane %v2509_v28, 4  ;;  %v2514_v38 = vrot.slane %v2512_v29, 5  ;;  %4360 = vmatmul.mubr.bf16.gmra.mrb[92].mxu1 %v8721_v21  ;;  %v2520_v42 = vrot.slane %v2518_v33, 5  ;;  %v2524_v31 = vrot.slane %v2522_v34, 4 }
 0x115   : > { %v1581_v41 = vrot.slane %v1580_v30, 4  ;;  %v7153_v43 = vrot.slane %v7123_v19, 9  ;;  %v1576_v45 = vsel %vm9130_vm5, %v1571_v36, %v1575_v22  ;;  %v2530_v47 = vrot.slane %v2528_v39, 5  ;;  %v7128_v30 = vld [vmem:[%s9108_s5 + $0x8c] sm:$0x1] }
 0x116   : > { %v2515_v46 = vor.u32 %v2514_v38, %v2511_v37  ;;  %v1996_v50 = vrot.slane %v7124_v25, 5  ;;  %v2525_v52 = vor.u32 %v2524_v31, %v2520_v42  ;;  %v1999_v53 = vrot.slane %v7125_v35, 5  ;;  %v7062_v36 = vld [vmem:[%s9108_s5 + $0x84] sm:$0xf] }
 0x117   : > { %v1586_v51 = vsel %vm9130_vm5, %v1581_v41, %v1585_v32  ;;  %v1588_v55 = vshrl.u32 %v7059_v40, 16  ;;  %v1591_v2 = vshll.u32 %v7059_v40, 16  ;;  %v1597_v3 = vshll.u32 %v7060_v44, 16  ;;  %v7063_v41 = vld [vmem:[%s9108_s5 + $0x88] sm:$0xf] }
 0x118   : > { %v7088_v57 = vcombine.low %v1576_v45, %v1586_v51  ;;  %v2516_v58 = vrot.slane %v2515_v46, 4  ;;  %v1997_v59 = vsel %vm9124_vm4, %v7153_v43, %v1996_v50  ;;  %v1998_v60 = vrot.slane %v1996_v50, 4  ;;  %v7064_v50 = vld [vmem:[%s9108_s5 + $0x8c] sm:$0x1] }
 0x119   : > { %v2526_v63 = vrot.slane %v2525_v52, 4  ;;  %v1590_v1 = vrot.slane %v1588_v55, 4  ;;  %v1601_v8 = vshrl.u32 %v7060_v44, 16  ;;  %v1607_v9 = vshll.u32 %v7061_v54, 16 }
 0x11a   : > { %4207 = vmatmul.mubr.bf16.gmra.mrb[96].mxu0 %v7088_v57  ;;  %v2521_v6 = vsel %vm9130_vm5, %v2516_v58, %v2520_v42  ;;  %v2000_v7 = vsel %vm9124_vm4, %v1998_v60, %v1999_v53  ;;  %v1593_v15 = vrot.slane %v1591_v2, 5  ;;  %v1599_v16 = vrot.slane %v1597_v3, 5  ;;  %v7254_v57 = vld [vmem:[%s9108_s5 + $0x90] sm:$0xf]  ;;  %v7255_v58 = vld [vmem:[%s9108_s5 + $0x94] sm:$0xf] }
 0x11b   : > { %v2531_v13 = vsel %vm9130_vm5, %v2526_v63, %v2530_v47  ;;  %v7169_v14 = vcombine.low %v1997_v59, %v2000_v7  ;;  %v1603_v21 = vrot.slane %v1601_v8, 4  ;;  %v1609_v22 = vrot.slane %v1607_v9, 5 }
 0x11c   : > { %v7280_v20 = vcombine.low %v2521_v6, %v2531_v13  ;;  %v2533_v23 = vshrl.u32 %v7251_v56, 16  ;;  %v1594_v26 = vor.u32 %v1593_v15, %v1590_v1  ;;  %v2536_v27 = vshll.u32 %v7251_v56, 16  ;;  %v8724_v15 = vld [vmem:[%s9108_s5 + $0x84] sm:$0xff]  }
 0x11d   : > { %4214 = vmatprep.mubr.bf16.mxu0 %v7169_v14  ;;  %v2542_v28 = vshll.u32 %v7252_v61, 16  ;;  %v2546_v29 = vshrl.u32 %v7252_v61, 16  ;;  %v1604_v32 = vor.u32 %v1603_v21, %v1599_v16  ;;  %v2552_v34 = vshll.u32 %v7253_v10, 16 }
 0x11e   : > { %4367 = vmatprep.mubr.bf16.mxu1 %v7280_v20  ;;  %v2535_v33 = vrot.slane %v2533_v23, 4  ;;  %v7154_v35 = vrot.slane %v7126_v17, 9  ;;  %v1595_v37 = vrot.slane %v1594_v26, 4  ;;  %v2538_v38 = vrot.slane %v2536_v27, 5  ;;  %v7256_v20 = vld [vmem:[%s9108_s5 + $0x98] sm:$0x1] }
 0x11f   : > { %4368 = vmatmul.mubr.bf16.gmra.mrb[96].mxu1 %v8723_v0  ;;  %v2544_v39 = vrot.slane %v2542_v28, 5  ;;  %v2548_v40 = vrot.slane %v2546_v29, 4  ;;  %v1605_v42 = vrot.slane %v1604_v32, 4  ;;  %v2554_v31 = vrot.slane %v2552_v34, 5  ;;  %v7130_v34 = vld [vmem:[%s9108_s5 + $0x94] sm:$0xf] }
 0x120   : > { %v2003_v43 = vrot.slane %v7127_v24, 5  ;;  %v2006_v44 = vrot.slane %v7128_v30, 5  ;;  %v1600_v45 = vsel %vm9130_vm5, %v1595_v37, %v1599_v16  ;;  %v2539_v46 = vor.u32 %v2538_v38, %v2535_v33  ;;  %v7129_v33 = vld [vmem:[%s9108_s5 + $0x90] sm:$0xe] }
 0x121   : > { %v2549_v47 = vor.u32 %v2548_v40, %v2544_v39  ;;  %v1612_v51 = vshrl.u32 %v7062_v36, 16  ;;  %v1610_v53 = vsel %vm9130_vm5, %v1605_v42, %v1609_v22  ;;  %v1615_v56 = vshll.u32 %v7062_v36, 16 }
 0x122   : > { %v2004_v54 = vsel %vm9124_vm4, %v7154_v35, %v2003_v43  ;;  %v2005_v55 = vrot.slane %v2003_v43, 4  ;;  %v7089_v60 = vcombine.low %v1600_v45, %v1610_v53  ;;  %v2540_v61 = vrot.slane %v2539_v46, 4 }
 0x123   : > { %v2550_v63 = vrot.slane %v2549_v47, 4  ;;  %v1614_v0 = vrot.slane %v1612_v51, 4  ;;  %v1617_v6 = vrot.slane %v1615_v56, 5  ;;  %v1621_v7 = vshll.u32 %v7063_v41, 16  ;;  %v7065_v51 = vld [vmem:[%s9108_s5 + $0x90] sm:$0xf] }
 0x124   : > { %v2007_v3 = vsel %vm9124_vm4, %v2005_v55, %v2006_v44  ;;  %v1625_v8 = vshrl.u32 %v7063_v41, 16  ;;  %4215 = vmatmul.mubr.bf16.gmra.mrb[100].mxu0 %v7089_v60  ;;  %v2545_v13 = vsel %vm9130_vm5, %v2540_v61, %v2544_v39  ;;  %v1631_v17 = vshll.u32 %v7064_v50, 16  ;;  %v7131_v39 = vld [vmem:[%s9108_s5 + $0x98] sm:$0x1]  ;;  %v7066_v56 = vld [vmem:[%s9108_s5 + $0x94] sm:$0xf] }
 0x125   : > { %v2555_v14 = vsel %vm9130_vm5, %v2550_v63, %v2554_v31  ;;  %v7170_v16 = vcombine.low %v2004_v54, %v2007_v3  ;;  %v1618_v23 = vor.u32 %v1617_v6, %v1614_v0  ;;  %v1623_v24 = vrot.slane %v1621_v7, 5 }
 0x126   : > { %v7281_v22 = vcombine.low %v2545_v13, %v2555_v14  ;;  %v1627_v26 = vrot.slane %v1625_v8, 4  ;;  %v1633_v28 = vrot.slane %v1631_v17, 5  ;;  %v2557_v29 = vshrl.u32 %v7254_v57, 16 }
 0x127   : > { %4222 = vmatprep.mubr.bf16.mxu0 %v7170_v16  ;;  %v2560_v30 = vshll.u32 %v7254_v57, 16  ;;  %v2566_v32 = vshll.u32 %v7255_v58, 16  ;;  %v1619_v35 = vrot.slane %v1618_v23, 4  ;;  %v2570_v37 = vshrl.u32 %v7255_v58, 16 }
 0x128   : > { %4375 = vmatprep.mubr.bf16.mxu1 %v7281_v22  ;;  %v1628_v36 = vor.u32 %v1627_v26, %v1623_v24  ;;  %v2576_v38 = vshll.u32 %v7256_v20, 16  ;;  %v2559_v41 = vrot.slane %v2557_v29, 4  ;;  %v7155_v60 = vrot.slane %v7129_v33, 9  ;;  %v7257_v22 = vld [vmem:[%s9108_s5 + $0x9c] sm:$0xf] }
 0x129   : > { %4376 = vmatmul.mubr.bf16.gmra.mrb[100].mxu1 %v8724_v15  ;;  %v2562_v42 = vrot.slane %v2560_v30, 5  ;;  %v2568_v31 = vrot.slane %v2566_v32, 5  ;;  %v1624_v45 = vsel %vm9130_vm5, %v1619_v35, %v1623_v24  ;;  %v2572_v47 = vrot.slane %v2570_v37, 4  ;;  %v7258_v30 = vld [vmem:[%s9108_s5 + $0xa0] sm:$0xf] }
 0x12a   : > { %v1629_v46 = vrot.slane %v1628_v36, 4  ;;  %v2578_v50 = vrot.slane %v2576_v38, 5  ;;  %v2010_v61 = vrot.slane %v7130_v34, 5  ;;  %v1636_v3 = vshrl.u32 %v7065_v51, 16  ;;  %v7259_v32 = vld [vmem:[%s9108_s5 + $0xa4] sm:$0x1] }
 0x12b   : > { %v9714_v4 = vpop.f32.mrb[0].mxu0  ;;  %v2563_v54 = vor.u32 %v2562_v42, %v2559_v41  ;;  %v2573_v58 = vor.u32 %v2572_v47, %v2568_v31  ;;  %v1639_v13 = vshll.u32 %v7065_v51, 16  ;;  %v1645_v17 = vshll.u32 %v7066_v56, 16  ;;  %v7132_v42 = vld [vmem:[%s9108_s5 + $0x9c] sm:$0xe] }
 0x12c   : > { %v9711_v62 = vpop.f32.mrb[0].mxu1  ;;  %v9723_v11 = vpop.f32.mrb[1].mxu0  ;;  %v1634_v57 = vsel %vm9130_vm5, %v1629_v46, %v1633_v28  ;;  %v2011_v7 = vsel %vm9124_vm4, %v7155_v60, %v2010_v61  ;;  %v2012_v8 = vrot.slane %v2010_v61, 4  ;;  %v1638_v16 = vrot.slane %v1636_v3, 4  ;;  %v7133_v51 = vld [vmem:[%s9108_s5 + $0xa0] sm:$0xf] }
 0x12d   : > { %v9716_v5 = vpop.f32.mrb[1].mxu1  ;;  %v9730_v18 = vpop.f32.mrb[2].mxu0  ;;  %v9780_v43 = vadd.f32 %v9723_v11, %v9714_v4  ;;  %v2564_v0 = vrot.slane %v2563_v54, 4  ;;  %v1649_v20 = vshrl.u32 %v7066_v56, 16  ;;  %v1641_v28 = vrot.slane %v1639_v13, 5 }
 0x12e   : > { %v9725_v12 = vpop.f32.mrb[2].mxu1  ;;  %v9735_v25 = vpop.f32.mrb[3].mxu0  ;;  %v9791_v55 = vadd.f32 %v9716_v5, %v9711_v62  ;;  %v7090_v5 = vcombine.low %v1624_v45, %v1634_v57  ;;  %v1647_v35 = vrot.slane %v1645_v17, 5  ;;  %v2584_v41 = vshll.u32 %v7257_v22, 16  ;;  %v7134_v54 = vld [vmem:[%s9108_s5 + $0xa4] sm:$0x1] }
 0x12f   : > { %v9732_v19 = vpop.f32.mrb[3].mxu1  ;;  %v9795_v4 = vadd.f32 %v9735_v25, %v9730_v18  ;;  %v2013_v18 = vrot.slane %v7131_v39, 5  ;;  %v7067_v25 = vld [vmem:[%s9108_s5 + $0x98] sm:$0x1]  ;;  %v2569_v15 = vsel %vm9130_vm5, %v2564_v0, %v2568_v31  ;;  %v1651_v36 = vrot.slane %v1649_v20, 4  ;;  %v8734_v20 = vld [vmem:[#allocation4 + $0x40] sm:$0xff]  }
 0x130   : > { %v9799_v11 = vadd.f32 %v9732_v19, %v9725_v12  ;;  %v2574_v12 = vrot.slane %v2573_v58, 4  ;;  %v8726_v19 = vld [vmem:[%s9108_s5 + $0x90] sm:$0xff]   ;;  %4223 = vmatmul.mubr.bf16.gmra.mrb[104].mxu0 %v7090_v5  ;;  %v1655_v29 = vshll.u32 %v7067_v25, 16  ;;  %v1642_v37 = vor.u32 %v1641_v28, %v1638_v16  ;;  %7990 = vmatprep.subr.bf16.mxu1 %v8734_v20 }
 0x131   : > { %v2014_v26 = vsel %vm9124_vm4, %v2012_v8, %v2013_v18  ;;  %v2581_v39 = vshrl.u32 %v7257_v22, 16  ;;  %v1652_v45 = vor.u32 %v1651_v36, %v1647_v35  ;;  %v2590_v46 = vshll.u32 %v7258_v30, 16 }
 0x132   : > { %v2579_v24 = vsel %vm9130_vm5, %v2574_v12, %v2578_v50  ;;  %v7171_v34 = vcombine.low %v2011_v7, %v2014_v26  ;;  %v1657_v38 = vrot.slane %v1655_v29, 5  ;;  %v2594_v47 = vshrl.u32 %v7258_v30, 16  ;;  %v7070_v29 = vld [vmem:[%s9108_s5 + $0xa4] sm:$0x1] }
 0x133   : > { %v9753_v1 = vpop.f32.mrb[4].mxu0  ;;  %v7282_v33 = vcombine.low %v2569_v15, %v2579_v24  ;;  %v2600_v50 = vshll.u32 %v7259_v32, 16  ;;  %v1643_v57 = vrot.slane %v1642_v37, 4  ;;  %v2583_v58 = vrot.slane %v2581_v39, 4 }
 0x134   : > { %v9743_v52 = vpop.f32.mrb[4].mxu1  ;;  %v9759_v9 = vpop.f32.mrb[5].mxu0  ;;  %4230 = vmatprep.mubr.bf16.mxu0 %v7171_v34  ;;  %v2586_v60 = vrot.slane %v2584_v41, 5  ;;  %v1653_v0 = vrot.slane %v1652_v45, 4  ;;  %v2592_v18 = vrot.slane %v2590_v46, 5  ;;  %v2596_v25 = vrot.slane %v2594_v47, 4 }
 0x135   : > { %v9751_v59 = vpop.f32.mrb[5].mxu1  ;;  %v9769_v21 = vpop.f32.mrb[6].mxu0  ;;  %4383 = vmatprep.mubr.bf16.mxu1 %v7282_v33  ;;  %v9836_v61 = vadd.f32 %v9759_v9, %v9753_v1  ;;  %v2602_v3 = vrot.slane %v2600_v50, 5  ;;  %v1648_v12 = vsel %vm9130_vm5, %v1643_v57, %v1647_v35  ;;  %v7068_v1 = vld [vmem:[%s9108_s5 + $0x9c] sm:$0xf]  ;;  %v2017_v26 = vrot.slane %v7133_v51, 5 }
 0x136   : > { %v9755_v2 = vpop.f32.mrb[6].mxu1  ;;  %v9771_v27 = vpop.f32.mrb[7].mxu0  ;;  %4384 = vmatmul.mubr.bf16.gmra.mrb[104].mxu1 %v8726_v19  ;;  %v2587_v7 = vor.u32 %v2586_v60, %v2583_v58  ;;  %v9844_v19 = vadd.f32 %v9751_v59, %v9743_v52  ;;  %v7069_v9 = vld [vmem:[%s9108_s5 + $0xa0] sm:$0xf]  ;;  %v1658_v16 = vsel %vm9130_vm5, %v1653_v0, %v1657_v38  ;;  %v2597_v17 = vor.u32 %v2596_v25, %v2592_v18  ;;  %v7260_v35 = vld [vmem:[%s9108_s5 + $0xa8] sm:$0xf] }
 0x137   : > { %v9761_v10 = vpop.f32.mrb[7].mxu1  ;;  %v9848_v8 = vadd.f32 %v9771_v27, %v9769_v21  ;;  %v7156_v59 = vrot.slane %v7132_v42, 9  ;;  %v7091_v22 = vcombine.low %v1648_v12, %v1658_v16  ;;  %v2020_v28 = vrot.slane %v7134_v54, 5  ;;  %v8727_v33 = vld [vmem:[%s9108_s5 + $0x9c] sm:$0xff]   ;;  %v7261_v41 = vld [vmem:[%s9108_s5 + $0xac] sm:$0xf] }
 0x138   : > { %11252 = vst [vmem:[#allocation10_spill] sm:$0xff] %v9844_v19  ;;  %v9860_v52 = vadd.f32 %v9761_v10, %v9755_v2  ;;  %v2588_v24 = vrot.slane %v2587_v7, 4  ;;  %v2598_v32 = vrot.slane %v2597_v17, 4  ;;  %v1660_v34 = vshrl.u32 %v7068_v1, 16  ;;  %v7262_v60 = vld [vmem:[%s9108_s5 + $0xb0] sm:$0x1] }
 0x139   : > { %11253 = vst [vmem:[#allocation11_spill] sm:$0xff] %v9848_v8  ;;  %v1663_v2 = vshll.u32 %v7068_v1, 16  ;;  %v1669_v10 = vshll.u32 %v7069_v9, 16  ;;  %4231 = vmatmul.mubr.bf16.gmra.mrb[108].mxu0 %v7091_v22  ;;  %v2018_v37 = vsel %vm9124_vm4, %v7156_v59, %v2017_v26  ;;  %v2019_v38 = vrot.slane %v2017_v26, 4  ;;  %v7135_v16 = vld [vmem:[%s9108_s5 + $0xa8] sm:$0xe] }
 0x13a   : > { %11254 = vst [vmem:[#allocation12_spill] sm:$0xff] %v9860_v52  ;;  %v2593_v36 = vsel %vm9130_vm5, %v2588_v24, %v2592_v18  ;;  %v1673_v39 = vshrl.u32 %v7069_v9, 16  ;;  %v2603_v42 = vsel %vm9130_vm5, %v2598_v32, %v2602_v3  ;;  %v1662_v45 = vrot.slane %v1660_v34, 4  ;;  %v7136_v17 = vld [vmem:[%s9108_s5 + $0xac] sm:$0xf] }
 0x13b   : > { %v9804_v63 = vpop.f32.mrb[8].mxu0  ;;  %v1665_v46 = vrot.slane %v1663_v2, 5  ;;  %v1671_v47 = vrot.slane %v1669_v10, 5  ;;  %v7283_v51 = vcombine.low %v2593_v36, %v2603_v42  ;;  %v2021_v54 = vsel %vm9124_vm4, %v2019_v38, %v2020_v28  ;;  %v7137_v28 = vld [vmem:[%s9108_s5 + $0xb0] sm:$0x1] }
 0x13c   : > { %v9776_v40 = vpop.f32.mrb[8].mxu1  ;;  %v9809_v6 = vpop.f32.mrb[9].mxu0  ;;  %v1675_v57 = vrot.slane %v1673_v39, 4  ;;  %v1679_v58 = vshll.u32 %v7070_v29, 16  ;;  %v7172_v0 = vcombine.low %v2018_v37, %v2021_v54  ;;  %v2605_v25 = vshrl.u32 %v7260_v35, 16  ;;  %v8735_v37 = vld [vmem:[#allocation4] sm:$0xff]  }
 0x13d   : > { %v9782_v44 = vpop.f32.mrb[9].mxu1  ;;  %v9814_v14 = vpop.f32.mrb[10].mxu0  ;;  %v1666_v18 = vor.u32 %v1665_v46, %v1662_v45  ;;  %v2608_v12 = vshll.u32 %v7260_v35, 16  ;;  %4391 = vmatprep.mubr.bf16.mxu1 %v7283_v51  ;;  %v2614_v1 = vshll.u32 %v7261_v41, 16  ;;  %v2618_v9 = vshrl.u32 %v7261_v41, 16  ;;  %7991 = vmatpush3.bf16.msra.mxu1 %v8735_v37 }
 0x13e   : > { %v9787_v53 = vpop.f32.mrb[10].mxu1  ;;  %v9819_v23 = vpop.f32.mrb[11].mxu0  ;;  %v1676_v3 = vor.u32 %v1675_v57, %v1671_v47  ;;  %v1681_v7 = vrot.slane %v1679_v58, 5  ;;  %4392 = vmatmul.mubr.bf16.gmra.mrb[108].mxu1 %v8727_v33  ;;  %4238 = vmatprep.mubr.bf16.mxu0 %v7172_v0  ;;  %v2607_v22 = vrot.slane %v2605_v25, 4  ;;  %v2624_v26 = vshll.u32 %v7262_v60, 16 }
 0x13f   : > { %v9806_v62 = vpop.f32.mrb[11].mxu1  ;;  %v1667_v20 = vrot.slane %v1666_v18, 4  ;;  %v2610_v24 = vrot.slane %v2608_v12, 5  ;;  %v2616_v2 = vrot.slane %v2614_v1, 5  ;;  %v2620_v10 = vrot.slane %v2618_v9, 4  ;;  %v8729_v12 = vld [vmem:[%s9108_s5 + $0xa8] sm:$0xff]  }
 0x140   : > { %v1677_v34 = vrot.slane %v1676_v3, 4  ;;  %v9894_v35 = vadd.f32 %v9809_v6, %v9804_v63  ;;  %v2626_v41 = vrot.slane %v2624_v26, 5  ;;  %v9904_v42 = vadd.f32 %v9782_v44, %v9776_v40  ;;  %v7071_v45 = vld [vmem:[%s9108_s5 + $0xa8] sm:$0xf]  ;;  %v7072_v44 = vld [vmem:[%s9108_s5 + $0xac] sm:$0xf] }
 0x141   : > { %v1672_v38 = vsel %vm9130_vm5, %v1667_v20, %v1671_v47  ;;  %v2611_v39 = vor.u32 %v2610_v24, %v2607_v22  ;;  %v8736_v6 = vld [vmem:[#allocation4 + $0x48] sm:$0xff]   ;;  %v2621_v54 = vor.u32 %v2620_v10, %v2616_v2  ;;  %v9915_v47 = vadd.f32 %v9819_v23, %v9814_v14  ;;  %v7073_v23 = vld [vmem:[%s9108_s5 + $0xb0] sm:$0x1] }
 0x142   : > { %11255 = vst [vmem:[#allocation13_spill] sm:$0xff] %v9894_v35  ;;  %11256 = vst [vmem:[#allocation14_spill] sm:$0xff] %v9904_v42  ;;  %v1682_v51 = vsel %vm9130_vm5, %v1677_v34, %v1681_v7  ;;  %v9919_v40 = vadd.f32 %v9806_v62, %v9787_v53  ;;  %v7157_v60 = vrot.slane %v7135_v16, 9  ;;  %v2024_v0 = vrot.slane %v7136_v17, 5  ;;  %7992 = vmatprep.subr.bf16.mxu1 %v8736_v6  ;;  %v7263_v16 = vld [vmem:[%s9108_s5 + $0xb4] sm:$0xf] }
 0x143   : > { %v9832_v56 = vpop.f32.mrb[12].mxu0  ;;  %11257 = vst [vmem:[#allocation15_spill] sm:$0xff] %v9915_v47  ;;  %v7092_v57 = vcombine.low %v1672_v38, %v1682_v51  ;;  %v2612_v58 = vrot.slane %v2611_v39, 4  ;;  %v2622_v25 = vrot.slane %v2621_v54, 4  ;;  %v2027_v14 = vrot.slane %v7137_v28, 5 }
 0x144   : > { %v9828_v31 = vpop.f32.mrb[12].mxu1  ;;  %v9838_v5 = vpop.f32.mrb[13].mxu0  ;;  %11258 = vst [vmem:[#allocation16_spill] sm:$0xff] %v9919_v40  ;;  %v1684_v3 = vshrl.u32 %v7071_v45, 16  ;;  %v1687_v7 = vshll.u32 %v7071_v45, 16  ;;  %v2025_v62 = vsel %vm9124_vm4, %v7157_v60, %v2024_v0  ;;  %v2026_v1 = vrot.slane %v2024_v0, 4 }
 0x145   : > { %v9852_v13 = vpop.f32.mrb[13].mxu1  ;;  %v9854_v15 = vpop.f32.mrb[14].mxu0  ;;  %4239 = vmatmul.mubr.bf16.gmra.mrb[112].mxu0 %v7092_v57  ;;  %v2617_v53 = vsel %vm9130_vm5, %v2612_v58, %v2616_v2  ;;  %v1693_v9 = vshll.u32 %v7072_v44, 16  ;;  %v7264_v17 = vld [vmem:[%s9108_s5 + $0xb8] sm:$0xf]  ;;  %v2627_v20 = vsel %vm9130_vm5, %v2622_v25, %v2626_v41  ;;  %v1697_v26 = vshrl.u32 %v7072_v44, 16 }
 0x146   : > { %v9862_v21 = vpop.f32.mrb[14].mxu1  ;;  %v9864_v27 = vpop.f32.mrb[15].mxu0  ;;  %v1686_v22 = vrot.slane %v1684_v3, 4  ;;  %v1689_v24 = vrot.slane %v1687_v7, 5  ;;  %v7265_v28 = vld [vmem:[%s9108_s5 + $0xbc] sm:$0x1]  ;;  %v7284_v10 = vcombine.low %v2617_v53, %v2627_v20  ;;  %v2028_v2 = vsel %vm9124_vm4, %v2026_v1, %v2027_v14 }
 0x147   : > { %v9867_v30 = vpop.f32.mrb[15].mxu1  ;;  %v1695_v37 = vrot.slane %v1693_v9, 5  ;;  %v1703_v38 = vshll.u32 %v7073_v23, 16  ;;  %v7173_v39 = vcombine.low %v2025_v62, %v2028_v2  ;;  %v1699_v6 = vrot.slane %v1697_v26, 4  ;;  %v7138_v0 = vld [vmem:[%s9108_s5 + $0xb4] sm:$0xe] }
 0x148   : > { %v1690_v45 = vor.u32 %v1689_v24, %v1686_v22  ;;  %v2629_v51 = vshrl.u32 %v7263_v16, 16  ;;  %4399 = vmatprep.mubr.bf16.mxu1 %v7284_v10  ;;  %v2632_v57 = vshll.u32 %v7263_v16, 16  ;;  %v2638_v58 = vshll.u32 %v7264_v17, 16  ;;  %v7139_v25 = vld [vmem:[%s9108_s5 + $0xb8] sm:$0xf]  ;;  %v8737_v16 = vld [vmem:[#allocation4 + $0x8] sm:$0xff]  }
 0x149   : > { %v1705_v44 = vrot.slane %v1703_v38, 5  ;;  %v2642_v60 = vshrl.u32 %v7264_v17, 16  ;;  %4400 = vmatmul.mubr.bf16.gmra.mrb[112].mxu1 %v8729_v12  ;;  %4246 = vmatprep.mubr.bf16.mxu0 %v7173_v39  ;;  %v1700_v7 = vor.u32 %v1699_v6, %v1695_v37  ;;  %v2648_v62 = vshll.u32 %v7265_v28, 16  ;;  %v7140_v12 = vld [vmem:[%s9108_s5 + $0xbc] sm:$0x1] }
 0x14a   : > { %v1691_v23 = vrot.slane %v1690_v45, 4  ;;  %v2631_v53 = vrot.slane %v2629_v51, 4  ;;  %v2634_v17 = vrot.slane %v2632_v57, 5  ;;  %v2640_v20 = vrot.slane %v2638_v58, 5  ;;  %v7074_v39 = vld [vmem:[%s9108_s5 + $0xb4] sm:$0xf]  ;;  %7993 = vmatpush3.bf16.msra.mxu1 %v8737_v16 }
 0x14b   : > { %v9878_v50 = vpop.f32.mrb[16].mxu0  ;;  %v2644_v22 = vrot.slane %v2642_v60, 4  ;;  %v9955_v24 = vadd.f32 %v9838_v5, %v9832_v56  ;;  %v1701_v28 = vrot.slane %v1700_v7, 4  ;;  %v2650_v2 = vrot.slane %v2648_v62, 5  ;;  %v7141_v47 = vld [vmem:[%s9108_s5 + $0xc0] sm:$0xe] }
 0x14c   : > { %v9885_v59 = vpop.f32.mrb[16].mxu1  ;;  %v9888_v29 = vpop.f32.mrb[17].mxu0  ;;  %v1696_v10 = vsel %vm9130_vm5, %v1691_v23, %v1695_v37  ;;  %v9964_v38 = vadd.f32 %v9852_v13, %v9828_v31  ;;  %v2635_v45 = vor.u32 %v2634_v17, %v2631_v53  ;;  %v9969_v56 = vadd.f32 %v9864_v27, %v9854_v15  ;;  %v7075_v37 = vld [vmem:[%s9108_s5 + $0xb8] sm:$0xf]  ;;  %v7076_v23 = vld [vmem:[%s9108_s5 + $0xbc] sm:$0x1] }
 0x14d   : > { %v9890_v32 = vpop.f32.mrb[17].mxu1  ;;  %v9896_v33 = vpop.f32.mrb[18].mxu0  ;;  %11259 = vst [vmem:[#allocation17_spill] sm:$0xff] %v9955_v24  ;;  %v2645_v6 = vor.u32 %v2644_v22, %v2640_v20  ;;  %v9973_v5 = vadd.f32 %v9867_v30, %v9862_v21  ;;  %v1706_v31 = vsel %vm9130_vm5, %v1701_v28, %v1705_v44  ;;  %v7158_v13 = vrot.slane %v7138_v0, 9  ;;  %v7266_v22 = vld [vmem:[%s9108_s5 + $0xc0] sm:$0xf] }
 0x14e   : > { %v9898_v36 = vpop.f32.mrb[18].mxu1  ;;  %v9907_v46 = vpop.f32.mrb[19].mxu0  ;;  %11260 = vst [vmem:[#allocation18_spill] sm:$0xff] %v9964_v38  ;;  %11261 = vst [vmem:[#allocation19_spill] sm:$0xff] %v9969_v56  ;;  %v2031_v58 = vrot.slane %v7139_v25, 5  ;;  %v2034_v60 = vrot.slane %v7140_v12, 5  ;;  %v7093_v21 = vcombine.low %v1696_v10, %v1706_v31 }
 0x14f   : > { %v9909_v63 = vpop.f32.mrb[19].mxu1  ;;  %11262 = vst [vmem:[#allocation20_spill] sm:$0xff] %v9973_v5  ;;  %v2636_v27 = vrot.slane %v2635_v45, 4  ;;  %v2646_v30 = vrot.slane %v2645_v6, 4  ;;  %v1708_v53 = vshrl.u32 %v7074_v39, 16  ;;  %v1711_v25 = vshll.u32 %v7074_v39, 16 }
 0x150   : > { %v2032_v44 = vsel %vm9124_vm4, %v7158_v13, %v2031_v58  ;;  %v2033_v0 = vrot.slane %v2031_v58, 4  ;;  %v1717_v17 = vshll.u32 %v7075_v37, 16  ;;  %4247 = vmatmul.mubr.bf16.gmra.mrb[116].mxu0 %v7093_v21  ;;  %v8730_v45 = vld [vmem:[%s9108_s5 + $0xb4] sm:$0xff]   ;;  %v1721_v31 = vshrl.u32 %v7075_v37, 16  ;;  %v7267_v5 = vld [vmem:[%s9108_s5 + $0xc4] sm:$0xf] }
 0x151   : > { %v2641_v10 = vsel %vm9130_vm5, %v2636_v27, %v2640_v20  ;;  %v2651_v28 = vsel %vm9130_vm5, %v2646_v30, %v2650_v2  ;;  %v1710_v6 = vrot.slane %v1708_v53, 4  ;;  %v1713_v58 = vrot.slane %v1711_v25, 5  ;;  %v7268_v38 = vld [vmem:[%s9108_s5 + $0xc8] sm:$0x1] }
 0x152   : > { %v7285_v13 = vcombine.low %v2641_v10, %v2651_v28  ;;  %v2035_v39 = vsel %vm9124_vm4, %v2033_v0, %v2034_v60  ;;  %v1719_v56 = vrot.slane %v1717_v17, 5  ;;  %v1723_v24 = vrot.slane %v1721_v31, 4  ;;  %v7142_v10 = vld [vmem:[%s9108_s5 + $0xc4] sm:$0xf]  ;;  %v8738_v60 = vld [vmem:[#allocation4 + $0x50] sm:$0xff]  }
 0x153   : > { %v9922_v18 = vpop.f32.mrb[20].mxu0  ;;  %v7174_v21 = vcombine.low %v2032_v44, %v2035_v39  ;;  %v1727_v40 = vshll.u32 %v7076_v23, 16  ;;  %v2653_v20 = vshrl.u32 %v7266_v22, 16  ;;  %v1714_v2 = vor.u32 %v1713_v58, %v1710_v6  ;;  %7994 = vmatprep.subr.bf16.mxu1 %v8738_v60 }
 0x154   : > { %v9935_v34 = vpop.f32.mrb[20].mxu1  ;;  %v9939_v54 = vpop.f32.mrb[21].mxu0  ;;  %4407 = vmatprep.mubr.bf16.mxu1 %v7285_v13  ;;  %v2656_v30 = vshll.u32 %v7266_v22, 16  ;;  %v2662_v37 = vshll.u32 %v7267_v5, 16  ;;  %v2666_v53 = vshrl.u32 %v7267_v5, 16  ;;  %v1724_v44 = vor.u32 %v1723_v24, %v1719_v56  ;;  %v8739_v22 = vld [vmem:[#allocation4 + $0x10] sm:$0xff]  }
 0x155   : > { %v9941_v41 = vpop.f32.mrb[21].mxu1  ;;  %v9945_v3 = vpop.f32.mrb[22].mxu0  ;;  %4408 = vmatmul.mubr.bf16.gmra.mrb[116].mxu1 %v8730_v45  ;;  %4254 = vmatprep.mubr.bf16.mxu0 %v7174_v21  ;;  %v1729_v0 = vrot.slane %v1727_v40, 5  ;;  %v2655_v23 = vrot.slane %v2653_v20, 4  ;;  %v2672_v25 = vshll.u32 %v7268_v38, 16  ;;  %v1715_v5 = vrot.slane %v1714_v2, 4 }
 0x156   : > { %v9947_v14 = vpop.f32.mrb[22].mxu1  ;;  %v9949_v1 = vpop.f32.mrb[23].mxu0  ;;  %v2658_v31 = vrot.slane %v2656_v30, 5  ;;  %v2664_v13 = vrot.slane %v2662_v37, 5  ;;  %v2668_v39 = vrot.slane %v2666_v53, 4  ;;  %v1725_v24 = vrot.slane %v1724_v44, 4  ;;  %7995 = vmatpush3.bf16.msra.mxu1 %v8739_v22 }
 0x157   : > { %v9951_v9 = vpop.f32.mrb[23].mxu1  ;;  %v2674_v40 = vrot.slane %v2672_v25, 5  ;;  %v10023_v38 = vadd.f32 %v9888_v29, %v9878_v50  ;;  %v10027_v45 = vadd.f32 %v9890_v32, %v9885_v59  ;;  %v7143_v21 = vld [vmem:[%s9108_s5 + $0xc8] sm:$0x1]  ;;  %v1720_v2 = vsel %vm9130_vm5, %v1715_v5, %v1719_v56  ;;  %v7077_v50 = vld [vmem:[%s9108_s5 + $0xc0] sm:$0xf] }
 0x158   : > { %v2659_v30 = vor.u32 %v2658_v31, %v2655_v23  ;;  %v2669_v37 = vor.u32 %v2668_v39, %v2664_v13  ;;  %v10036_v53 = vadd.f32 %v9907_v46, %v9896_v33  ;;  %v1730_v59 = vsel %vm9130_vm5, %v1725_v24, %v1729_v0  ;;  %v7078_v44 = vld [vmem:[%s9108_s5 + $0xc4] sm:$0xf]  ;;  %v7079_v25 = vld [vmem:[%s9108_s5 + $0xc8] sm:$0x1]  ;;  %v7269_v31 = vld [vmem:[%s9108_s5 + $0xcc] sm:$0xf] }
 0x159   : > { %11263 = vst [vmem:[#allocation21_spill] sm:$0xff] %v10023_v38  ;;  %11264 = vst [vmem:[#allocation22_spill] sm:$0xff] %v10027_v45  ;;  %v10043_v29 = vadd.f32 %v9909_v63, %v9898_v36  ;;  %v7159_v32 = vrot.slane %v7141_v47, 9  ;;  %v2038_v60 = vrot.slane %v7142_v10, 5  ;;  %v7094_v56 = vcombine.low %v1720_v2, %v1730_v59  ;;  %v8732_v46 = vld [vmem:[%s9108_s5 + $0xc0] sm:$0xff]  }
 0x15a   : > { %11265 = vst [vmem:[#allocation23_spill] sm:$0xff] %v10036_v53  ;;  %v2660_v23 = vrot.slane %v2659_v30, 4  ;;  %v2670_v22 = vrot.slane %v2669_v37, 4  ;;  %v2041_v5 = vrot.slane %v7143_v21, 5  ;;  %v1732_v24 = vshrl.u32 %v7077_v50, 16 }
 0x15b   : > { %v9958_v26 = vpop.f32.mrb[24].mxu0  ;;  %11266 = vst [vmem:[#allocation24_spill] sm:$0xff] %v10043_v29  ;;  %v2039_v0 = vsel %vm9124_vm4, %v7159_v32, %v2038_v60  ;;  %v2040_v39 = vrot.slane %v2038_v60, 4  ;;  %v1735_v36 = vshll.u32 %v7077_v50, 16  ;;  %4255 = vmatmul.mubr.bf16.gmra.mrb[120].mxu0 %v7094_v56  ;;  %v1741_v2 = vshll.u32 %v7078_v44, 16 }
 0x15c   : > { %v9976_v51 = vpop.f32.mrb[24].mxu1  ;;  %v9978_v57 = vpop.f32.mrb[25].mxu0  ;;  %v2665_v10 = vsel %vm9130_vm5, %v2660_v23, %v2664_v13  ;;  %v2675_v21 = vsel %vm9130_vm5, %v2670_v22, %v2674_v40  ;;  %v1745_v30 = vshrl.u32 %v7078_v44, 16  ;;  %v7270_v37 = vld [vmem:[%s9108_s5 + $0xd0] sm:$0xf]  ;;  %v1734_v29 = vrot.slane %v1732_v24, 4 }
 0x15d   : > { %v9983_v7 = vpop.f32.mrb[25].mxu1  ;;  %v9985_v15 = vpop.f32.mrb[26].mxu0  ;;  %v7286_v60 = vcombine.low %v2665_v10, %v2675_v21  ;;  %v2042_v50 = vsel %vm9124_vm4, %v2040_v39, %v2041_v5  ;;  %v1737_v56 = vrot.slane %v1735_v36, 5  ;;  %v7271_v53 = vld [vmem:[%s9108_s5 + $0xd4] sm:$0x1]  ;;  %v1743_v23 = vrot.slane %v1741_v2, 5 }
 0x15e   : > { %v9987_v62 = vpop.f32.mrb[26].mxu1  ;;  %v9989_v16 = vpop.f32.mrb[27].mxu0  ;;  %v7175_v40 = vcombine.low %v2039_v0, %v2042_v50  ;;  %v1747_v44 = vrot.slane %v1745_v30, 4  ;;  %v1751_v22 = vshll.u32 %v7079_v25, 16  ;;  %v2677_v21 = vshrl.u32 %v7269_v31, 16 }
 0x15f   : > { %v9994_v12 = vpop.f32.mrb[27].mxu1  ;;  %4415 = vmatprep.mubr.bf16.mxu1 %v7286_v60  ;;  %v1738_v10 = vor.u32 %v1737_v56, %v1734_v29  ;;  %v2680_v5 = vshll.u32 %v7269_v31, 16  ;;  %v2686_v39 = vshll.u32 %v7270_v37, 16  ;;  %v7288_v24 = vld [vmem:[%s9108_s5 + $0x18] sm:$0xe]  ;;  %v2690_v8 = vshrl.u32 %v7270_v37, 16 }
 0x160   : > { %4416 = vmatmul.mubr.bf16.gmra.mrb[120].mxu1 %v8732_v46  ;;  %4262 = vmatprep.mubr.bf16.mxu0 %v7175_v40  ;;  %v1748_v36 = vor.u32 %v1747_v44, %v1743_v23  ;;  %v1753_v52 = vrot.slane %v1751_v22, 5  ;;  %v2696_v0 = vshll.u32 %v7271_v53, 16  ;;  %v7289_v2 = vld [vmem:[%s9108_s5 + $0x1c] sm:$0xf]  ;;  %v7290_v50 = vld [vmem:[%s9108_s5 + $0x20] sm:$0x1]  ;;  %v10084_v44 = vadd.f32 %v9939_v54, %v9922_v18 }
 0x161   : > { %v1739_v25 = vrot.slane %v1738_v10, 4  ;;  %v2679_v60 = vrot.slane %v2677_v21, 4  ;;  %v2682_v29 = vrot.slane %v2680_v5, 5  ;;  %v2688_v56 = vrot.slane %v2686_v39, 5  ;;  %v7291_v53 = vld [vmem:[%s9108_s5 + $0x24] sm:$0xe] }
 0x162   : > { %v1749_v19 = vrot.slane %v1748_v36, 4  ;;  %v2692_v46 = vrot.slane %v2690_v8, 4  ;;  %v2698_v40 = vrot.slane %v2696_v0, 5  ;;  %11267 = vst [vmem:[#allocation25_spill] sm:$0xff] %v10084_v44  ;;  %v10093_v21 = vadd.f32 %v9941_v41, %v9935_v34  ;;  %v7292_v5 = vld [vmem:[%s9108_s5 + $0x28] sm:$0xf] }
 0x163   : > { %v10005_v27 = vpop.f32.mrb[28].mxu0  ;;  %v1744_v22 = vsel %vm9130_vm5, %v1739_v25, %v1743_v23  ;;  %v2683_v10 = vor.u32 %v2682_v29, %v2679_v60  ;;  %v10097_v8 = vadd.f32 %v9949_v1, %v9945_v3  ;;  %v7293_v18 = vld [vmem:[%s9108_s5 + $0x2c] sm:$0x1]  ;;  %v10109_v0 = vadd.f32 %v9951_v9, %v9947_v14  ;;  %v7294_v29 = vld [vmem:[%s9108_s5 + $0x30] sm:$0xe] }
 0x164   : > { %v10009_v28 = vpop.f32.mrb[28].mxu1  ;;  %v10011_v42 = vpop.f32.mrb[29].mxu0  ;;  %11268 = vst [vmem:[#allocation26_spill] sm:$0xff] %v10093_v21  ;;  %v1754_v23 = vsel %vm9130_vm5, %v1749_v19, %v1753_v52  ;;  %v2693_v36 = vor.u32 %v2692_v46, %v2688_v56  ;;  %v7336_v34 = vrot.slane %v7288_v24, 9  ;;  %v2878_v25 = vrot.slane %v7289_v2, 5  ;;  %v8733_v44 = vld [vmem:[%s9108_s5 + $0xcc] sm:$0xff]  }
 0x165   : > { %v10013_v17 = vpop.f32.mrb[29].mxu1  ;;  %v10015_v6 = vpop.f32.mrb[30].mxu0  ;;  %11269 = vst [vmem:[#allocation27_spill] sm:$0xff] %v10097_v8  ;;  %v7095_v3 = vcombine.low %v1744_v22, %v1754_v23  ;;  %v2684_v1 = vrot.slane %v2683_v10, 4  ;;  %v2881_v60 = vrot.slane %v7290_v50, 5  ;;  %v7337_v19 = vrot.slane %v7291_v53, 9 }
 0x166   : > { %v10017_v58 = vpop.f32.mrb[30].mxu1  ;;  %v10019_v35 = vpop.f32.mrb[31].mxu0  ;;  %v2694_v21 = vrot.slane %v2693_v36, 4  ;;  %v2885_v52 = vrot.slane %v7292_v5, 5  ;;  %v2888_v14 = vrot.slane %v7293_v18, 5  ;;  %v2879_v2 = vsel %vm9124_vm4, %v7336_v34, %v2878_v25  ;;  %v8740_v10 = vld [vmem:[#allocation4 + $0x58] sm:$0xff]  }
 0x167   : > { %v10030_v20 = vpop.f32.mrb[31].mxu1  ;;  %4263 = vmatmul.mubr.bf16.gmra.mrb[124].mxu0 %v7095_v3  ;;  %v2689_v24 = vsel %vm9130_vm5, %v2684_v1, %v2688_v56  ;;  %v2880_v50 = vrot.slane %v2878_v25, 4  ;;  %v10125_v46 = vadd.f32 %v9978_v57, %v9958_v26  ;;  %v7295_v53 = vld [vmem:[%s9108_s5 + $0x34] sm:$0xf]  ;;  %v7296_v22 = vld [vmem:[%s9108_s5 + $0x38] sm:$0x1]  ;;  %v10135_v23 = vadd.f32 %v9983_v7, %v9976_v51  ;;  %7996 = vmatprep.subr.bf16.mxu1 %v8740_v10 }
 0x168   : > { %v2699_v5 = vsel %vm9130_vm5, %v2694_v21, %v2698_v40  ;;  %v2886_v18 = vsel %vm9124_vm4, %v7337_v19, %v2885_v52  ;;  %v2887_v56 = vrot.slane %v2885_v52, 4  ;;  %v7297_v36 = vld [vmem:[%s9108_s5 + $0x3c] sm:$0xe]  ;;  %v7298_v34 = vld [vmem:[%s9108_s5 + $0x40] sm:$0xf]  ;;  %v10145_v49 = vadd.f32 %v9989_v16, %v9985_v15 }
 0x169   : > { %v7287_v57 = vcombine.low %v2689_v24, %v2699_v5  ;;  %v2882_v3 = vsel %vm9124_vm4, %v2880_v50, %v2881_v60  ;;  %v10149_v40 = vadd.f32 %v9994_v12, %v9987_v62  ;;  %v7299_v21 = vld [vmem:[%s9108_s5 + $0x44] sm:$0x1]  ;;  %v7300_v51 = vld [vmem:[%s9108_s5 + $0x48] sm:$0xe]  ;;  %v8741_v1 = vld [vmem:[#allocation4 + $0x18] sm:$0xff]   ;;  %v7338_v52 = vrot.slane %v7294_v29, 9 }
 0x16a   : > { %v7352_v25 = vcombine.low %v2879_v2, %v2882_v3  ;;  %v2889_v19 = vsel %vm9124_vm4, %v2887_v56, %v2888_v14  ;;  %v2892_v60 = vrot.slane %v7295_v53, 5  ;;  %v7301_v24 = vld [vmem:[%s9108_s5 + $0x4c] sm:$0xf]  ;;  %v2895_v62 = vrot.slane %v7296_v22, 5  ;;  %7997 = vmatpush3.bf16.msra.mxu1 %v8741_v1  ;;  %v7302_v22 = vld [vmem:[%s9108_s5 + $0x50] sm:$0x1] }
 0x16b   : > { %v10053_v63 = vpop.f32.mrb[32].mxu0  ;;  %4423 = vmatprep.mubr.bf16.mxu1 %v7287_v57  ;;  %v7353_v16 = vcombine.low %v2886_v18, %v2889_v19  ;;  %v7339_v12 = vrot.slane %v7297_v36, 9  ;;  %v2899_v50 = vrot.slane %v7298_v34, 5  ;;  %v2902_v2 = vrot.slane %v7299_v21, 5  ;;  %v7304_v34 = vld [vmem:[%s9108_s5 + $0x58] sm:$0xf] }
 0x16c   : > { %v10048_v33 = vpop.f32.mrb[32].mxu1  ;;  %v10062_v59 = vpop.f32.mrb[33].mxu0  ;;  %4424 = vmatmul.mubr.bf16.gmra.mrb[124].mxu1 %v8733_v44  ;;  %8478 = vmatprep.mubr.bf16.mxu0 %v7352_v25  ;;  %v2893_v29 = vsel %vm9124_vm4, %v7338_v52, %v2892_v60  ;;  %v2894_v14 = vrot.slane %v2892_v60, 4  ;;  %v10168_v53 = vadd.f32 %v10011_v42, %v10005_v27  ;;  %v10175_v36 = vadd.f32 %v10013_v17, %v10009_v28  ;;  %v7303_v17 = vld [vmem:[%s9108_s5 + $0x54] sm:$0xe] }
 0x16d   : > { %v10055_v47 = vpop.f32.mrb[33].mxu1  ;;  %v10069_v45 = vpop.f32.mrb[34].mxu0  ;;  %v2901_v56 = vrot.slane %v2899_v50, 4  ;;  %v10179_v44 = vadd.f32 %v10019_v35, %v10015_v6  ;;  %v10188_v27 = vadd.f32 %v10030_v20, %v10017_v58  ;;  %v7340_v3 = vrot.slane %v7300_v51, 9  ;;  %v7305_v6 = vld [vmem:[%s9108_s5 + $0x5c] sm:$0x1] }
 0x16e   : > { %v10064_v32 = vpop.f32.mrb[34].mxu1  ;;  %v10073_v38 = vpop.f32.mrb[35].mxu0  ;;  %v2896_v42 = vsel %vm9124_vm4, %v2894_v14, %v2895_v62  ;;  %v2906_v21 = vrot.slane %v7301_v24, 5  ;;  %v2909_v35 = vrot.slane %v7302_v22, 5  ;;  %v2900_v25 = vsel %vm9124_vm4, %v7339_v12, %v2899_v50  ;;  %v7307_v20 = vld [vmem:[%s9108_s5 + $0x64] sm:$0xf] }
 0x16f   : > { %v10071_v13 = vpop.f32.mrb[35].mxu1  ;;  %8479 = vmatmul.mubr.bf16.vlgmr.msra.gmra.mrb[128].mxu0 %v7353_v16  ;;  %v7354_v28 = vcombine.low %v2893_v29, %v2896_v42  ;;  %v2903_v19 = vsel %vm9124_vm4, %v2901_v56, %v2902_v2  ;;  %v2913_v58 = vrot.slane %v7304_v34, 5  ;;  %v7584_v24 = vadd.f32 %v10062_v59, %v10053_v63  ;;  %v7306_v12 = vld [vmem:[%s9108_s5 + $0x60] sm:$0xe]  ;;  %v7308_v50 = vld [vmem:[%s9108_s5 + $0x68] sm:$0x1] }
 0x170   : > { %v2908_v52 = vrot.slane %v2906_v21, 4  ;;  %v2907_v60 = vsel %vm9124_vm4, %v7340_v3, %v2906_v21  ;;  %v7696_v16 = vadd.f32 %v10055_v47, %v10048_v33  ;;  %v7587_v62 = vadd.f32 %v10073_v38, %v10069_v45  ;;  %v7310_v59 = vld [vmem:[%s9108_s5 + $0x70] sm:$0xf]  ;;  %v7309_v34 = vld [vmem:[%s9108_s5 + $0x6c] sm:$0xe] }
 0x171   : > { %8482 = vmatprep.mubr.bf16.mxu0 %v7354_v28  ;;  %v7341_v2 = vrot.slane %v7303_v17, 9  ;;  %v2916_v22 = vrot.slane %v7305_v6, 5  ;;  %v7699_v63 = vadd.f32 %v10071_v13, %v10064_v32  ;;  %v7355_v33 = vcombine.low %v2900_v25, %v2903_v19  ;;  %v7311_v32 = vld [vmem:[%s9108_s5 + $0x74] sm:$0x1]  ;;  %v7313_v13 = vld [vmem:[%s9108_s5 + $0x7c] sm:$0xf] }
 0x172   : > { %v2910_v14 = vsel %vm9124_vm4, %v2908_v52, %v2909_v35  ;;  %v2915_v38 = vrot.slane %v2913_v58, 4  ;;  %v10220_v45 = vadd.f32 %v7696_v16, %v7584_v24  ;;  %v2920_v47 = vrot.slane %v7307_v20, 5  ;;  %v7312_v52 = vld [vmem:[%s9108_s5 + $0x78] sm:$0xe]  ;;  %v7314_v24 = vld [vmem:[%s9108_s5 + $0x80] sm:$0x1] }
 0x173   : > { %v10101_v54 = vpop.f32.mrb[36].mxu0  ;;  %v7356_v21 = vcombine.low %v2907_v60, %v2910_v14  ;;  %v10227_v28 = vadd.f32 %v7699_v63, %v7587_v62  ;;  %v7342_v35 = vrot.slane %v7306_v12, 9  ;;  %v2923_v25 = vrot.slane %v7308_v50, 5 }
 0x174   : > { %v10078_v30 = vpop.f32.mrb[36].mxu1  ;;  %v10111_v41 = vpop.f32.mrb[37].mxu0  ;;  %v2922_v6 = vrot.slane %v2920_v47, 4  ;;  %v2927_v19 = vrot.slane %v7310_v59, 5  ;;  %v2914_v50 = vsel %vm9124_vm4, %v7341_v2, %v2913_v58  ;;  %v2917_v14 = vsel %vm9124_vm4, %v2915_v38, %v2916_v22 }
 0x175   : > { %v10080_v31 = vpop.f32.mrb[37].mxu1  ;;  %v10114_v8 = vpop.f32.mrb[38].mxu0  ;;  %v7590_v16 = vadd.f32 %v10111_v41, %v10101_v54  ;;  %v10250_v54 = vld [vmem:[%s9108_s5 + $0x88] sm:$0xf]  ;;  %v2934_v41 = vrot.slane %v7313_v13, 5  ;;  %v2930_v22 = vrot.slane %v7311_v32, 5  ;;  %v7357_v38 = vcombine.low %v2914_v50, %v2917_v14 }
 0x176   : > { %v10087_v37 = vpop.f32.mrb[38].mxu1  ;;  %v10117_v9 = vpop.f32.mrb[39].mxu0  ;;  %v7702_v60 = vadd.f32 %v10080_v31, %v10078_v30  ;;  %v2921_v30 = vsel %vm9124_vm4, %v7342_v35, %v2920_v47  ;;  %v7343_v31 = vrot.slane %v7309_v34, 9  ;;  %v2924_v58 = vsel %vm9124_vm4, %v2922_v6, %v2923_v25  ;;  %v7317_v35 = vld [vmem:[%s9108_s5 + $0x8c] sm:$0x1] }
 0x177   : > { %v10103_v39 = vpop.f32.mrb[39].mxu1  ;;  %v7593_v62 = vadd.f32 %v10117_v9, %v10114_v8  ;;  %8483 = vmatmul.mubr.bf16.gmra.mrb[132].mxu0 %v7355_v33  ;;  %v2929_v2 = vrot.slane %v2927_v19, 4  ;;  %v7344_v47 = vrot.slane %v7312_v52, 9  ;;  %v2936_v34 = vrot.slane %v2934_v41, 4 }
 0x178   : > { %v7705_v63 = vadd.f32 %v10103_v39, %v10087_v37  ;;  %8486 = vmatprep.mubr.bf16.mxu0 %v7356_v21  ;;  %v10254_v8 = vadd.f32 %v7702_v60, %v7590_v16  ;;  %v7315_v37 = vld [vmem:[%s9108_s5 + $0x84] sm:$0xe]  ;;  %v10264_v39 = vld [vmem:[%s9108_s5 + $0x94] sm:$0xf]  ;;  %v2937_v21 = vrot.slane %v7314_v24, 5  ;;  %v2941_v6 = vrot.slane %v10250_v54, 5 }
 0x179   : > { %v7358_v24 = vcombine.low %v2921_v30, %v2924_v58  ;;  %v10284_v14 = vsel %vm9124_vm4, %v7343_v31, %v2927_v19  ;;  %v7345_v54 = vrot.slane %v7315_v37, 9  ;;  %v10299_v19 = vld [vmem:[%s9108_s5 + $0xac] sm:$0xf]  ;;  %v8743_v31 = vld [vmem:[#allocation4 + $0x20] sm:$0xff]   ;;  %v2935_v58 = vsel %vm9124_vm4, %v7344_v47, %v2934_v41  ;;  %v7324_v47 = vld [vmem:[%s9108_s5 + $0xa8] sm:$0xe] }
 0x17a   : > { %v10260_v59 = vadd.f32 %v7705_v63, %v7593_v62  ;;  %v2931_v63 = vsel %vm9124_vm4, %v2929_v2, %v2930_v22  ;;  %v2944_v2 = vrot.slane %v7317_v35, 5  ;;  %v7321_v22 = vld [vmem:[%s9108_s5 + $0x9c] sm:$0xe]  ;;  %v7323_v37 = vld [vmem:[%s9108_s5 + $0xa4] sm:$0x1] }
 0x17b   : > { %v10160_v5 = vpop.f32.mrb[40].mxu0 }
 0x17c   : > { %v10139_v26 = vpop.f32.mrb[40].mxu1  ;;  %v10171_v18 = vpop.f32.mrb[41].mxu0 }
 0x17d   : > { %v10153_v7 = vpop.f32.mrb[41].mxu1  ;;  %v10182_v57 = vpop.f32.mrb[42].mxu0  ;;  %v7596_v32 = vadd.f32 %v10171_v18, %v10160_v5  ;;  %v7318_v18 = vld [vmem:[%s9108_s5 + $0x90] sm:$0xe] }
 0x17e   : > { %v10158_v15 = vpop.f32.mrb[42].mxu1  ;;  %v10190_v1 = vpop.f32.mrb[43].mxu0  ;;  %v7708_v25 = vadd.f32 %v10153_v7, %v10139_v26  ;;  %v7320_v26 = vld [vmem:[%s9108_s5 + $0x98] sm:$0x1]  ;;  %v10291_v7 = vld [vmem:[%s9108_s5 + $0xa0] sm:$0xf] }
 0x17f   : > { %v10162_v10 = vpop.f32.mrb[43].mxu1  ;;  %v7599_v16 = vadd.f32 %v10190_v1, %v10182_v57  ;;  %v8742_v1 = vld [vmem:[#allocation4 + $0x60] sm:$0xff]   ;;  %8487 = vmatmul.mubr.bf16.gmra.mrb[136].mxu0 %v7357_v38 }
 0x180   : > { %v7711_v62 = vadd.f32 %v10162_v10, %v10158_v15  ;;  %v10286_v5 = vadd.f32 %v7708_v25, %v7596_v32  ;;  %v2948_v10 = vrot.slane %v10264_v39, 5  ;;  %v2938_v32 = vsel %vm9124_vm4, %v2936_v34, %v2937_v21  ;;  %7998 = vmatprep.subr.bf16.mxu1 %v8742_v1  ;;  %8490 = vmatprep.mubr.bf16.mxu0 %v7358_v24  ;;  %v7326_v24 = vld [vmem:[%s9108_s5 + $0xb0] sm:$0x1] }
 0x181   : > { %v2943_v25 = vrot.slane %v2941_v6, 4  ;;  %v2955_v39 = vrot.slane %v10291_v7, 5  ;;  %7999 = vmatpush3.bf16.msra.mxu1 %v8743_v31  ;;  %v7359_v21 = vcombine.low %v10284_v14, %v2931_v63  ;;  %v7346_v1 = vrot.slane %v7318_v18, 9 }
 0x182   : > { %v10295_v15 = vadd.f32 %v7711_v62, %v7599_v16  ;;  %v2950_v7 = vrot.slane %v2948_v10, 4  ;;  %v2958_v31 = vrot.slane %v7323_v37, 5 }
 0x183   : > { %v10223_v42 = vpop.f32.mrb[44].mxu0  ;;  %v2945_v18 = vsel %vm9124_vm4, %v2943_v25, %v2944_v2  ;;  %v2957_v63 = vrot.slane %v2955_v39, 4  ;;  %v2965_v2 = vrot.slane %v7326_v24, 5  ;;  %v10368_v24 = vld [vmem:[%s9108_s5 + $0xc8] sm:$0x1] }
 0x184   : > { %v10199_v51 = vpop.f32.mrb[44].mxu1  ;;  %v10231_v17 = vpop.f32.mrb[45].mxu0  ;;  %11270 = vst [vmem:[#allocation28_spill] sm:$0xff] %v10295_v15  ;;  %v2951_v15 = vrot.slane %v7320_v26, 5  ;;  %v7347_v26 = vrot.slane %v7321_v22, 9 }
 0x185   : > { %v10211_v29 = vpop.f32.mrb[45].mxu1  ;;  %v10235_v20 = vpop.f32.mrb[46].mxu0  ;;  %v7602_v16 = vadd.f32 %v10231_v17, %v10223_v42  ;;  %v10321_v17 = vld [vmem:[%s9108_s5 + $0xb8] sm:$0xf]  ;;  %v10342_v22 = vld [vmem:[%s9108_s5 + $0xbc] sm:$0x1] }
 0x186   : > { %v10218_v56 = vpop.f32.mrb[46].mxu1  ;;  %v7604_v12 = vpop.f32.mrb[47].mxu0  ;;  %v7714_v38 = vadd.f32 %v10211_v29, %v10199_v51  ;;  %v7360_v29 = vcombine.low %v2935_v58, %v2938_v32  ;;  %v7348_v32 = vrot.slane %v7324_v47, 9  ;;  %v2952_v25 = vsel %vm9124_vm4, %v2950_v7, %v2951_v15 }
 0x187   : > { %v10225_v3 = vpop.f32.mrb[47].mxu1  ;;  %v7605_v41 = vadd.f32 %v7604_v12, %v10235_v20  ;;  %v10325_v20 = vsel %vm9124_vm4, %v7345_v54, %v2941_v6  ;;  %8491 = vmatmul.mubr.bf16.gmra.mrb[140].mxu0 %v7359_v21 }
 0x188   : > { %v7717_v35 = vadd.f32 %v10225_v3, %v10218_v56  ;;  %v10318_v42 = vadd.f32 %v7714_v38, %v7602_v16  ;;  %v2962_v56 = vrot.slane %v10299_v19, 5  ;;  %v10333_v16 = vld [vmem:[%s9108_s5 + $0xb4] sm:$0xe]  ;;  %8494 = vmatprep.mubr.bf16.mxu0 %v7360_v29 }
 0x189   : > { %v7349_v21 = vrot.slane %v10333_v16, 9 }
 0x18a   : > { %v10327_v12 = vadd.f32 %v7717_v35, %v7605_v41  ;;  %v2949_v41 = vsel %vm9124_vm4, %v7346_v1, %v2948_v10  ;;  %v7361_v10 = vcombine.low %v10325_v20, %v2945_v18  ;;  %v10372_v7 = vsel %vm9124_vm4, %v7348_v32, %v2962_v56 }
 0x18b   : > { %v7606_v52 = vpop.f32.mrb[48].mxu0  ;;  %v7362_v35 = vcombine.low %v2949_v41, %v2952_v25 }
 0x18c   : > { %v10256_v9 = vpop.f32.mrb[48].mxu1  ;;  %v7607_v50 = vpop.f32.mrb[49].mxu0 }
 0x18d   : > { %v10266_v33 = vpop.f32.mrb[49].mxu1  ;;  %v7609_v57 = vpop.f32.mrb[50].mxu0  ;;  %v7608_v6 = vadd.f32 %v7607_v50, %v7606_v52  ;;  %v2964_v50 = vrot.slane %v2962_v56, 4 }
 0x18e   : > { %v10269_v13 = vpop.f32.mrb[50].mxu1  ;;  %v7610_v30 = vpop.f32.mrb[51].mxu0  ;;  %v7720_v54 = vadd.f32 %v10266_v33, %v10256_v9  ;;  %v2969_v9 = vrot.slane %v10321_v17, 5 }
 0x18f   : > { %v10278_v60 = vpop.f32.mrb[51].mxu1  ;;  %v7611_v38 = vadd.f32 %v7610_v30, %v7609_v57  ;;  %v10350_v57 = vld [vmem:[%s9108_s5 + $0xc0] sm:$0xe]  ;;  %v10356_v30 = vld [vmem:[%s9108_s5 + $0xc4] sm:$0xf]  ;;  %8495 = vmatmul.mubr.bf16.gmra.mrb[144].mxu0 %v7361_v10  ;;  %v11280_v10 = vld [vmem:[#allocation19_spill] sm:$0xff] }
 0x190   : > { %v7723_v37 = vadd.f32 %v10278_v60, %v10269_v13  ;;  %v10347_v33 = vadd.f32 %v7720_v54, %v7608_v6  ;;  %v10360_v13 = vsel %vm9124_vm4, %v7347_v26, %v2955_v39  ;;  %v10364_v60 = vsel %vm9124_vm4, %v2957_v63, %v2958_v31  ;;  %8498 = vmatprep.mubr.bf16.mxu0 %v7362_v35 }
 0x191   : > { %v10376_v39 = vsel %vm9124_vm4, %v2964_v50, %v2965_v2  ;;  %v10380_v26 = vrot.slane %v2969_v9, 4  ;;  %v2972_v63 = vrot.slane %v10342_v22, 5  ;;  %v7350_v56 = vrot.slane %v10350_v57, 9  ;;  %v11272_v57 = vld [vmem:[#allocation11_spill] sm:$0xff] }
 0x192   : > { %v10353_v15 = vadd.f32 %v7723_v37, %v7611_v38  ;;  %v2976_v32 = vrot.slane %v10356_v30, 5  ;;  %v10391_v2 = vadd.f32 %v9791_v55, %v9780_v43  ;;  %v10396_v37 = vadd.f32 %v9799_v11, %v9795_v4  ;;  %v11273_v30 = vld [vmem:[#allocation12_spill] sm:$0xff]  ;;  %v11276_v4 = vld [vmem:[#allocation15_spill] sm:$0xff] }
 0x193   : > { %v7612_v3 = vpop.f32.mrb[52].mxu0  ;;  %v11277_v11 = vld [vmem:[#allocation16_spill] sm:$0xff] }
 0x194   : > { %v7724_v34 = vpop.f32.mrb[52].mxu1  ;;  %v7613_v58 = vpop.f32.mrb[53].mxu0 }
 0x195   : > { %v7725_v62 = vpop.f32.mrb[53].mxu1  ;;  %v7615_v19 = vpop.f32.mrb[54].mxu0  ;;  %v7614_v29 = vadd.f32 %v7613_v58, %v7612_v3 }
 0x196   : > { %v7727_v51 = vpop.f32.mrb[54].mxu1  ;;  %v7616_v52 = vpop.f32.mrb[55].mxu0  ;;  %v7726_v20 = vadd.f32 %v7725_v62, %v7724_v34 }
 0x197   : > { %v7728_v14 = vpop.f32.mrb[55].mxu1  ;;  %v7617_v18 = vadd.f32 %v7616_v52, %v7615_v19  ;;  %v11271_v52 = vld [vmem:[#allocation10_spill] sm:$0xff] }
 0x198   : > { %v7729_v31 = vadd.f32 %v7728_v14, %v7727_v51  ;;  %v10384_v3 = vadd.f32 %v7726_v20, %v7614_v29  ;;  %v2979_v51 = vrot.slane %v10368_v24, 5  ;;  %v10400_v50 = vadd.f32 %v11271_v52, %v9836_v61  ;;  %v11274_v24 = vld [vmem:[#allocation13_spill] sm:$0xff]  ;;  %v11275_v29 = vld [vmem:[#allocation14_spill] sm:$0xff]  ;;  %v11285_v52 = vld [vmem:[#allocation24_spill] sm:$0xff] }
 0x199   : > { %v10413_v20 = vadd.f32 %v11275_v29, %v11274_v24  ;;  %v11286_v29 = vld [vmem:[#allocation25_spill] sm:$0xff] }
 0x19a   : > { %v10387_v19 = vadd.f32 %v7729_v31, %v7617_v18  ;;  %v10417_v18 = vadd.f32 %v11277_v11, %v11276_v4  ;;  %v11279_v31 = vld [vmem:[#allocation18_spill] sm:$0xff] }
 0x19b   : > { %v7618_v54 = vpop.f32.mrb[56].mxu0  ;;  %v11287_v4 = vld [vmem:[#allocation26_spill] sm:$0xff] }
 0x19c   : > { %v7730_v47 = vpop.f32.mrb[56].mxu1  ;;  %v7619_v34 = vpop.f32.mrb[57].mxu0  ;;  %v10440_v11 = vadd.f32 %v11287_v4, %v11286_v29 }
 0x19d   : > { %v7731_v1 = vpop.f32.mrb[57].mxu1  ;;  %v7620_v41 = vadd.f32 %v7619_v34, %v7618_v54  ;;  %v7621_v25 = vpop.f32.mrb[58].mxu0 }
 0x19e   : > { %v7733_v6 = vpop.f32.mrb[58].mxu1  ;;  %v7732_v62 = vadd.f32 %v7731_v1, %v7730_v47  ;;  %v7622_v14 = vpop.f32.mrb[59].mxu0  ;;  %v10404_v47 = vadd.f32 %v11273_v30, %v11272_v57  ;;  %v10407_v1 = vld [vmem:[%s9108_s5 + $0xcc] sm:$0xe]  ;;  %v7334_v30 = vld [vmem:[%s9108_s5 + $0xd0] sm:$0xf] }
 0x19f   : > { %v7734_v38 = vpop.f32.mrb[59].mxu1  ;;  %v7623_v55 = vadd.f32 %v7622_v14, %v7621_v25  ;;  %v11284_v14 = vld [vmem:[#allocation23_spill] sm:$0xff] }
 0x1a0   : > { %v7735_v58 = vadd.f32 %v7734_v38, %v7733_v6  ;;  %v10409_v43 = vadd.f32 %v7732_v62, %v7620_v41  ;;  %v11278_v6 = vld [vmem:[#allocation17_spill] sm:$0xff]  ;;  %v11281_v38 = vld [vmem:[#allocation20_spill] sm:$0xff]  ;;  %v11283_v41 = vld [vmem:[#allocation22_spill] sm:$0xff]  ;;  %v10433_v57 = vadd.f32 %v11285_v52, %v11284_v14 }
 0x1a1   : > { %v10421_v54 = vadd.f32 %v11279_v31, %v11278_v6  ;;  %v10425_v34 = vadd.f32 %v11281_v38, %v11280_v10  ;;  %v11282_v62 = vld [vmem:[#allocation21_spill] sm:$0xff]  ;;  %v11288_v6 = vld [vmem:[#allocation27_spill] sm:$0xff]  ;;  %v10448_v10 = vadd.f32 %v10135_v23, %v10125_v46  ;;  %v7363_v46 = vcombine.low %v10360_v13, %v10364_v60 }
 0x1a2   : > { %v10429_v25 = vadd.f32 %v11283_v41, %v11282_v62  ;;  %v10436_v24 = vadd.f32 %v7735_v58, %v7623_v55  ;;  %v10444_v31 = vadd.f32 %v10109_v0, %v11288_v6  ;;  %v8744_v38 = vld [vmem:[#allocation4 + $0x68] sm:$0xff]   ;;  %v10452_v58 = vadd.f32 %v10149_v40, %v10145_v49 }
 0x1a3   : > { %v10456_v55 = vadd.f32 %v10175_v36, %v10168_v53  ;;  %v10460_v0 = vadd.f32 %v10188_v27, %v10179_v44  ;;  %v8745_v14 = vld [vmem:[#allocation4 + $0x28] sm:$0xff]   ;;  %v7624_v23 = vpop.f32.mrb[60].mxu0  ;;  %8000 = vmatprep.subr.bf16.mxu1 %v8744_v38  ;;  %v7364_v49 = vcombine.low %v10372_v7, %v10376_v39  ;;  %v7351_v40 = vrot.slane %v10407_v1, 9  ;;  %v7335_v44 = vld [vmem:[%s9108_s5 + $0xd4] sm:$0x1]  ;;  %8499 = vmatmul.mubr.bf16.gmra.mrb[148].mxu0 %v7363_v46  ;;  %s176_s5 = sand.u32 1, %s8893_s13  }
 0x1a4   : > { %v7736_v61 = vpop.f32.mrb[60].mxu1  ;;  %v7625_v52 = vpop.f32.mrb[61].mxu0  ;;  %8001 = vmatpush3.bf16.msra.mxu1 %v8745_v14  ;;  %v2978_v53 = vrot.slane %v2976_v32, 4  ;;  %v2983_v27 = vrot.slane %v7334_v30, 5  ;;  %v2970_v60 = vsel %vm9124_vm4, %v7349_v21, %v2969_v9  ;;  %v2973_v7 = vsel %vm9124_vm4, %v10380_v26, %v2972_v63  ;;  %s6918_s4 = sshll.u32 %s176_s5, 8  ;;  %s11193_s11 = scalar_lea.sflag [#allocation6], %s176_s5 }
 0x1a5   : > { %v7737_v35 = vpop.f32.mrb[61].mxu1  ;;  %v7626_v36 = vadd.f32 %v7625_v52, %v7624_v23  ;;  %v7627_v29 = vpop.f32.mrb[62].mxu0  ;;  %8502 = vmatprep.mubr.bf16.mxu0 %v7364_v49  ;;  %v2977_v39 = vsel %vm9124_vm4, %v7350_v56, %v2976_v32  ;;  %v7365_v17 = vcombine.low %v2970_v60, %v2973_v7  ;;  %v2986_v38 = vrot.slane %v7335_v44, 5  ;;  %8002 = vmatprep.subr.bf16.mxu1 %v8746_v48  ;;  %s11116_s6 = scalar_lea.vmem [#allocation7], %s6918_s4 }
 0x1a6   : > { %v7738_v62 = vadd.f32 %v7737_v35, %v7736_v61  ;;  %v7739_v41 = vpop.f32.mrb[62].mxu1  ;;  %v7628_v4 = vpop.f32.mrb[63].mxu0  ;;  %v2980_v1 = vsel %vm9124_vm4, %v2978_v53, %v2979_v51  ;;  %v2984_v56 = vsel %vm9124_vm4, %v7351_v40, %v2983_v27  ;;  %s6838_s8 = sshll.u32 %s11116_s6, 4  ;;  %s11186_s8 = int_to_ptr.vmem [resolvable:$true] %s6838_s8 }
 0x1a7   : > { %v7740_v61 = vpop.f32.mrb[63].mxu1  ;;  %v7629_v13 = vadd.f32 %v7628_v4, %v7627_v29  ;;  %v8747_v4 = vld [vmem:[#allocation4 + $0x30] sm:$0xff]   ;;  %s8835_s17 = scalar_lea.vmem %s11186_s8, 4096  ;;  %p8842_p2 = scmp.lt.s32.totalorder %s11186_s8, %s8840_s20 }
 0x1a8   : > { %v7741_v35 = vadd.f32 %v7740_v61, %v7739_v41  ;;  %v10468_v6 = vadd.f32 %v7738_v62, %v7626_v36  ;;  %v7366_v62 = vcombine.low %v2977_v39, %v2980_v1  ;;  %v2985_v41 = vrot.slane %v2983_v27, 4  ;;  %8003 = vmatpush3.bf16.msra.mxu1 %v8747_v4  ;;  %p8836_p6 = scmp.ne.s32.totalorder %s11186_s8, %s8835_s17  ;;  %p8843_p3 = scmp.lt.s32.totalorder %s8841_s25, %s8835_s17 }
 0x1aa   : > { %v10485_v30 = vadd.f32 %v7741_v35, %v7629_v13  ;;  %v2987_v32 = vsel %vm9124_vm4, %v2985_v41, %v2986_v38  ;;  %p8837_p10 = pnand %p8836_p6, %p11290_p9  ;;  %p8844_p4 = por %p8843_p3, %p8842_p2 }
 0x1ab   : > { %v7758_v16 = vpop.f32.mrb[64].mxu0  ;;  %8503 = vmatmul.mubr.bf16.gmra.mrb[152].mxu0 %v7365_v17  ;;  %v7367_v52 = vcombine.low %v2984_v56, %v2987_v32  ;;  %v8749_v56 = vld [vmem:[#allocation4 + $0x80] sm:$0xff]  }
 0x1ac   : > { %v7759_v9 = vpop.f32.mrb[65].mxu0  ;;  %8506 = vmatprep.mubr.bf16.mxu0 %v7366_v62  ;;  %p8838_p12 = pneg %p8837_p10 }
 0x1ad   : > { %v7760_v21 = vadd.f32 %v7759_v9, %v7758_v16  ;;  %v7761_v22 = vpop.f32.mrb[66].mxu0  ;;  %v7870_v51 = vpop.f32.mrb[64].mxu1 }
 0x1ae   : > { %v7762_v14 = vpop.f32.mrb[67].mxu0  ;;  %v7871_v23 = vpop.f32.mrb[65].mxu1  ;;  %p8845_p7 = pnand %p8844_p4, %p8838_p12 }
 0x1af   : > { %v4145_v26 = vadd.f32 %v7760_v21, %v10391_v2  ;;  %v7763_v63 = vadd.f32 %v7762_v14, %v7761_v22  ;;  %v7872_v61 = vadd.f32 %v7871_v23, %v7870_v51  ;;  %v7873_v49 = vpop.f32.mrb[66].mxu1 }
 0x1b0   : > { %v7874_v35 = vpop.f32.mrb[67].mxu1 }
 0x1b1   : > { %v4148_v46 = vadd.f32 %v7763_v63, %v10396_v37  ;;  %v7875_v53 = vadd.f32 %v7874_v35, %v7873_v49  ;;  %v10493_v36 = vadd.f32 %v7872_v61, %v4145_v26  ;;  %v8748_v63 = vld [vmem:[#allocation4 + $0xc0] sm:$0xff]   ;;  %v8751_v35 = vld [vmem:[#allocation4 + $0x88] sm:$0xff]  }
 0x1b2   : > { %8102 = vmatprep.subr.bf16.mxu0 %v8748_v63 }
 0x1b3   : > { %v7764_v2 = vpop.f32.mrb[68].mxu0  ;;  %v10495_v29 = vadd.f32 %v7875_v53, %v4148_v46  ;;  %8507 = vmatmul.mubr.bf16.gmra.mrb[156].mxu0 %v7367_v52  ;;  %v8750_v52 = vld [vmem:[#allocation4 + $0xc8] sm:$0xff]  }
 0x1b4   : > { %v7765_v44 = vpop.f32.mrb[69].mxu0  ;;  %8103 = vmatpush3.bf16.msra.mxu0 %v8749_v56 }
 0x1b5   : > { %v7766_v40 = vadd.f32 %v7765_v44, %v7764_v2  ;;  %v7767_v27 = vpop.f32.mrb[70].mxu0  ;;  %v7876_v60 = vpop.f32.mrb[68].mxu1  ;;  %8104 = vmatprep.subr.bf16.mxu0 %v8750_v52  ;;  %v8906_v52 = vmov 0.0  }
 0x1b6   : > { %v7768_v13 = vpop.f32.mrb[71].mxu0  ;;  %v7877_v39 = vpop.f32.mrb[69].mxu1  ;;  %185 = vst [vmem:[#allocation3] sm:$0xff] %v8906_v52  ;;  %186 = vst [vmem:[#allocation3 + $0x8] sm:$0xff] %v8906_v52 }
 0x1b7   : > { %v4153_v37 = vadd.f32 %v7766_v40, %v10400_v50  ;;  %v7769_v7 = vadd.f32 %v7768_v13, %v7767_v27  ;;  %v7878_v17 = vadd.f32 %v7877_v39, %v7876_v60  ;;  %v7879_v38 = vpop.f32.mrb[70].mxu1  ;;  %187 = vst [vmem:[#allocation3 + $0x10] sm:$0x3] %v8906_v52  ;;  %189 = vst [vmem:[#allocation3 + $0x198] sm:$0xff] %v8906_v52 }
 0x1b8   : > { %v7880_v16 = vpop.f32.mrb[71].mxu1  ;;  %8105 = vmatpush3.bf16.msra.mxu0 %v8751_v35  ;;  %190 = vst [vmem:[#allocation3 + $0x1a0] sm:$0xff] %v8906_v52  ;;  %191 = vst [vmem:[#allocation3 + $0x1a8] sm:$0x3] %v8906_v52 }
 0x1b9   : > { %v4156_v1 = vadd.f32 %v7769_v7, %v10404_v47  ;;  %v7881_v62 = vadd.f32 %v7880_v16, %v7879_v38  ;;  %v10499_v41 = vadd.f32 %v7878_v17, %v4153_v37  ;;  %v8753_v37 = vld [vmem:[#allocation4 + $0xd0] sm:$0xff]   ;;  %193 = vst [vmem:[#allocation3 + $0x18] sm:$0x1] %v8906_v52  ;;  %194 = vst [vmem:[#allocation3 + $0x30] sm:$0x1] %v8906_v52 }
 0x1ba   : > { %v8755_v17 = vld [vmem:[#allocation4 + $0x90] sm:$0xff]   ;;  %8106 = vmatprep.subr.bf16.mxu0 %v8753_v37  ;;  %195 = vst [vmem:[#allocation3 + $0x48] sm:$0x1] %v8906_v52  ;;  %196 = vst [vmem:[#allocation3 + $0x60] sm:$0x1] %v8906_v52 }
 0x1bb   : > { %v7770_v9 = vpop.f32.mrb[72].mxu0  ;;  %v10501_v21 = vadd.f32 %v7881_v62, %v4156_v1  ;;  %v8754_v1 = vld [vmem:[#allocation4 + $0x38] sm:$0xff]   ;;  %197 = vst [vmem:[#allocation3 + $0x78] sm:$0x1] %v8906_v52  ;;  %198 = vst [vmem:[#allocation3 + $0x90] sm:$0x1] %v8906_v52 }
 0x1bc   : > { %v7771_v22 = vpop.f32.mrb[73].mxu0  ;;  %8107 = vmatpush3.bf16.msra.mxu0 %v8755_v17  ;;  %199 = vst [vmem:[#allocation3 + $0xa8] sm:$0x1] %v8906_v52  ;;  %200 = vst [vmem:[#allocation3 + $0xc0] sm:$0x1] %v8906_v52 }
 0x1bd   : > { %v7772_v14 = vadd.f32 %v7771_v22, %v7770_v9  ;;  %v7773_v26 = vpop.f32.mrb[74].mxu0  ;;  %v7882_v46 = vpop.f32.mrb[72].mxu1  ;;  %201 = vst [vmem:[#allocation3 + $0xd8] sm:$0x1] %v8906_v52  ;;  %202 = vst [vmem:[#allocation3 + $0xf0] sm:$0x1] %v8906_v52 }
 0x1be   : > { %v7774_v50 = vpop.f32.mrb[75].mxu0  ;;  %v7883_v23 = vpop.f32.mrb[73].mxu1  ;;  %203 = vst [vmem:[#allocation3 + $0x108] sm:$0x1] %v8906_v52  ;;  %204 = vst [vmem:[#allocation3 + $0x120] sm:$0x1] %v8906_v52 }
 0x1bf   : > { %v4161_v32 = vadd.f32 %v7772_v14, %v10413_v20  ;;  %v7775_v51 = vadd.f32 %v7774_v50, %v7773_v26  ;;  %v7884_v61 = vadd.f32 %v7883_v23, %v7882_v46  ;;  %v7885_v49 = vpop.f32.mrb[74].mxu1  ;;  %v8756_v26 = vld [vmem:[#allocation4 + $0xd8] sm:$0xff]   ;;  %v8759_v46 = vld [vmem:[#allocation4 + $0xa0] sm:$0xff]   ;;  %v8760_v23 = vld [vmem:[#allocation4 + $0xe8] sm:$0xff]   ;;  %205 = vst [vmem:[#allocation3 + $0x138] sm:$0x1] %v8906_v52 }
 0x1c0   : > { %v7886_v53 = vpop.f32.mrb[75].mxu1  ;;  %v8757_v50 = vld [vmem:[#allocation4 + $0x98] sm:$0xff]   ;;  %8108 = vmatprep.subr.bf16.mxu0 %v8756_v26  ;;  %206 = vst [vmem:[#allocation3 + $0x150] sm:$0x1] %v8906_v52  ;;  %207 = vst [vmem:[#allocation3 + $0x168] sm:$0x1] %v8906_v52 }
 0x1c1   : > { %v4164_v47 = vadd.f32 %v7775_v51, %v10417_v18  ;;  %v7887_v2 = vadd.f32 %v7886_v53, %v7885_v49  ;;  %v10505_v44 = vadd.f32 %v7884_v61, %v4161_v32  ;;  %v8752_v18 = vld [vmem:[#allocation4 + $0x78] sm:$0xff]   ;;  %8109 = vmatpush3.bf16.msra.mxu0 %v8757_v50  ;;  %v8758_v32 = vld [vmem:[#allocation4 + $0xe0] sm:$0xff]   ;;  %208 = vst [vmem:[#allocation3 + $0x180] sm:$0x1] %v8906_v52  ;;  %211 = vst [vmem:[#allocation3 + $0x29] sm:$0x1] %v8906_v52 }
 0x1c2   : > { %8004 = vmatprep.subr.bf16.mxu1 %v8752_v18  ;;  %8110 = vmatprep.subr.bf16.mxu0 %v8758_v32  ;;  %212 = vst [vmem:[#allocation3 + $0x41] sm:$0x1] %v8906_v52  ;;  %213 = vst [vmem:[#allocation3 + $0x59] sm:$0x1] %v8906_v52  ;;  %v8765_v26 = vld [vmem:[#allocation4 + $0x100] sm:$0xff]  }
 0x1c3   : > { %v7776_v40 = vpop.f32.mrb[76].mxu0  ;;  %v10507_v27 = vadd.f32 %v7887_v2, %v4164_v47  ;;  %8005 = vmatpush3.bf16.msra.mxu1 %v8754_v1  ;;  %214 = vst [vmem:[#allocation3 + $0x71] sm:$0x1] %v8906_v52  ;;  %215 = vst [vmem:[#allocation3 + $0x89] sm:$0x1] %v8906_v52  ;;  %v8764_v1 = vld [vmem:[#allocation4 + $0xb0] sm:$0xff]  }
 0x1c4   : > { %v7777_v20 = vpop.f32.mrb[77].mxu0  ;;  %216 = vst [vmem:[#allocation3 + $0xa1] sm:$0x1] %v8906_v52  ;;  %217 = vst [vmem:[#allocation3 + $0xb9] sm:$0x1] %v8906_v52 }
 0x1c5   : > { %v7778_v48 = vadd.f32 %v7777_v20, %v7776_v40  ;;  %v7779_v4 = vpop.f32.mrb[78].mxu0  ;;  %v7888_v7 = vpop.f32.mrb[76].mxu1  ;;  %218 = vst [vmem:[#allocation3 + $0xd1] sm:$0x1] %v8906_v52  ;;  %219 = vst [vmem:[#allocation3 + $0xe9] sm:$0x1] %v8906_v52  ;;  %8111 = vmatpush3.bf16.msra.mxu0 %v8759_v46 }
 0x1c6   : > { %v7780_v13 = vpop.f32.mrb[79].mxu0  ;;  %v7889_v38 = vpop.f32.mrb[77].mxu1  ;;  %220 = vst [vmem:[#allocation3 + $0x101] sm:$0x1] %v8906_v52  ;;  %221 = vst [vmem:[#allocation3 + $0x119] sm:$0x1] %v8906_v52  ;;  %8112 = vmatprep.subr.bf16.mxu0 %v8760_v23 }
 0x1c7   : > { %v4169_v60 = vadd.f32 %v7778_v48, %v10421_v54  ;;  %v7781_v39 = vadd.f32 %v7780_v13, %v7779_v4  ;;  %v7890_v62 = vadd.f32 %v7889_v38, %v7888_v7  ;;  %v7891_v9 = vpop.f32.mrb[78].mxu1  ;;  %222 = vst [vmem:[#allocation3 + $0x131] sm:$0x1] %v8906_v52  ;;  %223 = vst [vmem:[#allocation3 + $0x149] sm:$0x1] %v8906_v52  ;;  %v8761_v40 = vld [vmem:[#allocation4 + $0xa8] sm:$0xff]  }
 0x1c8   : > { %v7892_v22 = vpop.f32.mrb[79].mxu1  ;;  %224 = vst [vmem:[#allocation3 + $0x161] sm:$0x1] %v8906_v52  ;;  %225 = vst [vmem:[#allocation3 + $0x179] sm:$0x1] %v8906_v52  ;;  %v8763_v7 = vld [vmem:[#allocation4 + $0x140] sm:$0xff]  }
 0x1c9   : > { %v4172_v16 = vadd.f32 %v7781_v39, %v10425_v34  ;;  %v7893_v14 = vadd.f32 %v7892_v22, %v7891_v9  ;;  %v10511_v63 = vadd.f32 %v7890_v62, %v4169_v60  ;;  %226 = vst [vmem:[#allocation3 + $0x191] sm:$0x1] %v8906_v52  ;;  %192 = vst [vmem:[#allocation3] sm:$0x1] %v8906_v52  ;;  %8113 = vmatpush3.bf16.msra.mxu0 %v8761_v40  ;;  %v8762_v60 = vld [vmem:[#allocation4 + $0xf0] sm:$0xff]   ;;  %v4691_v9 = vld [vmem:[#allocation3 + $0x9] sm:$0xff] }
 0x1ca   : > { %210 = vst [vmem:[#allocation3 + $0x11] sm:$0x1] %v8906_v52  ;;  %209 = vst [vmem:[#allocation3 + $0x198] sm:$0x1] %v8906_v52  ;;  %v4690_v62 = vld [vmem:[#allocation3 + $0x1] sm:$0xff]  ;;  %8114 = vmatprep.subr.bf16.mxu0 %v8762_v60  ;;  %8214 = vmatprep.subr.bf16.mxu1 %v8763_v7 }
 0x1cb   : > { %v10513_v54 = vadd.f32 %v7893_v14, %v4172_v16  ;;  %v7782_v56 = vpop.f32.mrb[80].mxu0  ;;  %227 = vst [vmem:[#allocation3 + $0x1a9] sm:$0x1] %v8906_v52 }
 0x1cc   : > { %v7783_v51 = vpop.f32.mrb[81].mxu0 }
 0x1cd   : > { %v7784_v47 = vadd.f32 %v7783_v51, %v7782_v56  ;;  %v7785_v34 = vpop.f32.mrb[82].mxu0  ;;  %v7894_v61 = vpop.f32.mrb[80].mxu1  ;;  %8115 = vmatpush3.bf16.msra.mxu0 %v8764_v1 }
 0x1ce   : > { %v7786_v49 = vpop.f32.mrb[83].mxu0  ;;  %v7895_v2 = vpop.f32.mrb[81].mxu1 }
 0x1cf   : > { %v4177_v35 = vadd.f32 %v7784_v47, %v10429_v25  ;;  %v7787_v53 = vadd.f32 %v7786_v49, %v7785_v34  ;;  %v7896_v20 = vadd.f32 %v7895_v2, %v7894_v61  ;;  %v7897_v48 = vpop.f32.mrb[82].mxu1  ;;  %v8767_v2 = vld [vmem:[#allocation4 + $0xb8] sm:$0xff]  }
 0x1d0   : > { %v7898_v13 = vpop.f32.mrb[83].mxu1  ;;  %v4626_v14 = vld [vmem:[#allocation3] sm:$0xff] }
 0x1d1   : > { %v4180_v4 = vadd.f32 %v7787_v53, %v10433_v57  ;;  %v7899_v18 = vadd.f32 %v7898_v13, %v7897_v48  ;;  %v10559_v25 = vadd.f32 %v7896_v20, %v4177_v35  ;;  %v4722_v57 = vpack.c.bf16 %v4691_v9, %v4690_v62  ;;  %v8766_v53 = vld [vmem:[#allocation4 + $0xf8] sm:$0xff]  }
 0x1d2   : > { %v4658_v32 = vpack.c.bf16 %v8906_v52, %v4626_v14  ;;  %8116 = vmatprep.subr.bf16.mxu0 %v8766_v53 }
 0x1d3   : > { %v7788_v37 = vpop.f32.mrb[84].mxu0  ;;  %v10561_v17 = vadd.f32 %v7899_v18, %v4180_v4  ;;  %5955 = vmatprep.mubr.bf16.mxu1 %v4722_v57  ;;  %8117 = vmatpush3.bf16.msra.mxu0 %v8767_v2 }
 0x1d4   : > { %v7789_v39 = vpop.f32.mrb[85].mxu0  ;;  %5956 = vmatmul.mubr.bf16.vlgmr.msra.gmra.mrb[128].mxu1 %v4658_v32 }
 0x1d5   : > { %v7790_v38 = vadd.f32 %v7789_v39, %v7788_v37  ;;  %v7791_v16 = vpop.f32.mrb[86].mxu0  ;;  %v7900_v51 = vpop.f32.mrb[84].mxu1  ;;  %8215 = vmatpush3.bf16.msra.mxu1 %v8765_v26  ;;  %v8768_v37 = vld [vmem:[#allocation4 + $0x148] sm:$0xff]  }
 0x1d6   : > { %v7792_v22 = vpop.f32.mrb[87].mxu0  ;;  %v7901_v47 = vpop.f32.mrb[85].mxu1  ;;  %v8769_v39 = vld [vmem:[#allocation4 + $0x108] sm:$0xff]   ;;  %8216 = vmatprep.subr.bf16.mxu1 %v8768_v37 }
 0x1d7   : > { %v4185_v50 = vadd.f32 %v7790_v38, %v10440_v11  ;;  %v7793_v56 = vadd.f32 %v7792_v22, %v7791_v16  ;;  %v7902_v34 = vadd.f32 %v7901_v47, %v7900_v51  ;;  %v7903_v23 = vpop.f32.mrb[86].mxu1 }
 0x1d8   : > { %v7904_v61 = vpop.f32.mrb[87].mxu1 }
 0x1d9   : > { %v4188_v46 = vadd.f32 %v7793_v56, %v10444_v31  ;;  %v7905_v49 = vadd.f32 %v7904_v61, %v7903_v23  ;;  %v10566_v35 = vadd.f32 %v7902_v34, %v4185_v50  ;;  %8217 = vmatpush3.bf16.msra.mxu1 %v8769_v39 }
 0x1db   : > { %v7794_v11 = vpop.f32.mrb[88].mxu0  ;;  %v10568_v40 = vadd.f32 %v7905_v49, %v4188_v46 }
 0x1dc   : > { %v7795_v52 = vpop.f32.mrb[89].mxu0 }
 0x1dd   : > { %v7796_v20 = vadd.f32 %v7795_v52, %v7794_v11  ;;  %v7797_v48 = vpop.f32.mrb[90].mxu0  ;;  %v7906_v18 = vpop.f32.mrb[88].mxu1  ;;  %v8770_v52 = vld [vmem:[#allocation4 + $0x150] sm:$0xff]  }
 0x1de   : > { %v7798_v31 = vpop.f32.mrb[91].mxu0  ;;  %v7907_v7 = vpop.f32.mrb[89].mxu1  ;;  %8218 = vmatprep.subr.bf16.mxu1 %v8770_v52 }
 0x1df   : > { %v4193_v4 = vadd.f32 %v7796_v20, %v10448_v10  ;;  %v7799_v13 = vadd.f32 %v7798_v31, %v7797_v48  ;;  %v7908_v1 = vadd.f32 %v7907_v7, %v7906_v18  ;;  %v7909_v38 = vpop.f32.mrb[90].mxu1  ;;  %v8771_v31 = vld [vmem:[#allocation4 + $0x110] sm:$0xff]  }
 0x1e0   : > { %v7910_v16 = vpop.f32.mrb[91].mxu1  ;;  %8219 = vmatpush3.bf16.msra.mxu1 %v8771_v31 }
 0x1e1   : > { %v4196_v60 = vadd.f32 %v7799_v13, %v10452_v58  ;;  %v7911_v62 = vadd.f32 %v7910_v16, %v7909_v38  ;;  %v10572_v9 = vadd.f32 %v7908_v1, %v4193_v4 }
 0x1e3   : > { %v7800_v22 = vpop.f32.mrb[92].mxu0  ;;  %v10574_v14 = vadd.f32 %v7911_v62, %v4196_v60 }
 0x1e4   : > { %v7801_v57 = vpop.f32.mrb[93].mxu0 }
 0x1e5   : > { %v7802_v10 = vadd.f32 %v7801_v57, %v7800_v22  ;;  %v7803_v26 = vpop.f32.mrb[94].mxu0 }
 0x1e6   : > { %v7804_v50 = vpop.f32.mrb[95].mxu0 }
 0x1e7   : > { %v4201_v56 = vadd.f32 %v7802_v10, %v10456_v55  ;;  %v7805_v58 = vadd.f32 %v7804_v50, %v7803_v26  ;;  %v7912_v32 = vpop.f32.mrb[92].mxu1 }
 0x1e8   : > { %v7913_v46 = vpop.f32.mrb[93].mxu1 }
 0x1e9   : > { %v4204_v51 = vadd.f32 %v7805_v58, %v10460_v0  ;;  %v7914_v47 = vadd.f32 %v7913_v46, %v7912_v32  ;;  %v7915_v34 = vpop.f32.mrb[94].mxu1  ;;  %v8772_v46 = vld [vmem:[#allocation4 + $0x158] sm:$0xff]  }
 0x1ea   : > { %v7916_v23 = vpop.f32.mrb[95].mxu1  ;;  %8220 = vmatprep.subr.bf16.mxu1 %v8772_v46 }
 0x1eb   : > { %v7917_v61 = vadd.f32 %v7916_v23, %v7915_v34  ;;  %v10578_v49 = vadd.f32 %v7914_v47, %v4201_v56  ;;  %v8773_v34 = vld [vmem:[#allocation4 + $0x118] sm:$0xff]  }
 0x1ec   : > { %8221 = vmatpush3.bf16.msra.mxu1 %v8773_v34 }
 0x1ed   : > { %v7806_v53 = vpop.f32.mrb[96].mxu0  ;;  %v10580_v11 = vadd.f32 %v7917_v61, %v4204_v51 }
 0x1ee   : > { %v7807_v2 = vpop.f32.mrb[97].mxu0 }
 0x1ef   : > { %v7808_v20 = vadd.f32 %v7807_v2, %v7806_v53  ;;  %v7809_v48 = vpop.f32.mrb[98].mxu0 }
 0x1f0   : > { %v7810_v55 = vpop.f32.mrb[99].mxu0 }
 0x1f1   : > { %v4209_v4 = vadd.f32 %v7808_v20, %v10220_v45  ;;  %v7811_v0 = vadd.f32 %v7810_v55, %v7809_v48  ;;  %v8774_v48 = vld [vmem:[#allocation4 + $0x1c0] sm:$0xff]  }
 0x1f2   : > { %v7918_v13 = vpop.f32.mrb[96].mxu1  ;;  %8326 = vmatprep.subr.bf16.mxu0 %v8774_v48 }
 0x1f3   : > { %v4212_v18 = vadd.f32 %v7811_v0, %v10227_v28  ;;  %v7919_v37 = vpop.f32.mrb[97].mxu1  ;;  %v11289_v0 = vld [vmem:[#allocation28_spill] sm:$0xff] }
 0x1f4   : > { %v7920_v60 = vadd.f32 %v7919_v37, %v7918_v13  ;;  %v7921_v7 = vpop.f32.mrb[98].mxu1 }
 0x1f5   : > { %v7922_v39 = vpop.f32.mrb[99].mxu1 }
 0x1f6   : > { %v7923_v1 = vadd.f32 %v7922_v39, %v7921_v7  ;;  %v10584_v38 = vadd.f32 %v7920_v60, %v4209_v4 }
 0x1f7   : > { %v7812_v16 = vpop.f32.mrb[100].mxu0 }
 0x1f8   : > { %v10586_v62 = vadd.f32 %v7923_v1, %v4212_v18  ;;  %v7813_v22 = vpop.f32.mrb[101].mxu0 }
 0x1f9   : > { %v7814_v57 = vadd.f32 %v7813_v22, %v7812_v16  ;;  %v7815_v10 = vpop.f32.mrb[102].mxu0  ;;  %v8776_v16 = vld [vmem:[#allocation4 + $0x160] sm:$0xff]  }
 0x1fa   : > { %v7816_v26 = vpop.f32.mrb[103].mxu0  ;;  %v8777_v22 = vld [vmem:[#allocation4 + $0x120] sm:$0xff]   ;;  %8222 = vmatprep.subr.bf16.mxu1 %v8776_v16 }
 0x1fb   : > { %v4217_v45 = vadd.f32 %v7814_v57, %v10254_v8  ;;  %v7817_v56 = vadd.f32 %v7816_v26, %v7815_v10  ;;  %8223 = vmatpush3.bf16.msra.mxu1 %v8777_v22 }
 0x1fc   : > { %v7924_v50 = vpop.f32.mrb[100].mxu1 }
 0x1fd   : > { %v7925_v58 = vpop.f32.mrb[101].mxu1  ;;  %v4220_v28 = vadd.f32 %v7817_v56, %v10260_v59 }
 0x1fe   : > { %v7926_v32 = vadd.f32 %v7925_v58, %v7924_v50  ;;  %v7927_v51 = vpop.f32.mrb[102].mxu1 }
 0x1ff   : > { %v7928_v47 = vpop.f32.mrb[103].mxu1 }
 0x200   : > { %v7929_v23 = vadd.f32 %v7928_v47, %v7927_v51  ;;  %v10590_v61 = vadd.f32 %v7926_v32, %v4217_v45 }
 0x202   : > { %v10592_v2 = vadd.f32 %v7929_v23, %v4220_v28 }
 0x203   : > { %v7818_v53 = vpop.f32.mrb[104].mxu0 }
 0x204   : > { %v7819_v52 = vpop.f32.mrb[105].mxu0 }
 0x205   : > { %v7820_v8 = vadd.f32 %v7819_v52, %v7818_v53  ;;  %v7821_v20 = vpop.f32.mrb[106].mxu0 }
 0x206   : > { %v7822_v31 = vpop.f32.mrb[107].mxu0 }
 0x207   : > { %v4225_v59 = vadd.f32 %v7820_v8, %v10286_v5  ;;  %v7823_v55 = vadd.f32 %v7822_v31, %v7821_v20 }
 0x209   : > { %v7930_v4 = vpop.f32.mrb[104].mxu1  ;;  %v4228_v13 = vadd.f32 %v7823_v55, %v11289_v0  ;;  %v8780_v55 = vld [vmem:[#allocation4 + $0x168] sm:$0xff]  }
 0x20a   : > { %v7931_v18 = vpop.f32.mrb[105].mxu1  ;;  %v8781_v0 = vld [vmem:[#allocation4 + $0x128] sm:$0xff]   ;;  %8224 = vmatprep.subr.bf16.mxu1 %v8780_v55 }
 0x20b   : > { %v7932_v37 = vadd.f32 %v7931_v18, %v7930_v4  ;;  %v7933_v60 = vpop.f32.mrb[106].mxu1  ;;  %8225 = vmatpush3.bf16.msra.mxu1 %v8781_v0 }
 0x20c   : > { %v7934_v7 = vpop.f32.mrb[107].mxu1  ;;  %v7824_v57 = vpop.f32.mrb[108].mxu0 }
 0x20d   : > { %v7935_v39 = vadd.f32 %v7934_v7, %v7933_v60  ;;  %v10596_v1 = vadd.f32 %v7932_v37, %v4225_v59  ;;  %v7825_v26 = vpop.f32.mrb[109].mxu0 }
 0x20e   : > { %v7826_v5 = vadd.f32 %v7825_v26, %v7824_v57  ;;  %v7827_v45 = vpop.f32.mrb[110].mxu0 }
 0x20f   : > { %v10598_v10 = vadd.f32 %v7935_v39, %v4228_v13  ;;  %v7828_v50 = vpop.f32.mrb[111].mxu0 }
 0x210   : > { %v4233_v56 = vadd.f32 %v7826_v5, %v10318_v42  ;;  %v7829_v58 = vadd.f32 %v7828_v50, %v7827_v45 }
 0x211   : > { %v7936_v28 = vpop.f32.mrb[108].mxu1 }
 0x212   : > { %v4236_v32 = vadd.f32 %v7829_v58, %v10327_v12  ;;  %v7937_v51 = vpop.f32.mrb[109].mxu1 }
 0x213   : > { %v7938_v46 = vadd.f32 %v7937_v51, %v7936_v28  ;;  %v7939_v47 = vpop.f32.mrb[110].mxu1 }
 0x214   : > { %v7940_v34 = vpop.f32.mrb[111].mxu1 }
 0x215   : > { %v7941_v23 = vadd.f32 %v7940_v34, %v7939_v47  ;;  %v10602_v53 = vadd.f32 %v7938_v46, %v4233_v56  ;;  %v8784_v47 = vld [vmem:[#allocation4 + $0x170] sm:$0xff]  }
 0x216   : > { %8226 = vmatprep.subr.bf16.mxu1 %v8784_v47 }
 0x217   : > { %v10604_v8 = vadd.f32 %v7941_v23, %v4236_v32 }
 0x218   : > { %v7830_v52 = vpop.f32.mrb[112].mxu0 }
 0x219   : > { %v7831_v20 = vpop.f32.mrb[113].mxu0 }
 0x21a   : > { %v7832_v48 = vadd.f32 %v7831_v20, %v7830_v52  ;;  %v7833_v31 = vpop.f32.mrb[114].mxu0  ;;  %v8785_v52 = vld [vmem:[#allocation4 + $0x130] sm:$0xff]  }
 0x21b   : > { %v7834_v59 = vpop.f32.mrb[115].mxu0  ;;  %8227 = vmatpush3.bf16.msra.mxu1 %v8785_v52 }
 0x21c   : > { %v4241_v42 = vadd.f32 %v7832_v48, %v10347_v33  ;;  %v7835_v4 = vadd.f32 %v7834_v59, %v7833_v31  ;;  %v7942_v12 = vpop.f32.mrb[112].mxu1 }
 0x21d   : > { %v7943_v18 = vpop.f32.mrb[113].mxu1 }
 0x21e   : > { %v4244_v13 = vadd.f32 %v7835_v4, %v10353_v15  ;;  %v7944_v37 = vadd.f32 %v7943_v18, %v7942_v12  ;;  %v7945_v60 = vpop.f32.mrb[114].mxu1 }
 0x21f   : > { %v7946_v7 = vpop.f32.mrb[115].mxu1 }
 0x220   : > { %v7947_v39 = vadd.f32 %v7946_v7, %v7945_v60  ;;  %v10608_v16 = vadd.f32 %v7944_v37, %v4241_v42 }
 0x222   : > { %v10610_v22 = vadd.f32 %v7947_v39, %v4244_v13 }
 0x223   : > { %v7836_v57 = vpop.f32.mrb[116].mxu0 }
 0x224   : > { %v7837_v26 = vpop.f32.mrb[117].mxu0 }
 0x225   : > { %v7838_v5 = vadd.f32 %v7837_v26, %v7836_v57  ;;  %v7839_v33 = vpop.f32.mrb[118].mxu0 }
 0x226   : > { %v7840_v45 = vpop.f32.mrb[119].mxu0 }
 0x227   : > { %v4249_v50 = vadd.f32 %v7838_v5, %v10384_v3  ;;  %v7841_v58 = vadd.f32 %v7840_v45, %v7839_v33  ;;  %v8788_v5 = vld [vmem:[#allocation4 + $0x178] sm:$0xff]  }
 0x228   : > { %v7948_v56 = vpop.f32.mrb[116].mxu1  ;;  %8228 = vmatprep.subr.bf16.mxu1 %v8788_v5 }
 0x229   : > { %v7949_v15 = vpop.f32.mrb[117].mxu1  ;;  %v4252_v28 = vadd.f32 %v7841_v58, %v10387_v19 }
 0x22a   : > { %v7950_v32 = vadd.f32 %v7949_v15, %v7948_v56  ;;  %v7951_v51 = vpop.f32.mrb[118].mxu1 }
 0x22b   : > { %v7952_v46 = vpop.f32.mrb[119].mxu1 }
 0x22c   : > { %v7953_v34 = vadd.f32 %v7952_v46, %v7951_v51  ;;  %v10614_v23 = vadd.f32 %v7950_v32, %v4249_v50  ;;  %v8789_v50 = vld [vmem:[#allocation4 + $0x138] sm:$0xff]  }
 0x22d   : > { %8229 = vmatpush3.bf16.msra.mxu1 %v8789_v50  ;;  %v8775_v50 = vld [vmem:[#allocation4 + $0x180] sm:$0xff]  }
 0x22e   : > { %v10616_v20 = vadd.f32 %v7953_v34, %v4252_v28  ;;  %v7842_v48 = vpop.f32.mrb[120].mxu0 }
 0x22f   : > { %v7843_v31 = vpop.f32.mrb[121].mxu0 }
 0x230   : > { %v7844_v3 = vadd.f32 %v7843_v31, %v7842_v48  ;;  %v7845_v59 = vpop.f32.mrb[122].mxu0 }
 0x231   : > { %v7846_v55 = vpop.f32.mrb[123].mxu0 }
 0x232   : > { %v4257_v42 = vadd.f32 %v7844_v3, %v10409_v43  ;;  %v7847_v4 = vadd.f32 %v7846_v55, %v7845_v59 }
 0x233   : > { %v7954_v19 = vpop.f32.mrb[120].mxu1 }
 0x234   : > { %v7955_v0 = vpop.f32.mrb[121].mxu1  ;;  %v4260_v12 = vadd.f32 %v7847_v4, %v10436_v24 }
 0x235   : > { %v7956_v13 = vadd.f32 %v7955_v0, %v7954_v19  ;;  %v7957_v18 = vpop.f32.mrb[122].mxu1 }
 0x236   : > { %v7958_v37 = vpop.f32.mrb[123].mxu1 }
 0x237   : > { %v7959_v60 = vadd.f32 %v7958_v37, %v7957_v18  ;;  %v10620_v7 = vadd.f32 %v7956_v13, %v4257_v42  ;;  %v4754_v18 = vld [vmem:[#allocation3 + $0x2] sm:$0xff]  ;;  %v4755_v37 = vld [vmem:[#allocation3 + $0xa] sm:$0xff] }
 0x239   : > { %v10622_v39 = vadd.f32 %v7959_v60, %v4260_v12  ;;  %v10637_v12 = vld [vmem:[#allocation4 + $0x200] sm:$0xff]  }
 0x23a   : > { %v7848_v57 = vpop.f32.mrb[124].mxu0  ;;  %8510 = vmatprep.subr.bf16.mxu1 %v10637_v12 }
 0x23b   : > { %v7849_v26 = vpop.f32.mrb[125].mxu0 }
 0x23c   : > { %v7850_v33 = vadd.f32 %v7849_v26, %v7848_v57  ;;  %v7851_v45 = vpop.f32.mrb[126].mxu0 }
 0x23d   : > { %v7852_v43 = vpop.f32.mrb[127].mxu0 }
 0x23e   : > { %v4265_v56 = vadd.f32 %v7850_v33, %v10468_v6  ;;  %v7853_v58 = vadd.f32 %v7852_v43, %v7851_v45 }
 0x23f   : > { %v7960_v24 = vpop.f32.mrb[124].mxu1 }
 0x240   : > { %v4268_v15 = vadd.f32 %v7853_v58, %v10485_v30  ;;  %v7961_v28 = vpop.f32.mrb[125].mxu1 }
 0x241   : > { %v7962_v32 = vadd.f32 %v7961_v28, %v7960_v24  ;;  %v7963_v51 = vpop.f32.mrb[126].mxu1 }
 0x242   : > { %v7964_v46 = vpop.f32.mrb[127].mxu1  ;;  %v8480_v47 = vpop.f32.mrb[128].mxu0 }
 0x243   : > { %v7965_v34 = vadd.f32 %v7964_v46, %v7963_v51  ;;  %v4475_v52 = vadd.f32 %v8480_v47, %v10499_v41  ;;  %v4466_v48 = vpop.f32.mrb[129].mxu0  ;;  %v10627_v31 = vadd.f32 %v7962_v32, %v4265_v56  ;;  %v8778_v56 = vld [vmem:[#allocation4 + $0x1c8] sm:$0xff]  }
 0x244   : > { %v4467_v3 = vadd.f32 %v4466_v48, %v10493_v36  ;;  %v8481_v59 = vpop.f32.mrb[130].mxu0  ;;  %v8779_v51 = vld [vmem:[#allocation4 + $0x188] sm:$0xff]  }
 0x245   : > { %4596 = vst [vmem:[#allocation3 + $0x31] sm:$0xff] %v4475_v52  ;;  %v4478_v6 = vadd.f32 %v8481_v59, %v10501_v21  ;;  %v4469_v55 = vpop.f32.mrb[131].mxu0  ;;  %v10631_v42 = vadd.f32 %v7965_v34, %v4268_v15  ;;  %v8783_v59 = vld [vmem:[#allocation4 + $0x190] sm:$0xff]  }
 0x246   : > { %4594 = vst [vmem:[#allocation3 + $0x19] sm:$0xff] %v4467_v3  ;;  %v4470_v30 = vadd.f32 %v4469_v55, %v10495_v29 }
 0x247   : > { %4597 = vst [vmem:[#allocation3 + $0x39] sm:$0xff] %v4478_v6  ;;  %v4724_v19 = vpack.c.bf16 %v4478_v6, %v4475_v52 }
 0x248   : > { %4595 = vst [vmem:[#allocation3 + $0x21] sm:$0xff] %v4470_v30  ;;  %v4723_v4 = vpack.c.bf16 %v4470_v30, %v4467_v3 }
 0x24a   : > { %v8484_v41 = vpop.f32.mrb[132].mxu0  ;;  %5963 = vmatprep.mubr.bf16.mxu1 %v4723_v4 }
 0x24b   : > { %v10635_v0 = vadd.f32 %v8484_v41, %v10511_v63  ;;  %v4482_v36 = vpop.f32.mrb[133].mxu0 }
 0x24c   : > { %v4483_v21 = vadd.f32 %v4482_v36, %v10505_v44  ;;  %v8485_v13 = vpop.f32.mrb[134].mxu0  ;;  %v4786_v44 = vpack.c.bf16 %v4755_v37, %v4754_v18  ;;  %v4820_v43 = vld [vmem:[#allocation3 + $0x30] sm:$0xff] }
 0x24d   : > { %4600 = vst [vmem:[#allocation3 + $0x61] sm:$0xff] %v10635_v0  ;;  %v10642_v29 = vadd.f32 %v8485_v13, %v10513_v54  ;;  %v4485_v60 = vpop.f32.mrb[135].mxu0  ;;  %v4818_v57 = vld [vmem:[#allocation3 + $0x18] sm:$0xff]  ;;  %v8787_v13 = vld [vmem:[#allocation4 + $0x198] sm:$0xff]  }
 0x24e   : > { %4598 = vst [vmem:[#allocation3 + $0x49] sm:$0xff] %v4483_v21  ;;  %v10646_v63 = vadd.f32 %v4485_v60, %v10507_v27  ;;  %v4821_v5 = vld [vmem:[#allocation3 + $0x38] sm:$0xff] }
 0x24f   : > { %4601 = vst [vmem:[#allocation3 + $0x69] sm:$0xff] %v10642_v29  ;;  %v4819_v26 = vld [vmem:[#allocation3 + $0x20] sm:$0xff]  ;;  %v4726_v33 = vpack.c.bf16 %v10642_v29, %v10635_v0  ;;  %v10653_v27 = vpack.c.bf16 %v4821_v5, %v4820_v43  ;;  %v8791_v5 = vld [vmem:[#allocation4 + $0x1a0] sm:$0xff]  }
 0x250   : > { %4599 = vst [vmem:[#allocation3 + $0x51] sm:$0xff] %v10646_v63  ;;  %v4850_v54 = vpack.c.bf16 %v4819_v26, %v4818_v57  ;;  %v4725_v45 = vpack.c.bf16 %v10646_v63, %v4483_v21  ;;  %v4757_v52 = vld [vmem:[#allocation3 + $0x22] sm:$0xff]  ;;  %v4759_v57 = vld [vmem:[#allocation3 + $0x3a] sm:$0xff] }
 0x252   : > { %v8488_v58 = vpop.f32.mrb[136].mxu0  ;;  %6116 = vmatprep.mubr.bf16.mxu0 %v4850_v54  ;;  %5964 = vmatmul.mubr.bf16.gmra.mrb[132].mxu1 %v4850_v54 }
 0x253   : > { %v10656_v24 = vadd.f32 %v8488_v58, %v10566_v35  ;;  %v4498_v15 = vpop.f32.mrb[137].mxu0  ;;  %6117 = vmatmul.mubr.bf16.vlgmr.msra.gmra.mrb[160].mxu0 %v4786_v44  ;;  %5971 = vmatprep.mubr.bf16.mxu1 %v4724_v19  ;;  %v8782_v35 = vld [vmem:[#allocation4 + $0x1d0] sm:$0xff]  }
 0x254   : > { %v10659_v28 = vadd.f32 %v4498_v15, %v10559_v25  ;;  %v8489_v32 = vpop.f32.mrb[138].mxu0  ;;  %6124 = vmatprep.mubr.bf16.mxu0 %v10653_v27  ;;  %8327 = vmatpush3.bf16.msra.mxu0 %v8775_v50  ;;  %v4756_v25 = vld [vmem:[#allocation3 + $0x1a] sm:$0xff] }
 0x255   : > { %4604 = vst [vmem:[#allocation3 + $0x91] sm:$0xff] %v10656_v24  ;;  %v10664_v46 = vadd.f32 %v8489_v32, %v10568_v40  ;;  %v4501_v47 = vpop.f32.mrb[139].mxu0  ;;  %8328 = vmatprep.subr.bf16.mxu0 %v8778_v56  ;;  %v10676_v6 = vpack.c.bf16 %v4757_v52, %v4756_v25  ;;  %v4822_v55 = vld [vmem:[#allocation3 + $0x48] sm:$0xff] }
 0x256   : > { %4602 = vst [vmem:[#allocation3 + $0x79] sm:$0xff] %v10659_v28  ;;  %v10668_v34 = vadd.f32 %v4501_v47, %v10561_v17  ;;  %v8786_v17 = vld [vmem:[#allocation4 + $0x1d8] sm:$0xff]  }
 0x257   : > { %4605 = vst [vmem:[#allocation3 + $0x99] sm:$0xff] %v10664_v46  ;;  %v4823_v48 = vld [vmem:[#allocation3 + $0x50] sm:$0xff]  ;;  %v4728_v3 = vpack.c.bf16 %v10664_v46, %v10656_v24  ;;  %v4825_v26 = vld [vmem:[#allocation3 + $0x68] sm:$0xff] }
 0x258   : > { %4603 = vst [vmem:[#allocation3 + $0x81] sm:$0xff] %v10668_v34  ;;  %v4727_v40 = vpack.c.bf16 %v10668_v34, %v10659_v28  ;;  %8329 = vmatpush3.bf16.msra.mxu0 %v8779_v51  ;;  %v10679_v19 = vpack.c.bf16 %v4823_v48, %v4822_v55  ;;  %v8793_v51 = vld [vmem:[#allocation4 + $0x1a8] sm:$0xff]   ;;  %v5141_v25 = vld [vmem:[#allocation3 + $0x4a] sm:$0xff] }
 0x259   : > { %8330 = vmatprep.subr.bf16.mxu0 %v8782_v35  ;;  %v8794_v35 = vld [vmem:[#allocation4 + $0x1f0] sm:$0xff]   ;;  %v5142_v52 = vld [vmem:[#allocation3 + $0x52] sm:$0xff]  ;;  %v8797_v55 = vld [vmem:[#allocation4 + $0x1f8] sm:$0xff]  }
 0x25a   : > { %v8492_v30 = vpop.f32.mrb[140].mxu0  ;;  %5972 = vmatmul.mubr.bf16.gmra.mrb[136].mxu1 %v10653_v27  ;;  %v10733_v48 = vpack.c.bf16 %v5142_v52, %v5141_v25 }
 0x25b   : > { %v10682_v4 = vadd.f32 %v8492_v30, %v10578_v49  ;;  %v4514_v41 = vpop.f32.mrb[141].mxu0  ;;  %6125 = vmatmul.mubr.bf16.gmra.mrb[164].mxu0 %v10676_v6  ;;  %5979 = vmatprep.mubr.bf16.mxu1 %v4725_v45  ;;  %v8790_v49 = vld [vmem:[#allocation4 + $0x1e0] sm:$0xff]   ;;  %v4824_v45 = vld [vmem:[#allocation3 + $0x60] sm:$0xff] }
 0x25c   : > { %v10686_v36 = vadd.f32 %v4514_v41, %v10572_v9  ;;  %v8493_v21 = vpop.f32.mrb[142].mxu0  ;;  %6132 = vmatprep.mubr.bf16.mxu0 %v10679_v19  ;;  %8331 = vmatpush3.bf16.msra.mxu0 %v8783_v59  ;;  %v4758_v9 = vld [vmem:[#allocation3 + $0x32] sm:$0xff]  ;;  %v10706_v43 = vpack.c.bf16 %v4825_v26, %v4824_v45 }
 0x25d   : > { %4608 = vst [vmem:[#allocation3 + $0xc1] sm:$0xff] %v10682_v4  ;;  %v10691_v18 = vadd.f32 %v8493_v21, %v10580_v11  ;;  %v4517_v37 = vpop.f32.mrb[143].mxu0  ;;  %8332 = vmatprep.subr.bf16.mxu0 %v8786_v17  ;;  %v10703_v54 = vpack.c.bf16 %v4759_v57, %v4758_v9  ;;  %v4826_v59 = vld [vmem:[#allocation3 + $0x78] sm:$0xff] }
 0x25e   : > { %4606 = vst [vmem:[#allocation3 + $0xa9] sm:$0xff] %v10686_v36  ;;  %v10695_v60 = vadd.f32 %v4517_v37, %v10574_v14  ;;  %v8792_v14 = vld [vmem:[#allocation4 + $0x1e8] sm:$0xff]   ;;  %v8798_v37 = vld [vmem:[#allocation4 + $0x1b8] sm:$0xff]  }
 0x25f   : > { %4609 = vst [vmem:[#allocation3 + $0xc9] sm:$0xff] %v10691_v18  ;;  %v4730_v44 = vpack.c.bf16 %v10691_v18, %v10682_v4  ;;  %v4827_v0 = vld [vmem:[#allocation3 + $0x80] sm:$0xff]  ;;  %v4829_v9 = vld [vmem:[#allocation3 + $0x98] sm:$0xff] }
 0x260   : > { %4607 = vst [vmem:[#allocation3 + $0xb1] sm:$0xff] %v10695_v60  ;;  %v4729_v11 = vpack.c.bf16 %v10695_v60, %v10686_v36  ;;  %8333 = vmatpush3.bf16.msra.mxu0 %v8787_v13  ;;  %v10736_v17 = vpack.c.bf16 %v4827_v0, %v4826_v59  ;;  %v4765_v24 = vld [vmem:[#allocation3 + $0x82] sm:$0xff] }
 0x261   : > { %8334 = vmatprep.subr.bf16.mxu0 %v8790_v49 }
 0x262   : > { %v8496_v50 = vpop.f32.mrb[144].mxu0  ;;  %5980 = vmatmul.mubr.bf16.gmra.mrb[140].mxu1 %v10679_v19 }
 0x263   : > { %v10709_v56 = vadd.f32 %v8496_v50, %v10590_v61  ;;  %v4530_v58 = vpop.f32.mrb[145].mxu0  ;;  %6133 = vmatmul.mubr.bf16.gmra.mrb[168].mxu0 %v10703_v54  ;;  %5987 = vmatprep.mubr.bf16.mxu1 %v4726_v33  ;;  %v8796_v33 = vld [vmem:[#allocation4 + $0x1b0] sm:$0xff]  }
 0x264   : > { %v10716_v15 = vadd.f32 %v4530_v58, %v10584_v38  ;;  %v8497_v32 = vpop.f32.mrb[146].mxu0  ;;  %6140 = vmatprep.mubr.bf16.mxu0 %v10706_v43  ;;  %8335 = vmatpush3.bf16.msra.mxu0 %v8791_v5  ;;  %v4828_v5 = vld [vmem:[#allocation3 + $0x90] sm:$0xff] }
 0x265   : > { %4612 = vst [vmem:[#allocation3 + $0xf1] sm:$0xff] %v10709_v56  ;;  %v10721_v61 = vadd.f32 %v8497_v32, %v10592_v2  ;;  %v4533_v47 = vpop.f32.mrb[147].mxu0  ;;  %8336 = vmatprep.subr.bf16.mxu0 %v8792_v14  ;;  %v4830_v25 = vld [vmem:[#allocation3 + $0xa8] sm:$0xff] }
 0x266   : > { %4610 = vst [vmem:[#allocation3 + $0xd9] sm:$0xff] %v10716_v15  ;;  %v10725_v38 = vadd.f32 %v4533_v47, %v10586_v62  ;;  %v4833_v36 = vld [vmem:[#allocation3 + $0xc8] sm:$0xff] }
 0x267   : > { %4613 = vst [vmem:[#allocation3 + $0xf9] sm:$0xff] %v10721_v61  ;;  %v4732_v29 = vpack.c.bf16 %v10721_v61, %v10709_v56  ;;  %v4770_v4 = vld [vmem:[#allocation3 + $0xc2] sm:$0xff]  ;;  %v4771_v18 = vld [vmem:[#allocation3 + $0xca] sm:$0xff] }
 0x268   : > { %4611 = vst [vmem:[#allocation3 + $0xe1] sm:$0xff] %v10725_v38  ;;  %v4731_v2 = vpack.c.bf16 %v10725_v38, %v10716_v15  ;;  %8337 = vmatpush3.bf16.msra.mxu0 %v8793_v51 }
 0x269   : > { %8338 = vmatprep.subr.bf16.mxu0 %v8794_v35  ;;  %v4764_v35 = vld [vmem:[#allocation3 + $0x7a] sm:$0xff] }
 0x26a   : > { %5988 = vmatmul.mubr.bf16.gmra.mrb[144].mxu1 %v10706_v43 }
 0x26b   : > { %6141 = vmatmul.mubr.bf16.gmra.mrb[172].mxu0 %v10733_v48  ;;  %5995 = vmatprep.mubr.bf16.mxu1 %v4727_v40  ;;  %v4762_v40 = vld [vmem:[#allocation3 + $0x62] sm:$0xff] }
 0x26c   : > { %6148 = vmatprep.mubr.bf16.mxu0 %v10736_v17  ;;  %8339 = vmatpush3.bf16.msra.mxu0 %v8796_v33 }
 0x26d   : > { %8340 = vmatprep.subr.bf16.mxu0 %v8797_v55 }
 0x26e   : > { %v4774_v56 = vld [vmem:[#allocation3 + $0xf2] sm:$0xff]  ;;  %v4775_v61 = vld [vmem:[#allocation3 + $0xfa] sm:$0xff] }
 0x26f   : > { %v4772_v15 = vld [vmem:[#allocation3 + $0xda] sm:$0xff] }
 0x270   : > { %8341 = vmatpush3.bf16.msra.mxu0 %v8798_v37  ;;  %v4767_v37 = vld [vmem:[#allocation3 + $0x9a] sm:$0xff] }
 0x272   : > { %5996 = vmatmul.mubr.bf16.gmra.mrb[148].mxu1 %v10736_v17 }
 0x273   : > { %6003 = vmatprep.mubr.bf16.mxu1 %v4728_v3  ;;  %v10793_v3 = vpack.c.bf16 %v4765_v24, %v4764_v35 }
 0x276   : > { %v8500_v62 = vpop.f32.mrb[148].mxu0 }
 0x277   : > { %v10739_v30 = vadd.f32 %v8500_v62, %v10602_v53  ;;  %v4546_v41 = vpop.f32.mrb[149].mxu0 }
 0x278   : > { %v10746_v21 = vadd.f32 %v4546_v41, %v10596_v1  ;;  %v8501_v13 = vpop.f32.mrb[150].mxu0  ;;  %v4763_v1 = vld [vmem:[#allocation3 + $0x6a] sm:$0xff] }
 0x279   : > { %4616 = vst [vmem:[#allocation3 + $0x121] sm:$0xff] %v10739_v30  ;;  %v10751_v53 = vadd.f32 %v8501_v13, %v10604_v8  ;;  %v4549_v49 = vpop.f32.mrb[151].mxu0  ;;  %v10763_v26 = vpack.c.bf16 %v4763_v1, %v4762_v40  ;;  %v4766_v13 = vld [vmem:[#allocation3 + $0x92] sm:$0xff]  ;;  %v4835_v1 = vld [vmem:[#allocation3 + $0xe0] sm:$0xff] }
 0x27a   : > { %4614 = vst [vmem:[#allocation3 + $0x109] sm:$0xff] %v10746_v21  ;;  %v10755_v28 = vadd.f32 %v4549_v49, %v10598_v10  ;;  %v10766_v10 = vpack.c.bf16 %v4829_v9, %v4828_v5  ;;  %v4832_v49 = vld [vmem:[#allocation3 + $0xc0] sm:$0xff]  ;;  %v4769_v40 = vld [vmem:[#allocation3 + $0xb2] sm:$0xff] }
 0x27b   : > { %4617 = vst [vmem:[#allocation3 + $0x129] sm:$0xff] %v10751_v53  ;;  %v4734_v57 = vpack.c.bf16 %v10751_v53, %v10739_v30  ;;  %6149 = vmatmul.mubr.bf16.gmra.mrb[176].mxu0 %v10763_v26  ;;  %v4834_v5 = vld [vmem:[#allocation3 + $0xd8] sm:$0xff] }
 0x27c   : > { %4615 = vst [vmem:[#allocation3 + $0x111] sm:$0xff] %v10755_v28  ;;  %v4733_v8 = vpack.c.bf16 %v10755_v28, %v10746_v21  ;;  %6156 = vmatprep.mubr.bf16.mxu0 %v10766_v10  ;;  %6004 = vmatmul.mubr.bf16.gmra.mrb[152].mxu1 %v10766_v10 }
 0x27d   : > { %6011 = vmatprep.mubr.bf16.mxu1 %v4729_v11  ;;  %v10815_v11 = vpack.c.bf16 %v4767_v37, %v4766_v13 }
 0x27e   : > { %v8504_v45 = vpop.f32.mrb[152].mxu0 }
 0x27f   : > { %v10769_v14 = vadd.f32 %v8504_v45, %v10614_v23  ;;  %v4562_v50 = vpop.f32.mrb[153].mxu0  ;;  %v10828_v45 = vpack.c.bf16 %v4835_v1, %v4834_v5 }
 0x280   : > { %v10776_v58 = vadd.f32 %v4562_v50, %v10608_v16  ;;  %v8505_v32 = vpop.f32.mrb[154].mxu0  ;;  %v4831_v16 = vld [vmem:[#allocation3 + $0xb0] sm:$0xff]  ;;  %v10835_v50 = vpack.c.bf16 %v4771_v18, %v4770_v4 }
 0x281   : > { %4620 = vst [vmem:[#allocation3 + $0x151] sm:$0xff] %v10769_v14  ;;  %v10781_v51 = vadd.f32 %v8505_v32, %v10616_v20  ;;  %v4565_v23 = vpop.f32.mrb[155].mxu0  ;;  %v4836_v32 = vld [vmem:[#allocation3 + $0xf0] sm:$0xff] }
 0x282   : > { %4618 = vst [vmem:[#allocation3 + $0x139] sm:$0xff] %v10776_v58  ;;  %v10785_v47 = vadd.f32 %v4565_v23, %v10610_v22  ;;  %v10796_v22 = vpack.c.bf16 %v4831_v16, %v4830_v25  ;;  %v4838_v16 = vld [vmem:[#allocation3 + $0x108] sm:$0xff] }
 0x283   : > { %4621 = vst [vmem:[#allocation3 + $0x159] sm:$0xff] %v10781_v51  ;;  %v4736_v46 = vpack.c.bf16 %v10781_v51, %v10769_v14  ;;  %6157 = vmatmul.mubr.bf16.gmra.mrb[180].mxu0 %v10793_v3  ;;  %v4839_v35 = vld [vmem:[#allocation3 + $0x110] sm:$0xff]  ;;  %v4778_v53 = vld [vmem:[#allocation3 + $0x122] sm:$0xff] }
 0x284   : > { %4619 = vst [vmem:[#allocation3 + $0x141] sm:$0xff] %v10785_v47  ;;  %v4735_v20 = vpack.c.bf16 %v10785_v47, %v10776_v58  ;;  %6164 = vmatprep.mubr.bf16.mxu0 %v10796_v22  ;;  %6012 = vmatmul.mubr.bf16.gmra.mrb[156].mxu1 %v10796_v22  ;;  %v10848_v25 = vpack.c.bf16 %v4839_v35, %v4838_v16  ;;  %v4776_v21 = vld [vmem:[#allocation3 + $0x10a] sm:$0xff] }
 0x285   : > { %6019 = vmatprep.mubr.bf16.mxu1 %v4730_v44  ;;  %v4837_v44 = vld [vmem:[#allocation3 + $0xf8] sm:$0xff] }
 0x286   : > { %v8508_v52 = vpop.f32.mrb[156].mxu0  ;;  %v10838_v23 = vpack.c.bf16 %v4837_v44, %v4836_v32 }
 0x287   : > { %v4587_v0 = vadd.f32 %v8508_v52, %v10627_v31  ;;  %v4578_v33 = vpop.f32.mrb[157].mxu0  ;;  %v10855_v52 = vpack.c.bf16 %v4775_v61, %v4774_v56  ;;  %v4882_v61 = vld [vmem:[#allocation3 + $0x19] sm:$0xff] }
 0x288   : > { %v10804_v59 = vadd.f32 %v4578_v33, %v10620_v7  ;;  %v8509_v55 = vpop.f32.mrb[158].mxu0  ;;  %v4844_v4 = vld [vmem:[#allocation3 + $0x150] sm:$0xff] }
 0x289   : > { %4624 = vst [vmem:[#allocation3 + $0x181] sm:$0xff] %v4587_v0  ;;  %v4590_v62 = vadd.f32 %v8509_v55, %v10631_v42  ;;  %v4581_v41 = vpop.f32.mrb[159].mxu0  ;;  %v10818_v42 = vpack.c.bf16 %v4833_v36, %v4832_v49  ;;  %v4840_v0 = vld [vmem:[#allocation3 + $0x120] sm:$0xff]  ;;  %v4842_v37 = vld [vmem:[#allocation3 + $0x138] sm:$0xff] }
 0x28a   : > { %4622 = vst [vmem:[#allocation3 + $0x169] sm:$0xff] %v10804_v59  ;;  %v10810_v31 = vadd.f32 %v4581_v41, %v10622_v39  ;;  %v4768_v39 = vld [vmem:[#allocation3 + $0xaa] sm:$0xff]  ;;  %v4845_v1 = vld [vmem:[#allocation3 + $0x158] sm:$0xff] }
 0x28b   : > { %4625 = vst [vmem:[#allocation3 + $0x189] sm:$0xff] %v4590_v62  ;;  %6165 = vmatmul.mubr.bf16.gmra.mrb[184].mxu0 %v10815_v11  ;;  %v10825_v9 = vpack.c.bf16 %v4769_v40, %v4768_v39  ;;  %v4843_v55 = vld [vmem:[#allocation3 + $0x140] sm:$0xff]  ;;  %v10882_v18 = vpack.c.bf16 %v4845_v1, %v4844_v4  ;;  %v4782_v14 = vld [vmem:[#allocation3 + $0x152] sm:$0xff] }
 0x28c   : > { %4623 = vst [vmem:[#allocation3 + $0x171] sm:$0xff] %v10810_v31  ;;  %v4737_v7 = vpack.c.bf16 %v10810_v31, %v10804_v59  ;;  %6172 = vmatprep.mubr.bf16.mxu0 %v10818_v42  ;;  %6020 = vmatmul.mubr.bf16.gmra.mrb[160].mxu1 %v10818_v42  ;;  %v10870_v39 = vpack.c.bf16 %v4843_v55, %v4842_v37  ;;  %v4780_v58 = vld [vmem:[#allocation3 + $0x13a] sm:$0xff]  ;;  %v8801_v37 = vld [vmem:[#allocation4 + $0x218] sm:$0xff]  }
 0x28d   : > { %6027 = vmatprep.mubr.bf16.mxu1 %v4731_v2  ;;  %v4773_v2 = vld [vmem:[#allocation3 + $0xe2] sm:$0xff]  ;;  %v4783_v51 = vld [vmem:[#allocation3 + $0x15a] sm:$0xff] }
 0x28e   : > { %v10845_v24 = vpack.c.bf16 %v4773_v2, %v4772_v15  ;;  %v10899_v35 = vpack.c.bf16 %v4783_v51, %v4782_v14  ;;  %v4883_v59 = vld [vmem:[#allocation3 + $0x21] sm:$0xff]  ;;  %v8799_v55 = vld [vmem:[#allocation4 + $0x208] sm:$0xff]  }
 0x28f   : > { %v8803_v1 = vld [vmem:[#allocation4 + $0x228] sm:$0xff]  }
 0x290   : > { %v4848_v16 = vld [vmem:[#allocation3 + $0x180] sm:$0xff] }
 0x291   : > { %v4846_v15 = vld [vmem:[#allocation3 + $0x168] sm:$0xff] }
 0x293   : > { %6173 = vmatmul.mubr.bf16.gmra.mrb[188].mxu0 %v10825_v9  ;;  %v4847_v44 = vld [vmem:[#allocation3 + $0x170] sm:$0xff] }
 0x294   : > { %6180 = vmatprep.mubr.bf16.mxu0 %v10828_v45  ;;  %6028 = vmatmul.mubr.bf16.gmra.mrb[164].mxu1 %v10828_v45  ;;  %v10892_v2 = vpack.c.bf16 %v4847_v44, %v4846_v15  ;;  %v4784_v31 = vld [vmem:[#allocation3 + $0x16a] sm:$0xff] }
 0x295   : > { %6035 = vmatprep.mubr.bf16.mxu1 %v4732_v29  ;;  %v4841_v29 = vld [vmem:[#allocation3 + $0x128] sm:$0xff] }
 0x296   : > { %v10858_v33 = vpack.c.bf16 %v4841_v29, %v4840_v0  ;;  %v5076_v29 = vld [vmem:[#allocation3 + $0x39] sm:$0xff]  ;;  %v4914_v0 = vpack.c.bf16 %v4883_v59, %v4882_v61  ;;  %v5085_v15 = vld [vmem:[#allocation3 + $0xa9] sm:$0xff] }
 0x29b   : > { %6181 = vmatmul.mubr.bf16.gmra.mrb[192].mxu0 %v10835_v50 }
 0x29c   : > { %6188 = vmatprep.mubr.bf16.mxu0 %v10838_v23  ;;  %6036 = vmatmul.mubr.bf16.gmra.mrb[168].mxu1 %v10838_v23 }
 0x29d   : > { %6043 = vmatprep.mubr.bf16.mxu1 %v4733_v8  ;;  %v4777_v8 = vld [vmem:[#allocation3 + $0x112] sm:$0xff] }
 0x29e   : > { %v10865_v13 = vpack.c.bf16 %v4777_v8, %v4776_v21  ;;  %v5075_v8 = vld [vmem:[#allocation3 + $0x31] sm:$0xff] }
 0x2a3   : > { %6189 = vmatmul.mubr.bf16.gmra.mrb[196].mxu0 %v10845_v24 }
 0x2a4   : > { %6196 = vmatprep.mubr.bf16.mxu0 %v10848_v25  ;;  %6044 = vmatmul.mubr.bf16.gmra.mrb[172].mxu1 %v10848_v25 }
 0x2a5   : > { %6051 = vmatprep.mubr.bf16.mxu1 %v4734_v57  ;;  %v4779_v57 = vld [vmem:[#allocation3 + $0x12a] sm:$0xff] }
 0x2a6   : > { %v10879_v5 = vpack.c.bf16 %v4779_v57, %v4778_v53  ;;  %v5080_v53 = vld [vmem:[#allocation3 + $0x69] sm:$0xff]  ;;  %v5079_v57 = vld [vmem:[#allocation3 + $0x61] sm:$0xff] }
 0x2a7   : > { %v8006_v62 = vpop.f32.mrb[128].mxu1  ;;  %v5109_v4 = vpack.c.bf16 %v5080_v53, %v5079_v57 }
 0x2a8   : > { %v8007_v41 = vpop.f32.mrb[129].mxu1 }
 0x2a9   : > { %v10867_v36 = vadd.f32 %v8007_v41, %v8006_v62  ;;  %v8009_v49 = vpop.f32.mrb[130].mxu1  ;;  %v5107_v62 = vpack.c.bf16 %v5076_v29, %v5075_v8  ;;  %v5077_v41 = vld [vmem:[#allocation3 + $0x49] sm:$0xff] }
 0x2aa   : > { %v8010_v40 = vpop.f32.mrb[131].mxu1 }
 0x2ab   : > { %6197 = vmatmul.mubr.bf16.gmra.mrb[200].mxu0 %v10855_v52  ;;  %v10876_v30 = vadd.f32 %v8010_v40, %v8009_v49  ;;  %v5108_v49 = vpack.c.bf16 %v10646_v63, %v5077_v41  ;;  %v4887_v40 = vld [vmem:[#allocation3 + $0x51] sm:$0xff]  ;;  %v8804_v63 = vld [vmem:[#allocation4 + $0x230] sm:$0xff]  }
 0x2ac   : > { %6204 = vmatprep.mubr.bf16.mxu0 %v10858_v33  ;;  %6052 = vmatmul.mubr.bf16.gmra.mrb[176].mxu1 %v10858_v33 }
 0x2ad   : > { %6059 = vmatprep.mubr.bf16.mxu1 %v4735_v20  ;;  %v4781_v20 = vld [vmem:[#allocation3 + $0x142] sm:$0xff] }
 0x2ae   : > { %v10889_v32 = vpack.c.bf16 %v4781_v20, %v4780_v58  ;;  %v8805_v58 = vld [vmem:[#allocation4 + $0x238] sm:$0xff]  }
 0x2b3   : > { %6205 = vmatmul.mubr.bf16.gmra.mrb[204].mxu0 %v10865_v13 }
 0x2b4   : > { %6212 = vmatprep.mubr.bf16.mxu0 %v10870_v39  ;;  %6060 = vmatmul.mubr.bf16.gmra.mrb[180].mxu1 %v10870_v39 }
 0x2b5   : > { %6067 = vmatprep.mubr.bf16.mxu1 %v4736_v46  ;;  %v4849_v46 = vld [vmem:[#allocation3 + $0x188] sm:$0xff] }
 0x2b6   : > { %v10902_v56 = vpack.c.bf16 %v4849_v46, %v4848_v16 }
 0x2bb   : > { %6213 = vmatmul.mubr.bf16.gmra.mrb[208].mxu0 %v10879_v5 }
 0x2bc   : > { %6220 = vmatprep.mubr.bf16.mxu0 %v10882_v18  ;;  %6068 = vmatmul.mubr.bf16.gmra.mrb[184].mxu1 %v10882_v18 }
 0x2bd   : > { %6075 = vmatprep.mubr.bf16.mxu1 %v4737_v7  ;;  %v4785_v7 = vld [vmem:[#allocation3 + $0x172] sm:$0xff] }
 0x2be   : > { %v10907_v21 = vpack.c.bf16 %v4785_v7, %v4784_v31 }
 0x2c3   : > { %6221 = vmatmul.mubr.bf16.gmra.mrb[212].mxu0 %v10889_v32 }
 0x2c4   : > { %6228 = vmatprep.mubr.bf16.mxu0 %v10892_v2  ;;  %6076 = vmatmul.mubr.bf16.gmra.mrb[188].mxu1 %v10892_v2 }
 0x2c5   : > { %6277 = vmatprep.mubr.bf16.mxu1 %v10676_v6  ;;  %v8800_v6 = vld [vmem:[#allocation4 + $0x210] sm:$0xff]  }
 0x2cb   : > { %6229 = vmatmul.mubr.bf16.gmra.mrb[216].mxu0 %v10899_v35 }
 0x2cc   : > { %6236 = vmatprep.mubr.bf16.mxu0 %v10902_v56  ;;  %6278 = vmatmul.mubr.bf16.vlgmr.msra.gmra.mrb[192].mxu1 %v4914_v0 }
 0x2cd   : > { %6285 = vmatprep.mubr.bf16.mxu1 %v10703_v54  ;;  %8511 = vmatpush3.bf16.msra.mxu1 %v10637_v12  ;;  %v8802_v54 = vld [vmem:[#allocation4 + $0x220] sm:$0xff]   ;;  %v4916_v12 = vpack.c.bf16 %v4887_v40, %v5077_v41 }
 0x2ce   : > { %8512 = vmatprep.subr.bf16.mxu1 %v8799_v55 }
 0x2d1   : > { %8513 = vmatpush3.bf16.msra.mxu1 %v8799_v55 }
 0x2d2   : > { %8514 = vmatprep.subr.bf16.mxu1 %v8800_v6 }
 0x2d3   : > { %6237 = vmatmul.mubr.bf16.gmra.mrb[220].mxu0 %v10907_v21 }
 0x2d4   : > { %6438 = vmatprep.mubr.bf16.mxu0 %v5107_v62  ;;  %6286 = vmatmul.mubr.bf16.gmra.mrb[196].mxu1 %v5107_v62 }
 0x2d5   : > { %6293 = vmatprep.mubr.bf16.mxu1 %v10733_v48  ;;  %8515 = vmatpush3.bf16.msra.mxu1 %v8800_v6 }
 0x2d6   : > { %8516 = vmatprep.subr.bf16.mxu1 %v8801_v37 }
 0x2d9   : > { %8517 = vmatpush3.bf16.msra.mxu1 %v8801_v37 }
 0x2da   : > { %8518 = vmatprep.subr.bf16.mxu1 %v8802_v54 }
 0x2db   : > { %6439 = vmatmul.mubr.bf16.vlgmr.msra.gmra.mrb[224].mxu0 %v10653_v27  ;;  %v5081_v27 = vld [vmem:[#allocation3 + $0x79] sm:$0xff] }
 0x2dc   : > { %6446 = vmatprep.mubr.bf16.mxu0 %v5108_v49  ;;  %6294 = vmatmul.mubr.bf16.gmra.mrb[200].mxu1 %v4916_v12  ;;  %v5110_v20 = vpack.c.bf16 %v10668_v34, %v5081_v27  ;;  %v5112_v34 = vpack.c.bf16 %v10695_v60, %v5085_v15  ;;  %v5092_v60 = vld [vmem:[#allocation3 + $0xf9] sm:$0xff] }
 0x2dd   : > { %6301 = vmatprep.mubr.bf16.mxu1 %v10763_v26  ;;  %8519 = vmatpush3.bf16.msra.mxu1 %v8802_v54  ;;  %v5083_v26 = vld [vmem:[#allocation3 + $0x91] sm:$0xff] }
 0x2de   : > { %8520 = vmatprep.subr.bf16.mxu1 %v8803_v1  ;;  %v5102_v54 = vld [vmem:[#allocation3 + $0x171] sm:$0xff] }
 0x2e1   : > { %8521 = vmatpush3.bf16.msra.mxu1 %v8803_v1 }
 0x2e2   : > { %8522 = vmatprep.subr.bf16.mxu1 %v8804_v63 }
 0x2e3   : > { %6447 = vmatmul.mubr.bf16.gmra.mrb[228].mxu0 %v10679_v19  ;;  %v5084_v19 = vld [vmem:[#allocation3 + $0x99] sm:$0xff] }
 0x2e4   : > { %6454 = vmatprep.mubr.bf16.mxu0 %v5109_v4  ;;  %6302 = vmatmul.mubr.bf16.gmra.mrb[204].mxu1 %v5109_v4  ;;  %v5111_v44 = vpack.c.bf16 %v5084_v19, %v5083_v26  ;;  %v5101_v4 = vld [vmem:[#allocation3 + $0x169] sm:$0xff] }
 0x2e5   : > { %6309 = vmatprep.mubr.bf16.mxu1 %v10793_v3  ;;  %8523 = vmatpush3.bf16.msra.mxu1 %v8804_v63  ;;  %v5087_v3 = vld [vmem:[#allocation3 + $0xc1] sm:$0xff]  ;;  %v4977_v26 = vld [vmem:[#allocation3 + $0x18a] sm:$0xff] }
 0x2e6   : > { %8524 = vmatprep.subr.bf16.mxu1 %v8805_v58  ;;  %v4976_v19 = vld [vmem:[#allocation3 + $0x182] sm:$0xff] }
 0x2e9   : > { %8525 = vmatpush3.bf16.msra.mxu1 %v8805_v58 }
 0x2eb   : > { %6455 = vmatmul.mubr.bf16.gmra.mrb[232].mxu0 %v10706_v43  ;;  %v5088_v43 = vld [vmem:[#allocation3 + $0xc9] sm:$0xff] }
 0x2ec   : > { %6462 = vmatprep.mubr.bf16.mxu0 %v5110_v20  ;;  %6310 = vmatmul.mubr.bf16.gmra.mrb[208].mxu1 %v5110_v20  ;;  %v5113_v14 = vpack.c.bf16 %v5088_v43, %v5087_v3  ;;  %v5104_v43 = vld [vmem:[#allocation3 + $0x189] sm:$0xff] }
 0x2ed   : > { %6317 = vmatprep.mubr.bf16.mxu1 %v10815_v11 }
 0x2f3   : > { %6463 = vmatmul.mubr.bf16.gmra.mrb[236].mxu0 %v10736_v17  ;;  %v5089_v17 = vld [vmem:[#allocation3 + $0xd9] sm:$0xff] }
 0x2f4   : > { %6470 = vmatprep.mubr.bf16.mxu0 %v5111_v44  ;;  %6318 = vmatmul.mubr.bf16.gmra.mrb[212].mxu1 %v5111_v44  ;;  %v5114_v11 = vpack.c.bf16 %v10725_v38, %v5089_v17  ;;  %v5096_v38 = vld [vmem:[#allocation3 + $0x129] sm:$0xff] }
 0x2f5   : > { %6325 = vmatprep.mubr.bf16.mxu1 %v10825_v9 }
 0x2fb   : > { %6471 = vmatmul.mubr.bf16.gmra.mrb[240].mxu0 %v10766_v10  ;;  %v5091_v10 = vld [vmem:[#allocation3 + $0xf1] sm:$0xff] }
 0x2fc   : > { %6478 = vmatprep.mubr.bf16.mxu0 %v5112_v34  ;;  %6326 = vmatmul.mubr.bf16.gmra.mrb[216].mxu1 %v5112_v34  ;;  %v5115_v9 = vpack.c.bf16 %v5092_v60, %v5091_v10 }
 0x2fd   : > { %6333 = vmatprep.mubr.bf16.mxu1 %v10835_v50 }
 0x303   : > { %6479 = vmatmul.mubr.bf16.gmra.mrb[244].mxu0 %v10796_v22  ;;  %v5093_v22 = vld [vmem:[#allocation3 + $0x109] sm:$0xff] }
 0x304   : > { %6486 = vmatprep.mubr.bf16.mxu0 %v5113_v14  ;;  %6334 = vmatmul.mubr.bf16.gmra.mrb[220].mxu1 %v5113_v14  ;;  %v5116_v50 = vpack.c.bf16 %v10755_v28, %v5093_v22 }
 0x305   : > { %6341 = vmatprep.mubr.bf16.mxu1 %v10845_v24 }
 0x30b   : > { %6487 = vmatmul.mubr.bf16.gmra.mrb[248].mxu0 %v10818_v42  ;;  %v5095_v42 = vld [vmem:[#allocation3 + $0x121] sm:$0xff] }
 0x30c   : > { %6494 = vmatprep.mubr.bf16.mxu0 %v5114_v11  ;;  %6342 = vmatmul.mubr.bf16.gmra.mrb[224].mxu1 %v5114_v11  ;;  %v5117_v24 = vpack.c.bf16 %v5096_v38, %v5095_v42  ;;  %v5105_v42 = vld [vmem:[#allocation3 + $0x199] sm:$0xff] }
 0x30d   : > { %6349 = vmatprep.mubr.bf16.mxu1 %v10855_v52 }
 0x313   : > { %6495 = vmatmul.mubr.bf16.gmra.mrb[252].mxu0 %v10828_v45  ;;  %v5097_v45 = vld [vmem:[#allocation3 + $0x139] sm:$0xff] }
 0x314   : > { %6502 = vmatprep.mubr.bf16.mxu0 %v5115_v9  ;;  %6350 = vmatmul.mubr.bf16.gmra.mrb[228].mxu1 %v5115_v9  ;;  %v5118_v52 = vpack.c.bf16 %v10785_v47, %v5097_v45  ;;  %v5099_v47 = vld [vmem:[#allocation3 + $0x151] sm:$0xff] }
 0x315   : > { %6357 = vmatprep.mubr.bf16.mxu1 %v10865_v13 }
 0x31b   : > { %6503 = vmatmul.mubr.bf16.gmra.mrb[0].mxu0 %v10838_v23  ;;  %v4907_v23 = vld [vmem:[#allocation3 + $0x141] sm:$0xff] }
 0x31c   : > { %6510 = vmatprep.mubr.bf16.mxu0 %v5116_v50  ;;  %6358 = vmatmul.mubr.bf16.gmra.mrb[232].mxu1 %v5116_v50  ;;  %v4926_v61 = vpack.c.bf16 %v4907_v23, %v5097_v45  ;;  %v5140_v23 = vld [vmem:[#allocation3 + $0x3a] sm:$0xff] }
 0x31d   : > { %6365 = vmatprep.mubr.bf16.mxu1 %v10879_v5 }
 0x323   : > { %6511 = vmatmul.mubr.bf16.gmra.mrb[4].mxu0 %v10848_v25  ;;  %v5100_v25 = vld [vmem:[#allocation3 + $0x159] sm:$0xff] }
 0x324   : > { %6518 = vmatprep.mubr.bf16.mxu0 %v5117_v24  ;;  %6366 = vmatmul.mubr.bf16.gmra.mrb[236].mxu1 %v5117_v24  ;;  %v5119_v8 = vpack.c.bf16 %v5100_v25, %v5099_v47  ;;  %v5106_v24 = vld [vmem:[#allocation3 + $0x1a1] sm:$0xff]  ;;  %v5041_v47 = vld [vmem:[#allocation3 + $0x198] sm:$0xff] }
 0x325   : > { %6373 = vmatprep.mubr.bf16.mxu1 %v10889_v32  ;;  %v8012_v28 = vpop.f32.mrb[132].mxu1 }
 0x326   : > { %v8118_v13 = vpop.f32.mrb[160].mxu0  ;;  %v8013_v51 = vpop.f32.mrb[133].mxu1 }
 0x327   : > { %v8014_v46 = vadd.f32 %v8013_v51, %v8012_v28  ;;  %v8119_v16 = vpop.f32.mrb[161].mxu0  ;;  %v8015_v59 = vpop.f32.mrb[134].mxu1  ;;  %v5139_v28 = vld [vmem:[#allocation3 + $0x32] sm:$0xff] }
 0x328   : > { %v8120_v31 = vadd.f32 %v8119_v16, %v8118_v13  ;;  %v8121_v5 = vpop.f32.mrb[162].mxu0  ;;  %v8016_v7 = vpop.f32.mrb[135].mxu1 }
 0x329   : > { %v8017_v29 = vadd.f32 %v8016_v7, %v8015_v59  ;;  %v8122_v0 = vpop.f32.mrb[163].mxu0  ;;  %v5171_v7 = vpack.c.bf16 %v5140_v23, %v5139_v28  ;;  %v5150_v28 = vld [vmem:[#allocation3 + $0xb2] sm:$0xff] }
 0x32a   : > { %v8123_v32 = vadd.f32 %v8122_v0, %v8121_v5 }
 0x32b   : > { %6519 = vmatmul.mubr.bf16.gmra.mrb[8].mxu0 %v10858_v33  ;;  %v10941_v33 = vadd.f32 %v8120_v31, %v10867_v36  ;;  %v5122_v31 = vpack.c.bf16 %v5106_v24, %v5105_v42 }
 0x32c   : > { %6526 = vmatprep.mubr.bf16.mxu0 %v5118_v52  ;;  %6374 = vmatmul.mubr.bf16.gmra.mrb[240].mxu1 %v4926_v61  ;;  %v10946_v55 = vadd.f32 %v8123_v32, %v10876_v30  ;;  %v5120_v30 = vpack.c.bf16 %v5102_v54, %v5101_v4  ;;  %v8806_v54 = vld [vmem:[#allocation3 + $0x8] sm:$0xff] }
 0x32d   : > { %6381 = vmatprep.mubr.bf16.mxu1 %v10899_v35  ;;  %v8018_v62 = vpop.f32.mrb[136].mxu1 }
 0x32e   : > { %v8124_v6 = vpop.f32.mrb[164].mxu0  ;;  %v8019_v41 = vpop.f32.mrb[137].mxu1 }
 0x32f   : > { %v8020_v37 = vadd.f32 %v8019_v41, %v8018_v62  ;;  %v8125_v49 = vpop.f32.mrb[165].mxu0  ;;  %v8021_v40 = vpop.f32.mrb[138].mxu1  ;;  %v5144_v41 = vld [vmem:[#allocation3 + $0x6a] sm:$0xff] }
 0x330   : > { %v8126_v36 = vadd.f32 %v8125_v49, %v8124_v6  ;;  %v8127_v53 = vpop.f32.mrb[166].mxu0  ;;  %v8022_v12 = vpop.f32.mrb[139].mxu1  ;;  %v5143_v6 = vld [vmem:[#allocation3 + $0x62] sm:$0xff] }
 0x331   : > { %v8023_v57 = vadd.f32 %v8022_v12, %v8021_v40  ;;  %v8128_v1 = vpop.f32.mrb[167].mxu0  ;;  %v5173_v4 = vpack.c.bf16 %v5144_v41, %v5143_v6 }
 0x332   : > { %v8129_v35 = vadd.f32 %v8128_v1, %v8127_v53 }
 0x333   : > { %6527 = vmatmul.mubr.bf16.gmra.mrb[12].mxu0 %v10870_v39  ;;  %v10948_v39 = vadd.f32 %v8126_v36, %v8014_v46  ;;  %v5058_v36 = vpack.c.bf16 %v8806_v54, %v5041_v47 }
 0x334   : > { %6534 = vmatprep.mubr.bf16.mxu0 %v5119_v8  ;;  %6382 = vmatmul.mubr.bf16.gmra.mrb[244].mxu1 %v5119_v8  ;;  %v10952_v63 = vadd.f32 %v8129_v35, %v8017_v29 }
 0x335   : > { %6389 = vmatprep.mubr.bf16.mxu1 %v10907_v21  ;;  %v8024_v27 = vpop.f32.mrb[140].mxu1  ;;  %v5103_v21 = vld [vmem:[#allocation3 + $0x181] sm:$0xff] }
 0x336   : > { %v8130_v58 = vpop.f32.mrb[168].mxu0  ;;  %v8025_v20 = vpop.f32.mrb[141].mxu1  ;;  %v5121_v22 = vpack.c.bf16 %v5104_v43, %v5103_v21 }
 0x337   : > { %v8026_v44 = vadd.f32 %v8025_v20, %v8024_v27  ;;  %v8131_v15 = vpop.f32.mrb[169].mxu0  ;;  %v8027_v34 = vpop.f32.mrb[142].mxu1  ;;  %v5145_v20 = vld [vmem:[#allocation3 + $0x7a] sm:$0xff] }
 0x338   : > { %v8132_v3 = vadd.f32 %v8131_v15, %v8130_v58  ;;  %v8133_v14 = vpop.f32.mrb[170].mxu0  ;;  %v8028_v17 = vpop.f32.mrb[143].mxu1  ;;  %v5147_v15 = vld [vmem:[#allocation3 + $0x92] sm:$0xff] }
 0x339   : > { %v8029_v11 = vadd.f32 %v8028_v17, %v8027_v34  ;;  %v8134_v60 = vpop.f32.mrb[171].mxu0  ;;  %v5148_v34 = vld [vmem:[#allocation3 + $0x9a] sm:$0xff] }
 0x33a   : > { %v10956_v10 = vadd.f32 %v8132_v3, %v8020_v37  ;;  %v8135_v9 = vadd.f32 %v8134_v60, %v8133_v14 }
 0x33b   : > { %6535 = vmatmul.mubr.bf16.gmra.mrb[16].mxu0 %v10882_v18  ;;  %v10954_v18 = vpack.c.bf16 %v4977_v26, %v4976_v19  ;;  %v5146_v19 = vld [vmem:[#allocation3 + $0x82] sm:$0xff] }
 0x33c   : > { %6542 = vmatprep.mubr.bf16.mxu0 %v5120_v30  ;;  %6390 = vmatmul.mubr.bf16.gmra.mrb[248].mxu1 %v5120_v30  ;;  %v10960_v50 = vadd.f32 %v8135_v9, %v8023_v57  ;;  %v5174_v21 = vpack.c.bf16 %v5146_v19, %v5145_v20 }
 0x33d   : > { %6397 = vmatprep.mubr.bf16.mxu1 %v10954_v18  ;;  %v8030_v38 = vpop.f32.mrb[144].mxu1 }
 0x33e   : > { %v8136_v45 = vpop.f32.mrb[172].mxu0  ;;  %v8031_v52 = vpop.f32.mrb[145].mxu1 }
 0x33f   : > { %v8032_v13 = vadd.f32 %v8031_v52, %v8030_v38  ;;  %v8137_v51 = vpop.f32.mrb[173].mxu0  ;;  %v8033_v46 = vpop.f32.mrb[146].mxu1  ;;  %v5149_v52 = vld [vmem:[#allocation3 + $0xaa] sm:$0xff] }
 0x340   : > { %v8138_v16 = vadd.f32 %v8137_v51, %v8136_v45  ;;  %v8139_v59 = vpop.f32.mrb[174].mxu0  ;;  %v8034_v25 = vpop.f32.mrb[147].mxu1  ;;  %v5151_v51 = vld [vmem:[#allocation3 + $0xc2] sm:$0xff] }
 0x341   : > { %v8140_v5 = vpop.f32.mrb[175].mxu0 }
 0x342   : > { %v10962_v61 = vadd.f32 %v8138_v16, %v8026_v44  ;;  %v8141_v29 = vadd.f32 %v8140_v5, %v8139_v59 }
 0x343   : > { %6543 = vmatmul.mubr.bf16.gmra.mrb[20].mxu0 %v10892_v2  ;;  %v8035_v2 = vadd.f32 %v8034_v25, %v8033_v46  ;;  %v5152_v46 = vld [vmem:[#allocation3 + $0xca] sm:$0xff] }
 0x344   : > { %6550 = vmatprep.mubr.bf16.mxu0 %v5121_v22  ;;  %6398 = vmatmul.mubr.bf16.gmra.mrb[252].mxu1 %v5121_v22  ;;  %v10965_v0 = vadd.f32 %v8141_v29, %v8029_v11  ;;  %v5175_v22 = vpack.c.bf16 %v5148_v34, %v5147_v15 }
 0x345   : > { %8526 = vmatprep.mubr.bf16.mxu1 %v5171_v7  ;;  %v8036_v32 = vpop.f32.mrb[148].mxu1  ;;  %v5176_v7 = vpack.c.bf16 %v5150_v28, %v5149_v52 }
 0x346   : > { %v8037_v62 = vpop.f32.mrb[149].mxu1 }
 0x347   : > { %v8038_v37 = vadd.f32 %v8037_v62, %v8036_v32  ;;  %v8039_v40 = vpop.f32.mrb[150].mxu1  ;;  %v5177_v32 = vpack.c.bf16 %v5152_v46, %v5151_v51 }
 0x348   : > { %v8040_v57 = vpop.f32.mrb[151].mxu1 }
 0x349   : > { %v8041_v1 = vadd.f32 %v8040_v57, %v8039_v40 }
 0x34b   : > { %6551 = vmatmul.mubr.bf16.gmra.mrb[24].mxu0 %v10902_v56 }
 0x34c   : > { %6558 = vmatprep.mubr.bf16.mxu0 %v5122_v31  ;;  %8527 = vmatmul.mubr.bf16.vlgmr.msra.gmra.mrb[0].mxu1 %v10733_v48 }
 0x34d   : > { %8530 = vmatprep.mubr.bf16.mxu1 %v5173_v4 }
 0x34e   : > { %v8142_v8 = vpop.f32.mrb[176].mxu0 }
 0x34f   : > { %v8143_v49 = vpop.f32.mrb[177].mxu0  ;;  %v8042_v58 = vpop.f32.mrb[152].mxu1 }
 0x350   : > { %v8144_v53 = vadd.f32 %v8143_v49, %v8142_v8  ;;  %v8145_v12 = vpop.f32.mrb[178].mxu0  ;;  %v8043_v44 = vpop.f32.mrb[153].mxu1  ;;  %v5154_v49 = vld [vmem:[#allocation3 + $0xe2] sm:$0xff] }
 0x351   : > { %v8146_v56 = vpop.f32.mrb[179].mxu0  ;;  %v8044_v43 = vadd.f32 %v8043_v44, %v8042_v58  ;;  %v8045_v14 = vpop.f32.mrb[154].mxu1 }
 0x352   : > { %v10967_v35 = vadd.f32 %v8144_v53, %v8032_v13  ;;  %v8147_v30 = vadd.f32 %v8146_v56, %v8145_v12  ;;  %v8046_v60 = vpop.f32.mrb[155].mxu1  ;;  %v5156_v53 = vld [vmem:[#allocation3 + $0xfa] sm:$0xff] }
 0x353   : > { %6559 = vmatmul.mubr.bf16.gmra.mrb[28].mxu0 %v5058_v36  ;;  %v8047_v9 = vadd.f32 %v8046_v60, %v8045_v14  ;;  %v5155_v36 = vld [vmem:[#allocation3 + $0xf2] sm:$0xff]  ;;  %v5159_v60 = vld [vmem:[#allocation3 + $0x122] sm:$0xff] }
 0x354   : > { %v10970_v27 = vadd.f32 %v8147_v30, %v8035_v2  ;;  %8531 = vmatmul.mubr.bf16.gmra.mrb[4].mxu1 %v5174_v21  ;;  %v5158_v14 = vld [vmem:[#allocation3 + $0x112] sm:$0xff]  ;;  %v5160_v21 = vld [vmem:[#allocation3 + $0x12a] sm:$0xff] }
 0x355   : > { %8534 = vmatprep.mubr.bf16.mxu1 %v5175_v22  ;;  %v5181_v51 = vpack.c.bf16 %v5160_v21, %v5159_v60 }
 0x356   : > { %v8148_v26 = vpop.f32.mrb[180].mxu0 }
 0x357   : > { %v8149_v3 = vpop.f32.mrb[181].mxu0  ;;  %v8048_v45 = vpop.f32.mrb[156].mxu1 }
 0x358   : > { %v8150_v17 = vadd.f32 %v8149_v3, %v8148_v26  ;;  %v8151_v11 = vpop.f32.mrb[182].mxu0  ;;  %v8049_v13 = vpop.f32.mrb[157].mxu1  ;;  %v5179_v26 = vpack.c.bf16 %v5156_v53, %v5155_v36  ;;  %v5157_v3 = vld [vmem:[#allocation3 + $0x10a] sm:$0xff] }
 0x359   : > { %v8152_v48 = vpop.f32.mrb[183].mxu0  ;;  %v8050_v16 = vadd.f32 %v8049_v13, %v8048_v45  ;;  %v8051_v25 = vpop.f32.mrb[158].mxu1  ;;  %v5180_v28 = vpack.c.bf16 %v5158_v14, %v5157_v3 }
 0x35a   : > { %v10972_v38 = vadd.f32 %v8150_v17, %v8038_v37  ;;  %v8153_v42 = vadd.f32 %v8152_v48, %v8151_v11  ;;  %v8052_v5 = vpop.f32.mrb[159].mxu1  ;;  %v5153_v37 = vld [vmem:[#allocation3 + $0xda] sm:$0xff] }
 0x35b   : > { %v8053_v29 = vadd.f32 %v8052_v5, %v8051_v25  ;;  %v5178_v58 = vpack.c.bf16 %v5154_v49, %v5153_v37 }
 0x35c   : > { %v10974_v24 = vadd.f32 %v8153_v42, %v8041_v1  ;;  %8535 = vmatmul.mubr.bf16.gmra.mrb[8].mxu1 %v5176_v7 }
 0x35d   : > { %8538 = vmatprep.mubr.bf16.mxu1 %v5177_v32 }
 0x35e   : > { %v8154_v23 = vpop.f32.mrb[184].mxu0 }
 0x35f   : > { %v8155_v59 = vpop.f32.mrb[185].mxu0  ;;  %v8054_v41 = vpop.f32.mrb[160].mxu1 }
 0x360   : > { %v8156_v31 = vadd.f32 %v8155_v59, %v8154_v23  ;;  %v8157_v2 = vpop.f32.mrb[186].mxu0  ;;  %v8055_v54 = vpop.f32.mrb[161].mxu1 }
 0x361   : > { %v8158_v47 = vpop.f32.mrb[187].mxu0  ;;  %v8056_v12 = vadd.f32 %v8055_v54, %v8054_v41  ;;  %v8057_v1 = vpop.f32.mrb[162].mxu1 }
 0x362   : > { %v10976_v8 = vadd.f32 %v8156_v31, %v8044_v43  ;;  %v8159_v62 = vadd.f32 %v8158_v47, %v8157_v2  ;;  %v8058_v30 = vpop.f32.mrb[163].mxu1  ;;  %v5161_v31 = vld [vmem:[#allocation3 + $0x13a] sm:$0xff]  ;;  %v5162_v2 = vld [vmem:[#allocation3 + $0x142] sm:$0xff] }
 0x363   : > { %v8059_v20 = vadd.f32 %v8058_v30, %v8057_v1  ;;  %v5164_v47 = vld [vmem:[#allocation3 + $0x15a] sm:$0xff]  ;;  %v5182_v54 = vpack.c.bf16 %v5162_v2, %v5161_v31  ;;  %v5165_v30 = vld [vmem:[#allocation3 + $0x16a] sm:$0xff] }
 0x364   : > { %v10978_v6 = vadd.f32 %v8159_v62, %v8047_v9  ;;  %8539 = vmatmul.mubr.bf16.gmra.mrb[12].mxu1 %v5178_v58  ;;  %v5166_v58 = vld [vmem:[#allocation3 + $0x172] sm:$0xff] }
 0x365   : > { %8542 = vmatprep.mubr.bf16.mxu1 %v5179_v26 }
 0x366   : > { %v8160_v40 = vpop.f32.mrb[188].mxu0 }
 0x367   : > { %v8161_v57 = vpop.f32.mrb[189].mxu0  ;;  %v8060_v43 = vpop.f32.mrb[164].mxu1 }
 0x368   : > { %v8162_v56 = vadd.f32 %v8161_v57, %v8160_v40  ;;  %v8163_v4 = vpop.f32.mrb[190].mxu0  ;;  %v8061_v11 = vpop.f32.mrb[165].mxu1 }
 0x369   : > { %v8164_v19 = vpop.f32.mrb[191].mxu0  ;;  %v8062_v9 = vadd.f32 %v8061_v11, %v8060_v43  ;;  %v8063_v22 = vpop.f32.mrb[166].mxu1  ;;  %v5184_v11 = vpack.c.bf16 %v5166_v58, %v5165_v30 }
 0x36a   : > { %v10980_v44 = vadd.f32 %v8162_v56, %v8050_v16  ;;  %v8165_v15 = vadd.f32 %v8164_v19, %v8163_v4  ;;  %v8064_v52 = vpop.f32.mrb[167].mxu1 }
 0x36b   : > { %v8065_v23 = vadd.f32 %v8064_v52, %v8063_v22  ;;  %v5169_v22 = vld [vmem:[#allocation3 + $0x19a] sm:$0xff] }
 0x36c   : > { %v10982_v34 = vadd.f32 %v8165_v15, %v8053_v29  ;;  %8543 = vmatmul.mubr.bf16.gmra.mrb[16].mxu1 %v5180_v28  ;;  %v5163_v29 = vld [vmem:[#allocation3 + $0x152] sm:$0xff] }
 0x36d   : > { %8546 = vmatprep.mubr.bf16.mxu1 %v5181_v51 }
 0x36e   : > { %v8166_v17 = vpop.f32.mrb[192].mxu0 }
 0x36f   : > { %v8167_v48 = vpop.f32.mrb[193].mxu0  ;;  %v8066_v25 = vpop.f32.mrb[168].mxu1 }
 0x370   : > { %v8168_v42 = vadd.f32 %v8167_v48, %v8166_v17  ;;  %v8169_v45 = vpop.f32.mrb[194].mxu0  ;;  %v8067_v7 = vpop.f32.mrb[169].mxu1 }
 0x371   : > { %v8170_v13 = vpop.f32.mrb[195].mxu0  ;;  %v8068_v32 = vadd.f32 %v8067_v7, %v8066_v25  ;;  %v8069_v41 = vpop.f32.mrb[170].mxu1 }
 0x372   : > { %v10984_v46 = vadd.f32 %v8168_v42, %v8056_v12  ;;  %v8171_v16 = vadd.f32 %v8170_v13, %v8169_v45  ;;  %v8070_v40 = vpop.f32.mrb[171].mxu1  ;;  %v5183_v12 = vpack.c.bf16 %v5164_v47, %v5163_v29  ;;  %v5170_v42 = vld [vmem:[#allocation3 + $0x1a2] sm:$0xff] }
 0x373   : > { %v8071_v36 = vadd.f32 %v8070_v40, %v8069_v41  ;;  %v5186_v13 = vpack.c.bf16 %v5170_v42, %v5169_v22 }
 0x374   : > { %v10986_v59 = vadd.f32 %v8171_v16, %v8059_v20  ;;  %8547 = vmatmul.mubr.bf16.gmra.mrb[20].mxu1 %v5182_v54 }
 0x375   : > { %8550 = vmatprep.mubr.bf16.mxu1 %v5183_v12 }
 0x376   : > { %v8172_v5 = vpop.f32.mrb[196].mxu0 }
 0x377   : > { %v8173_v62 = vpop.f32.mrb[197].mxu0  ;;  %v8072_v4 = vpop.f32.mrb[172].mxu1 }
 0x378   : > { %v8174_v37 = vadd.f32 %v8173_v62, %v8172_v5  ;;  %v8175_v49 = vpop.f32.mrb[198].mxu0  ;;  %v8073_v19 = vpop.f32.mrb[173].mxu1 }
 0x379   : > { %v8176_v53 = vpop.f32.mrb[199].mxu0  ;;  %v8074_v26 = vadd.f32 %v8073_v19, %v8072_v4  ;;  %v8075_v43 = vpop.f32.mrb[174].mxu1 }
 0x37a   : > { %v10988_v57 = vadd.f32 %v8174_v37, %v8062_v9  ;;  %v8177_v1 = vadd.f32 %v8176_v53, %v8175_v49  ;;  %v8076_v17 = vpop.f32.mrb[175].mxu1 }
 0x37b   : > { %v8077_v60 = vadd.f32 %v8076_v17, %v8075_v43 }
 0x37c   : > { %v10990_v56 = vadd.f32 %v8177_v1, %v8065_v23  ;;  %8551 = vmatmul.mubr.bf16.gmra.mrb[24].mxu1 %v5184_v11 }
 0x37d   : > { %8554 = vmatprep.mubr.bf16.mxu1 %v10954_v18 }
 0x37e   : > { %v8178_v20 = vpop.f32.mrb[200].mxu0 }
 0x37f   : > { %v8179_v15 = vpop.f32.mrb[201].mxu0  ;;  %v8078_v52 = vpop.f32.mrb[176].mxu1 }
 0x380   : > { %v8180_v3 = vadd.f32 %v8179_v15, %v8178_v20  ;;  %v8181_v14 = vpop.f32.mrb[202].mxu0  ;;  %v8079_v23 = vpop.f32.mrb[177].mxu1 }
 0x381   : > { %v8182_v21 = vpop.f32.mrb[203].mxu0  ;;  %v8080_v51 = vadd.f32 %v8079_v23, %v8078_v52  ;;  %v8081_v25 = vpop.f32.mrb[178].mxu1 }
 0x382   : > { %v10992_v9 = vadd.f32 %v8180_v3, %v8068_v32  ;;  %v8183_v48 = vadd.f32 %v8182_v21, %v8181_v14  ;;  %v8082_v5 = vpop.f32.mrb[179].mxu1 }
 0x383   : > { %v8083_v7 = vadd.f32 %v8082_v5, %v8081_v25 }
 0x384   : > { %v10995_v45 = vadd.f32 %v8183_v48, %v8071_v36  ;;  %8555 = vmatmul.mubr.bf16.gmra.mrb[28].mxu1 %v5186_v13 }
 0x386   : > { %v8184_v28 = vpop.f32.mrb[204].mxu0 }
 0x387   : > { %v8185_v16 = vpop.f32.mrb[205].mxu0  ;;  %v8084_v62 = vpop.f32.mrb[180].mxu1 }
 0x388   : > { %v8186_v31 = vadd.f32 %v8185_v16, %v8184_v28  ;;  %v8187_v2 = vpop.f32.mrb[206].mxu0  ;;  %v8085_v37 = vpop.f32.mrb[181].mxu1 }
 0x389   : > { %v8188_v29 = vpop.f32.mrb[207].mxu0  ;;  %v8086_v49 = vadd.f32 %v8085_v37, %v8084_v62  ;;  %v8087_v54 = vpop.f32.mrb[182].mxu1 }
 0x38a   : > { %v10997_v47 = vadd.f32 %v8186_v31, %v8074_v26  ;;  %v8189_v32 = vadd.f32 %v8188_v29, %v8187_v2  ;;  %v8088_v12 = vpop.f32.mrb[183].mxu1 }
 0x38b   : > { %v8089_v1 = vadd.f32 %v8088_v12, %v8087_v54 }
 0x38c   : > { %v10999_v18 = vadd.f32 %v8189_v32, %v8077_v60 }
 0x38e   : > { %v8190_v41 = vpop.f32.mrb[208].mxu0 }
 0x38f   : > { %v8191_v40 = vpop.f32.mrb[209].mxu0  ;;  %v8090_v19 = vpop.f32.mrb[184].mxu1 }
 0x390   : > { %v8192_v36 = vadd.f32 %v8191_v40, %v8190_v41  ;;  %v8193_v53 = vpop.f32.mrb[210].mxu0  ;;  %v8091_v15 = vpop.f32.mrb[185].mxu1 }
 0x391   : > { %v8194_v4 = vpop.f32.mrb[211].mxu0  ;;  %v8092_v43 = vadd.f32 %v8091_v15, %v8090_v19  ;;  %v8093_v14 = vpop.f32.mrb[186].mxu1 }
 0x392   : > { %v11001_v30 = vadd.f32 %v8192_v36, %v8080_v51  ;;  %v8195_v58 = vadd.f32 %v8194_v4, %v8193_v53  ;;  %v8094_v60 = vpop.f32.mrb[187].mxu1 }
 0x393   : > { %v8095_v21 = vadd.f32 %v8094_v60, %v8093_v14 }
 0x394   : > { %v11003_v20 = vadd.f32 %v8195_v58, %v8083_v7 }
 0x396   : > { %v8196_v26 = vpop.f32.mrb[212].mxu0 }
 0x397   : > { %v8197_v3 = vpop.f32.mrb[213].mxu0  ;;  %v8096_v28 = vpop.f32.mrb[188].mxu1 }
 0x398   : > { %v8198_v17 = vadd.f32 %v8197_v3, %v8196_v26  ;;  %v8199_v11 = vpop.f32.mrb[214].mxu0  ;;  %v8097_v13 = vpop.f32.mrb[189].mxu1 }
 0x399   : > { %v8200_v48 = vpop.f32.mrb[215].mxu0  ;;  %v8098_v51 = vadd.f32 %v8097_v13, %v8096_v28  ;;  %v8099_v25 = vpop.f32.mrb[190].mxu1 }
 0x39a   : > { %v11005_v22 = vadd.f32 %v8198_v17, %v8086_v49  ;;  %v8201_v42 = vadd.f32 %v8200_v48, %v8199_v11  ;;  %v8100_v5 = vpop.f32.mrb[191].mxu1 }
 0x39b   : > { %v8101_v7 = vadd.f32 %v8100_v5, %v8099_v25 }
 0x39c   : > { %v11007_v52 = vadd.f32 %v8201_v42, %v8089_v1 }
 0x39e   : > { %v8202_v23 = vpop.f32.mrb[216].mxu0 }
 0x39f   : > { %v8203_v16 = vpop.f32.mrb[217].mxu0  ;;  %v8230_v37 = vpop.f32.mrb[192].mxu1 }
 0x3a0   : > { %v8204_v31 = vadd.f32 %v8203_v16, %v8202_v23  ;;  %v8205_v2 = vpop.f32.mrb[218].mxu0  ;;  %v8231_v40 = vpop.f32.mrb[193].mxu1 }
 0x3a1   : > { %v8206_v29 = vpop.f32.mrb[219].mxu0  ;;  %v8232_v36 = vadd.f32 %v8231_v40, %v8230_v37  ;;  %v8233_v53 = vpop.f32.mrb[194].mxu1 }
 0x3a2   : > { %v11009_v32 = vadd.f32 %v8204_v31, %v8092_v43  ;;  %v8207_v62 = vadd.f32 %v8206_v29, %v8205_v2  ;;  %v8234_v4 = vpop.f32.mrb[195].mxu1 }
 0x3a3   : > { %v6280_v58 = vadd.f32 %v8232_v36, %v10941_v33  ;;  %v8235_v26 = vadd.f32 %v8234_v4, %v8233_v53 }
 0x3a4   : > { %v11011_v41 = vadd.f32 %v8207_v62, %v8095_v21 }
 0x3a5   : > { %v6283_v3 = vadd.f32 %v8235_v26, %v10946_v55 }
 0x3a6   : > { %v8208_v49 = vpop.f32.mrb[220].mxu0 }
 0x3a7   : > { %v8209_v54 = vpop.f32.mrb[221].mxu0  ;;  %v8236_v17 = vpop.f32.mrb[196].mxu1 }
 0x3a8   : > { %v8210_v12 = vadd.f32 %v8209_v54, %v8208_v49  ;;  %v8211_v1 = vpop.f32.mrb[222].mxu0  ;;  %v8237_v60 = vpop.f32.mrb[197].mxu1 }
 0x3a9   : > { %v8212_v19 = vpop.f32.mrb[223].mxu0  ;;  %v8238_v21 = vadd.f32 %v8237_v60, %v8236_v17  ;;  %v8239_v42 = vpop.f32.mrb[198].mxu1 }
 0x3aa   : > { %v11014_v15 = vadd.f32 %v8210_v12, %v8098_v51  ;;  %v8213_v43 = vadd.f32 %v8212_v19, %v8211_v1  ;;  %v8240_v13 = vpop.f32.mrb[199].mxu1 }
 0x3ab   : > { %v6288_v33 = vadd.f32 %v8238_v21, %v10948_v39  ;;  %v8241_v16 = vadd.f32 %v8240_v13, %v8239_v42 }
 0x3ac   : > { %v11017_v14 = vadd.f32 %v8213_v43, %v8101_v7 }
 0x3ad   : > { %v6291_v55 = vadd.f32 %v8241_v16, %v10952_v63 }
 0x3ae   : > { %v8342_v11 = vpop.f32.mrb[224].mxu0 }
 0x3af   : > { %v8343_v48 = vpop.f32.mrb[225].mxu0  ;;  %v8242_v5 = vpop.f32.mrb[200].mxu1 }
 0x3b0   : > { %v8344_v28 = vadd.f32 %v8343_v48, %v8342_v11  ;;  %v8345_v23 = vpop.f32.mrb[226].mxu0  ;;  %v8243_v29 = vpop.f32.mrb[201].mxu1 }
 0x3b1   : > { %v8346_v25 = vpop.f32.mrb[227].mxu0  ;;  %v8244_v62 = vadd.f32 %v8243_v29, %v8242_v5  ;;  %v8245_v49 = vpop.f32.mrb[202].mxu1 }
 0x3b2   : > { %v8347_v51 = vadd.f32 %v8346_v25, %v8345_v23  ;;  %v11020_v31 = vadd.f32 %v8344_v28, %v6280_v58  ;;  %v8246_v36 = vpop.f32.mrb[203].mxu1 }
 0x3b3   : > { %v6296_v39 = vadd.f32 %v8244_v62, %v10956_v10  ;;  %v8247_v53 = vadd.f32 %v8246_v36, %v8245_v49 }
 0x3b4   : > { %v11023_v2 = vadd.f32 %v8347_v51, %v6283_v3 }
 0x3b5   : > { %v6299_v63 = vadd.f32 %v8247_v53, %v10960_v50 }
 0x3b6   : > { %v8348_v7 = vpop.f32.mrb[228].mxu0 }
 0x3b7   : > { %v8349_v37 = vpop.f32.mrb[229].mxu0  ;;  %v8248_v19 = vpop.f32.mrb[204].mxu1 }
 0x3b8   : > { %v8350_v40 = vadd.f32 %v8349_v37, %v8348_v7  ;;  %v8351_v54 = vpop.f32.mrb[230].mxu0  ;;  %v8249_v43 = vpop.f32.mrb[205].mxu1 }
 0x3b9   : > { %v8352_v12 = vpop.f32.mrb[231].mxu0  ;;  %v8250_v3 = vadd.f32 %v8249_v43, %v8248_v19  ;;  %v8251_v11 = vpop.f32.mrb[206].mxu1 }
 0x3ba   : > { %v8353_v1 = vadd.f32 %v8352_v12, %v8351_v54  ;;  %v11026_v4 = vadd.f32 %v8350_v40, %v6288_v33  ;;  %v8252_v48 = vpop.f32.mrb[207].mxu1 }
 0x3bb   : > { %v6304_v10 = vadd.f32 %v8250_v3, %v10962_v61  ;;  %v8253_v42 = vadd.f32 %v8252_v48, %v8251_v11 }
 0x3bc   : > { %v11029_v58 = vadd.f32 %v8353_v1, %v6291_v55 }
 0x3bd   : > { %v6307_v50 = vadd.f32 %v8253_v42, %v10965_v0 }
 0x3be   : > { %v8354_v26 = vpop.f32.mrb[232].mxu0 }
 0x3bf   : > { %v8355_v17 = vpop.f32.mrb[233].mxu0  ;;  %v8254_v16 = vpop.f32.mrb[208].mxu1 }
 0x3c0   : > { %v8356_v60 = vadd.f32 %v8355_v17, %v8354_v26  ;;  %v8357_v21 = vpop.f32.mrb[234].mxu0  ;;  %v8255_v51 = vpop.f32.mrb[209].mxu1 }
 0x3c1   : > { %v8358_v28 = vpop.f32.mrb[235].mxu0  ;;  %v8256_v55 = vadd.f32 %v8255_v51, %v8254_v16  ;;  %v8257_v7 = vpop.f32.mrb[210].mxu1 }
 0x3c2   : > { %v8359_v23 = vadd.f32 %v8358_v28, %v8357_v21  ;;  %v11032_v13 = vadd.f32 %v8356_v60, %v6296_v39  ;;  %v8258_v37 = vpop.f32.mrb[211].mxu1 }
 0x3c3   : > { %v6312_v61 = vadd.f32 %v8256_v55, %v10967_v35  ;;  %v8259_v49 = vadd.f32 %v8258_v37, %v8257_v7 }
 0x3c4   : > { %v11035_v33 = vadd.f32 %v8359_v23, %v6299_v63 }
 0x3c5   : > { %v6315_v0 = vadd.f32 %v8259_v49, %v10970_v27 }
 0x3c6   : > { %v8360_v25 = vpop.f32.mrb[236].mxu0 }
 0x3c7   : > { %v8361_v5 = vpop.f32.mrb[237].mxu0  ;;  %v8260_v53 = vpop.f32.mrb[212].mxu1 }
 0x3c8   : > { %v8362_v29 = vadd.f32 %v8361_v5, %v8360_v25  ;;  %v8363_v62 = vpop.f32.mrb[238].mxu0  ;;  %v8261_v1 = vpop.f32.mrb[213].mxu1 }
 0x3c9   : > { %v8364_v40 = vpop.f32.mrb[239].mxu0  ;;  %v8262_v63 = vadd.f32 %v8261_v1, %v8260_v53  ;;  %v8263_v26 = vpop.f32.mrb[214].mxu1 }
 0x3ca   : > { %v8365_v54 = vadd.f32 %v8364_v40, %v8363_v62  ;;  %v11038_v36 = vadd.f32 %v8362_v29, %v6304_v10  ;;  %v8264_v17 = vpop.f32.mrb[215].mxu1 }
 0x3cb   : > { %v6320_v35 = vadd.f32 %v8262_v63, %v10972_v38  ;;  %v8265_v11 = vadd.f32 %v8264_v17, %v8263_v26 }
 0x3cc   : > { %v11041_v39 = vadd.f32 %v8365_v54, %v6307_v50 }
 0x3cd   : > { %v6323_v27 = vadd.f32 %v8265_v11, %v10974_v24 }
 0x3ce   : > { %v8366_v12 = vpop.f32.mrb[240].mxu0 }
 0x3cf   : > { %v8367_v19 = vpop.f32.mrb[241].mxu0  ;;  %v8266_v42 = vpop.f32.mrb[216].mxu1 }
 0x3d0   : > { %v8368_v43 = vadd.f32 %v8367_v19, %v8366_v12  ;;  %v8369_v3 = vpop.f32.mrb[242].mxu0  ;;  %v8267_v23 = vpop.f32.mrb[217].mxu1 }
 0x3d1   : > { %v8370_v60 = vpop.f32.mrb[243].mxu0  ;;  %v8268_v50 = vadd.f32 %v8267_v23, %v8266_v42  ;;  %v8269_v25 = vpop.f32.mrb[218].mxu1 }
 0x3d2   : > { %v8371_v21 = vadd.f32 %v8370_v60, %v8369_v3  ;;  %v11044_v48 = vadd.f32 %v8368_v43, %v6312_v61  ;;  %v8270_v5 = vpop.f32.mrb[219].mxu1 }
 0x3d3   : > { %v6328_v38 = vadd.f32 %v8268_v50, %v10976_v8  ;;  %v8271_v7 = vadd.f32 %v8270_v5, %v8269_v25 }
 0x3d4   : > { %v11047_v10 = vadd.f32 %v8371_v21, %v6315_v0 }
 0x3d5   : > { %v6331_v24 = vadd.f32 %v8271_v7, %v10978_v6 }
 0x3d6   : > { %v8372_v28 = vpop.f32.mrb[244].mxu0 }
 0x3d7   : > { %v8373_v16 = vpop.f32.mrb[245].mxu0  ;;  %v8272_v49 = vpop.f32.mrb[220].mxu1 }
 0x3d8   : > { %v8374_v51 = vadd.f32 %v8373_v16, %v8372_v28  ;;  %v8375_v55 = vpop.f32.mrb[246].mxu0  ;;  %v8273_v54 = vpop.f32.mrb[221].mxu1 }
 0x3d9   : > { %v8376_v29 = vpop.f32.mrb[247].mxu0  ;;  %v8274_v0 = vadd.f32 %v8273_v54, %v8272_v49  ;;  %v8275_v12 = vpop.f32.mrb[222].mxu1 }
 0x3da   : > { %v8377_v62 = vadd.f32 %v8376_v29, %v8375_v55  ;;  %v11050_v37 = vadd.f32 %v8374_v51, %v6320_v35  ;;  %v8276_v19 = vpop.f32.mrb[223].mxu1 }
 0x3db   : > { %v6336_v8 = vadd.f32 %v8274_v0, %v10980_v44  ;;  %v8277_v26 = vadd.f32 %v8276_v19, %v8275_v12 }
 0x3dc   : > { %v11053_v61 = vadd.f32 %v8377_v62, %v6323_v27 }
 0x3dd   : > { %v6339_v6 = vadd.f32 %v8277_v26, %v10982_v34 }
 0x3de   : > { %v8378_v40 = vpop.f32.mrb[248].mxu0 }
 0x3df   : > { %v8379_v53 = vpop.f32.mrb[249].mxu0  ;;  %v8278_v11 = vpop.f32.mrb[224].mxu1 }
 0x3e0   : > { %v8380_v1 = vadd.f32 %v8379_v53, %v8378_v40  ;;  %v8381_v63 = vpop.f32.mrb[250].mxu0  ;;  %v8279_v21 = vpop.f32.mrb[225].mxu1 }
 0x3e1   : > { %v8382_v43 = vpop.f32.mrb[251].mxu0  ;;  %v8280_v27 = vadd.f32 %v8279_v21, %v8278_v11  ;;  %v8281_v28 = vpop.f32.mrb[226].mxu1 }
 0x3e2   : > { %v8383_v3 = vadd.f32 %v8382_v43, %v8381_v63  ;;  %v11056_v17 = vadd.f32 %v8380_v1, %v6328_v38  ;;  %v8282_v16 = vpop.f32.mrb[227].mxu1 }
 0x3e3   : > { %v6344_v44 = vadd.f32 %v8280_v27, %v10984_v46  ;;  %v8283_v25 = vadd.f32 %v8282_v16, %v8281_v28 }
 0x3e4   : > { %v11059_v35 = vadd.f32 %v8383_v3, %v6331_v24 }
 0x3e5   : > { %v6347_v34 = vadd.f32 %v8283_v25, %v10986_v59 }
 0x3e6   : > { %v8384_v60 = vpop.f32.mrb[252].mxu0 }
 0x3e7   : > { %v8385_v42 = vpop.f32.mrb[253].mxu0  ;;  %v8284_v7 = vpop.f32.mrb[228].mxu1 }
 0x3e8   : > { %v8386_v23 = vadd.f32 %v8385_v42, %v8384_v60  ;;  %v8387_v50 = vpop.f32.mrb[254].mxu0  ;;  %v8285_v62 = vpop.f32.mrb[229].mxu1 }
 0x3e9   : > { %v8388_v51 = vpop.f32.mrb[255].mxu0  ;;  %v8286_v24 = vadd.f32 %v8285_v62, %v8284_v7  ;;  %v8287_v40 = vpop.f32.mrb[230].mxu1 }
 0x3ea   : > { %v8389_v55 = vadd.f32 %v8388_v51, %v8387_v50  ;;  %v11062_v5 = vadd.f32 %v8386_v23, %v6336_v8  ;;  %v8288_v53 = vpop.f32.mrb[231].mxu1 }
 0x3eb   : > { %v6352_v46 = vadd.f32 %v8286_v24, %v10988_v57  ;;  %v8289_v12 = vadd.f32 %v8288_v53, %v8287_v40 }
 0x3ec   : > { %v11065_v38 = vadd.f32 %v8389_v55, %v6339_v6 }
 0x3ed   : > { %v6355_v59 = vadd.f32 %v8289_v12, %v10990_v56 }
 0x3ee   : > { %v8390_v29 = vpop.f32.mrb[0].mxu0 }
 0x3ef   : > { %v8391_v49 = vpop.f32.mrb[1].mxu0  ;;  %v8290_v26 = vpop.f32.mrb[232].mxu1 }
 0x3f0   : > { %v8392_v54 = vadd.f32 %v8391_v49, %v8390_v29  ;;  %v8393_v0 = vpop.f32.mrb[2].mxu0  ;;  %v8291_v3 = vpop.f32.mrb[233].mxu1 }
 0x3f1   : > { %v8394_v1 = vpop.f32.mrb[3].mxu0  ;;  %v8292_v6 = vadd.f32 %v8291_v3, %v8290_v26  ;;  %v8293_v60 = vpop.f32.mrb[234].mxu1 }
 0x3f2   : > { %v8395_v63 = vadd.f32 %v8394_v1, %v8393_v0  ;;  %v11068_v19 = vadd.f32 %v8392_v54, %v6344_v44  ;;  %v8294_v42 = vpop.f32.mrb[235].mxu1 }
 0x3f3   : > { %v6360_v57 = vadd.f32 %v8292_v6, %v10992_v9  ;;  %v8295_v28 = vadd.f32 %v8294_v42, %v8293_v60 }
 0x3f4   : > { %v11071_v8 = vadd.f32 %v8395_v63, %v6347_v34 }
 0x3f5   : > { %v6363_v56 = vadd.f32 %v8295_v28, %v10995_v45 }
 0x3f6   : > { %v8396_v43 = vpop.f32.mrb[4].mxu0 }
 0x3f7   : > { %v8397_v11 = vpop.f32.mrb[5].mxu0  ;;  %v8296_v25 = vpop.f32.mrb[236].mxu1 }
 0x3f8   : > { %v8398_v21 = vadd.f32 %v8397_v11, %v8396_v43  ;;  %v8399_v27 = vpop.f32.mrb[6].mxu0  ;;  %v8297_v55 = vpop.f32.mrb[237].mxu1 }
 0x3f9   : > { %v8400_v23 = vpop.f32.mrb[7].mxu0  ;;  %v8298_v34 = vadd.f32 %v8297_v55, %v8296_v25  ;;  %v8299_v29 = vpop.f32.mrb[238].mxu1 }
 0x3fa   : > { %v8401_v50 = vadd.f32 %v8400_v23, %v8399_v27  ;;  %v11074_v16 = vadd.f32 %v8398_v21, %v6352_v46  ;;  %v8300_v49 = vpop.f32.mrb[239].mxu1 }
 0x3fb   : > { %v6368_v9 = vadd.f32 %v8298_v34, %v10997_v47  ;;  %v8301_v40 = vadd.f32 %v8300_v49, %v8299_v29 }
 0x3fc   : > { %v11077_v44 = vadd.f32 %v8401_v50, %v6355_v59 }
 0x3fd   : > { %v6371_v45 = vadd.f32 %v8301_v40, %v10999_v18 }
 0x3fe   : > { %v8402_v51 = vpop.f32.mrb[8].mxu0 }
 0x3ff   : > { %v8403_v7 = vpop.f32.mrb[9].mxu0  ;;  %v8302_v12 = vpop.f32.mrb[240].mxu1 }
 0x400   : > { %v8404_v62 = vadd.f32 %v8403_v7, %v8402_v51  ;;  %v8405_v24 = vpop.f32.mrb[10].mxu0  ;;  %v8303_v63 = vpop.f32.mrb[241].mxu1 }
 0x401   : > { %v8406_v54 = vpop.f32.mrb[11].mxu0  ;;  %v8304_v59 = vadd.f32 %v8303_v63, %v8302_v12  ;;  %v8305_v43 = vpop.f32.mrb[242].mxu1 }
 0x402   : > { %v8407_v0 = vadd.f32 %v8406_v54, %v8405_v24  ;;  %v11080_v53 = vadd.f32 %v8404_v62, %v6360_v57  ;;  %v8306_v11 = vpop.f32.mrb[243].mxu1 }
 0x403   : > { %v6376_v47 = vadd.f32 %v8304_v59, %v11001_v30  ;;  %v8307_v60 = vadd.f32 %v8306_v11, %v8305_v43 }
 0x404   : > { %v11083_v46 = vadd.f32 %v8407_v0, %v6363_v56 }
 0x405   : > { %v6379_v18 = vadd.f32 %v8307_v60, %v11003_v20 }
 0x406   : > { %v8408_v1 = vpop.f32.mrb[12].mxu0 }
 0x407   : > { %v8409_v26 = vpop.f32.mrb[13].mxu0  ;;  %v8308_v28 = vpop.f32.mrb[244].mxu1 }
 0x408   : > { %v8410_v3 = vadd.f32 %v8409_v26, %v8408_v1  ;;  %v8411_v6 = vpop.f32.mrb[14].mxu0  ;;  %v8309_v50 = vpop.f32.mrb[245].mxu1 }
 0x409   : > { %v8412_v21 = vpop.f32.mrb[15].mxu0  ;;  %v8310_v56 = vadd.f32 %v8309_v50, %v8308_v28  ;;  %v8311_v51 = vpop.f32.mrb[246].mxu1 }
 0x40a   : > { %v8413_v27 = vadd.f32 %v8412_v21, %v8411_v6  ;;  %v11086_v42 = vadd.f32 %v8410_v3, %v6368_v9  ;;  %v8312_v7 = vpop.f32.mrb[247].mxu1 }
 0x40b   : > { %v6384_v30 = vadd.f32 %v8310_v56, %v11005_v22  ;;  %v8313_v29 = vadd.f32 %v8312_v7, %v8311_v51 }
 0x40c   : > { %v11089_v57 = vadd.f32 %v8413_v27, %v6371_v45 }
 0x40d   : > { %v6387_v20 = vadd.f32 %v8313_v29, %v11007_v52 }
 0x40e   : > { %v8414_v23 = vpop.f32.mrb[16].mxu0 }
 0x40f   : > { %v8415_v25 = vpop.f32.mrb[17].mxu0  ;;  %v8314_v40 = vpop.f32.mrb[248].mxu1 }
 0x410   : > { %v8416_v55 = vadd.f32 %v8415_v25, %v8414_v23  ;;  %v8417_v34 = vpop.f32.mrb[18].mxu0  ;;  %v8315_v0 = vpop.f32.mrb[249].mxu1 }
 0x411   : > { %v8418_v62 = vpop.f32.mrb[19].mxu0  ;;  %v8316_v45 = vadd.f32 %v8315_v0, %v8314_v40  ;;  %v8317_v1 = vpop.f32.mrb[250].mxu1  ;;  %v6730_v40 = vld [vmem:[#allocation3 + $0x31] sm:$0xff] }
 0x412   : > { %v8419_v24 = vadd.f32 %v8418_v62, %v8417_v34  ;;  %v11092_v49 = vadd.f32 %v8416_v55, %v6376_v47  ;;  %v8318_v26 = vpop.f32.mrb[251].mxu1 }
 0x413   : > { %v6392_v22 = vadd.f32 %v8316_v45, %v11009_v32  ;;  %v8319_v43 = vadd.f32 %v8318_v26, %v8317_v1  ;;  %v6728_v1 = vld [vmem:[#allocation3 + $0x19] sm:$0xff] }
 0x414   : > { %v11095_v9 = vadd.f32 %v8419_v24, %v6379_v18 }
 0x415   : > { %v6395_v52 = vadd.f32 %v8319_v43, %v11011_v41 }
 0x416   : > { %v8420_v54 = vpop.f32.mrb[20].mxu0 }
 0x417   : > { %v8421_v12 = vpop.f32.mrb[21].mxu0  ;;  %v8320_v60 = vpop.f32.mrb[252].mxu1 }
 0x418   : > { %v8422_v63 = vadd.f32 %v8421_v12, %v8420_v54  ;;  %v8423_v59 = vpop.f32.mrb[22].mxu0  ;;  %v8321_v27 = vpop.f32.mrb[253].mxu1 }
 0x419   : > { %v8424_v3 = vpop.f32.mrb[23].mxu0  ;;  %v8322_v18 = vadd.f32 %v8321_v27, %v8320_v60  ;;  %v8323_v23 = vpop.f32.mrb[254].mxu1 }
 0x41a   : > { %v8425_v6 = vadd.f32 %v8424_v3, %v8423_v59  ;;  %v11098_v11 = vadd.f32 %v8422_v63, %v6384_v30  ;;  %v8324_v32 = vpop.f32.mrb[255].mxu1 }
 0x41b   : > { %v6400_v25 = vadd.f32 %v8322_v18, %v11014_v15  ;;  %v8325_v51 = vadd.f32 %v8324_v32, %v8323_v23  ;;  %v6734_v18 = vld [vmem:[#allocation3 + $0x61] sm:$0xff] }
 0x41c   : > { %v11101_v47 = vadd.f32 %v8425_v6, %v6387_v20  ;;  %v6729_v6 = vld [vmem:[#allocation3 + $0x21] sm:$0xff] }
 0x41d   : > { %v6403_v41 = vadd.f32 %v8325_v51, %v11017_v14 }
 0x41e   : > { %v8426_v21 = vpop.f32.mrb[24].mxu0 }
 0x41f   : > { %v8427_v28 = vpop.f32.mrb[25].mxu0  ;;  %v8528_v29 = vpop.f32.mrb[0].mxu1 }
 0x420   : > { %v8428_v50 = vadd.f32 %v8427_v28, %v8426_v21  ;;  %v8429_v56 = vpop.f32.mrb[26].mxu0  ;;  %v6610_v24 = vadd.f32 %v8528_v29, %v11026_v4  ;;  %v6601_v20 = vpop.f32.mrb[1].mxu1  ;;  %v6733_v29 = vld [vmem:[#allocation3 + $0x51] sm:$0xff] }
 0x421   : > { %v8430_v55 = vpop.f32.mrb[27].mxu0  ;;  %v6602_v15 = vadd.f32 %v6601_v20, %v11020_v31  ;;  %v8529_v0 = vpop.f32.mrb[2].mxu1 }
 0x422   : > { %v8431_v34 = vadd.f32 %v8430_v55, %v8429_v56  ;;  %v11105_v7 = vadd.f32 %v8428_v50, %v6392_v22  ;;  %v6762_v45 = vadd.f32 %v6730_v40, %v6610_v24  ;;  %v6613_v14 = vadd.f32 %v8529_v0, %v11029_v58  ;;  %v6604_v59 = vpop.f32.mrb[3].mxu1  ;;  %v6731_v22 = vld [vmem:[#allocation3 + $0x39] sm:$0xff]  ;;  %v6732_v56 = vld [vmem:[#allocation3 + $0x49] sm:$0xff] }
 0x423   : > { %v6760_v26 = vadd.f32 %v6728_v1, %v6602_v15  ;;  %v6605_v3 = vadd.f32 %v6604_v59, %v11023_v2  ;;  %v6735_v55 = vld [vmem:[#allocation3 + $0x69] sm:$0xff] }
 0x424   : > { %v11110_v30 = vadd.f32 %v8431_v34, %v6395_v52  ;;  %6794 = vst [vmem:[%s11116_s6 + $0x10] sm:$0xff] %v6762_v45  ;;  %v6763_v31 = vadd.f32 %v6731_v22, %v6613_v14  ;;  %v6737_v14 = vld [vmem:[#allocation3 + $0x81] sm:$0xff] }
 0x425   : > { %6792 = vst [vmem:[%s11116_s6] sm:$0xff] %v6760_v26  ;;  %v6761_v58 = vadd.f32 %v6729_v6, %v6605_v3  ;;  %v6740_v3 = vld [vmem:[#allocation3 + $0xa9] sm:$0xff] }
 0x426   : > { %v8432_v62 = vpop.f32.mrb[28].mxu0  ;;  %6795 = vst [vmem:[%s11116_s6 + $0x18] sm:$0xff] %v6763_v31 }
 0x427   : > { %v8433_v54 = vpop.f32.mrb[29].mxu0  ;;  %6793 = vst [vmem:[%s11116_s6 + $0x8] sm:$0xff] %v6761_v58  ;;  %v8532_v2 = vpop.f32.mrb[4].mxu1  ;;  %v6743_v58 = vld [vmem:[#allocation3 + $0xc9] sm:$0xff] }
 0x428   : > { %v8434_v12 = vadd.f32 %v8433_v54, %v8432_v62  ;;  %v8435_v63 = vpop.f32.mrb[30].mxu0  ;;  %v6626_v21 = vadd.f32 %v8532_v2, %v11038_v36  ;;  %v6617_v27 = vpop.f32.mrb[5].mxu1  ;;  %v6736_v54 = vld [vmem:[#allocation3 + $0x79] sm:$0xff] }
 0x429   : > { %v8436_v43 = vpop.f32.mrb[31].mxu0  ;;  %v6618_v28 = vadd.f32 %v6617_v27, %v11032_v13  ;;  %v8533_v23 = vpop.f32.mrb[6].mxu1  ;;  %v6741_v27 = vld [vmem:[#allocation3 + $0xb1] sm:$0xff] }
 0x42a   : > { %v8437_v4 = vadd.f32 %v8436_v43, %v8435_v63  ;;  %v11119_v52 = vadd.f32 %v8434_v12, %v6400_v25  ;;  %v6766_v50 = vadd.f32 %v6734_v18, %v6626_v21  ;;  %v6629_v32 = vadd.f32 %v8533_v23, %v11041_v39  ;;  %v6620_v25 = vpop.f32.mrb[7].mxu1  ;;  %v6738_v39 = vld [vmem:[#allocation3 + $0x91] sm:$0xff]  ;;  %v6739_v12 = vld [vmem:[#allocation3 + $0x99] sm:$0xff] }
 0x42b   : > { %v6764_v51 = vadd.f32 %v6732_v56, %v6618_v28  ;;  %v6621_v34 = vadd.f32 %v6620_v25, %v11035_v33  ;;  %v6744_v56 = vld [vmem:[#allocation3 + $0xd9] sm:$0xff] }
 0x42c   : > { %v11123_v60 = vadd.f32 %v8437_v4, %v6403_v41  ;;  %6798 = vst [vmem:[%s11116_s6 + $0x30] sm:$0xff] %v6766_v50  ;;  %v6767_v41 = vadd.f32 %v6735_v55, %v6629_v32  ;;  %v6747_v55 = vld [vmem:[#allocation3 + $0xf9] sm:$0xff] }
 0x42d   : > { %6796 = vst [vmem:[%s11116_s6 + $0x20] sm:$0xff] %v6764_v51  ;;  %v6765_v36 = vadd.f32 %v6733_v29, %v6621_v34  ;;  %v6745_v29 = vld [vmem:[#allocation3 + $0xe1] sm:$0xff] }
 0x42e   : > { %6799 = vst [vmem:[%s11116_s6 + $0x38] sm:$0xff] %v6767_v41 }
 0x42f   : > { %6797 = vst [vmem:[%s11116_s6 + $0x28] sm:$0xff] %v6765_v36  ;;  %v8536_v62 = vpop.f32.mrb[8].mxu1 }
 0x430   : > { %v6642_v13 = vadd.f32 %v8536_v62, %v11050_v37  ;;  %v6633_v24 = vpop.f32.mrb[9].mxu1 }
 0x431   : > { %v6634_v20 = vadd.f32 %v6633_v24, %v11044_v48  ;;  %v8537_v40 = vpop.f32.mrb[10].mxu1 }
 0x432   : > { %v6770_v33 = vadd.f32 %v6738_v39, %v6642_v13  ;;  %v6645_v15 = vadd.f32 %v8537_v40, %v11053_v61  ;;  %v6636_v0 = vpop.f32.mrb[11].mxu1  ;;  %v6742_v61 = vld [vmem:[#allocation3 + $0xc1] sm:$0xff]  ;;  %v6748_v39 = vld [vmem:[#allocation3 + $0x109] sm:$0xff] }
 0x433   : > { %v6768_v45 = vadd.f32 %v6736_v54, %v6634_v20  ;;  %v6637_v1 = vadd.f32 %v6636_v0, %v11047_v10  ;;  %v6751_v54 = vld [vmem:[#allocation3 + $0x129] sm:$0xff] }
 0x434   : > { %6802 = vst [vmem:[%s11116_s6 + $0x50] sm:$0xff] %v6770_v33  ;;  %v6771_v63 = vadd.f32 %v6739_v12, %v6645_v15 }
 0x435   : > { %6800 = vst [vmem:[%s11116_s6 + $0x40] sm:$0xff] %v6768_v45  ;;  %v6769_v37 = vadd.f32 %v6737_v14, %v6637_v1  ;;  %v6749_v45 = vld [vmem:[#allocation3 + $0x111] sm:$0xff] }
 0x436   : > { %6803 = vst [vmem:[%s11116_s6 + $0x58] sm:$0xff] %v6771_v63 }
 0x437   : > { %6801 = vst [vmem:[%s11116_s6 + $0x48] sm:$0xff] %v6769_v37  ;;  %v8540_v59 = vpop.f32.mrb[12].mxu1  ;;  %v6752_v37 = vld [vmem:[#allocation3 + $0x139] sm:$0xff] }
 0x438   : > { %v6658_v48 = vadd.f32 %v8540_v59, %v11062_v5  ;;  %v6649_v26 = vpop.f32.mrb[13].mxu1 }
 0x439   : > { %v6650_v22 = vadd.f32 %v6649_v26, %v11056_v17  ;;  %v8541_v43 = vpop.f32.mrb[14].mxu1 }
 0x43a   : > { %v6774_v10 = vadd.f32 %v6742_v61, %v6658_v48  ;;  %v6661_v31 = vadd.f32 %v8541_v43, %v11065_v38  ;;  %v6652_v4 = vpop.f32.mrb[15].mxu1  ;;  %v6746_v38 = vld [vmem:[#allocation3 + $0xf1] sm:$0xff]  ;;  %v6755_v61 = vld [vmem:[#allocation3 + $0x159] sm:$0xff]  ;;  %v6753_v43 = vld [vmem:[#allocation3 + $0x141] sm:$0xff] }
 0x43b   : > { %v6772_v6 = vadd.f32 %v6740_v3, %v6650_v22  ;;  %v6653_v2 = vadd.f32 %v6652_v4, %v11059_v35 }
 0x43c   : > { %6806 = vst [vmem:[%s11116_s6 + $0x70] sm:$0xff] %v6774_v10  ;;  %v6775_v21 = vadd.f32 %v6743_v58, %v6661_v31  ;;  %v6756_v58 = vld [vmem:[#allocation3 + $0x169] sm:$0xff] }
 0x43d   : > { %6804 = vst [vmem:[%s11116_s6 + $0x60] sm:$0xff] %v6772_v6  ;;  %v6773_v5 = vadd.f32 %v6741_v27, %v6653_v2 }
 0x43e   : > { %6807 = vst [vmem:[%s11116_s6 + $0x78] sm:$0xff] %v6775_v21 }
 0x43f   : > { %6805 = vst [vmem:[%s11116_s6 + $0x68] sm:$0xff] %v6773_v5  ;;  %v8544_v18 = vpop.f32.mrb[16].mxu1  ;;  %v6759_v5 = vld [vmem:[#allocation3 + $0x189] sm:$0xff] }
 0x440   : > { %v6674_v17 = vadd.f32 %v8544_v18, %v11074_v16  ;;  %v6665_v28 = vpop.f32.mrb[17].mxu1 }
 0x441   : > { %v6666_v23 = vadd.f32 %v6665_v28, %v11068_v19  ;;  %v8545_v50 = vpop.f32.mrb[18].mxu1 }
 0x442   : > { %v6778_v35 = vadd.f32 %v6746_v38, %v6674_v17  ;;  %v6677_v32 = vadd.f32 %v8545_v50, %v11077_v44  ;;  %v6668_v25 = vpop.f32.mrb[19].mxu1  ;;  %v6750_v44 = vld [vmem:[#allocation3 + $0x121] sm:$0xff] }
 0x443   : > { %v6776_v51 = vadd.f32 %v6744_v56, %v6666_v23  ;;  %v6669_v34 = vadd.f32 %v6668_v25, %v11071_v8 }
 0x444   : > { %6810 = vst [vmem:[%s11116_s6 + $0x90] sm:$0xff] %v6778_v35  ;;  %v6779_v41 = vadd.f32 %v6747_v55, %v6677_v32 }
 0x445   : > { %6808 = vst [vmem:[%s11116_s6 + $0x80] sm:$0xff] %v6776_v51  ;;  %v6777_v16 = vadd.f32 %v6745_v29, %v6669_v34 }
 0x446   : > { %6811 = vst [vmem:[%s11116_s6 + $0x98] sm:$0xff] %v6779_v41 }
 0x447   : > { %6809 = vst [vmem:[%s11116_s6 + $0x88] sm:$0xff] %v6777_v16  ;;  %v8548_v36 = vpop.f32.mrb[20].mxu1 }
 0x448   : > { %v6690_v19 = vadd.f32 %v8548_v36, %v11086_v42  ;;  %v6681_v62 = vpop.f32.mrb[21].mxu1 }
 0x449   : > { %v6682_v13 = vadd.f32 %v6681_v62, %v11080_v53  ;;  %v8549_v24 = vpop.f32.mrb[22].mxu1 }
 0x44a   : > { %v6782_v8 = vadd.f32 %v6750_v44, %v6690_v19  ;;  %v6693_v20 = vadd.f32 %v8549_v24, %v11089_v57  ;;  %v6684_v40 = vpop.f32.mrb[23].mxu1  ;;  %v6754_v57 = vld [vmem:[#allocation3 + $0x151] sm:$0xff] }
 0x44b   : > { %v6780_v33 = vadd.f32 %v6748_v39, %v6682_v13  ;;  %v6685_v15 = vadd.f32 %v6684_v40, %v11083_v46 }
 0x44c   : > { %6814 = vst [vmem:[%s11116_s6 + $0xb0] sm:$0xff] %v6782_v8  ;;  %v6783_v0 = vadd.f32 %v6751_v54, %v6693_v20 }
 0x44d   : > { %6812 = vst [vmem:[%s11116_s6 + $0xa0] sm:$0xff] %v6780_v33  ;;  %v6781_v42 = vadd.f32 %v6749_v45, %v6685_v15 }
 0x44e   : > { %6815 = vst [vmem:[%s11116_s6 + $0xb8] sm:$0xff] %v6783_v0 }
 0x44f   : > { %6813 = vst [vmem:[%s11116_s6 + $0xa8] sm:$0xff] %v6781_v42  ;;  %v8552_v12 = vpop.f32.mrb[24].mxu1 }
 0x450   : > { %v6706_v53 = vadd.f32 %v8552_v12, %v11098_v11  ;;  %v6697_v1 = vpop.f32.mrb[25].mxu1 }
 0x451   : > { %v6698_v63 = vadd.f32 %v6697_v1, %v11092_v49  ;;  %v8553_v14 = vpop.f32.mrb[26].mxu1 }
 0x452   : > { %v6786_v46 = vadd.f32 %v6754_v57, %v6706_v53  ;;  %v6709_v59 = vadd.f32 %v8553_v14, %v11101_v47  ;;  %v6700_v48 = vpop.f32.mrb[27].mxu1  ;;  %v6758_v47 = vld [vmem:[#allocation3 + $0x181] sm:$0xff] }
 0x453   : > { %v6784_v26 = vadd.f32 %v6752_v37, %v6698_v63  ;;  %v6701_v22 = vadd.f32 %v6700_v48, %v11095_v9 }
 0x454   : > { %6818 = vst [vmem:[%s11116_s6 + $0xd0] sm:$0xff] %v6786_v46  ;;  %v6787_v11 = vadd.f32 %v6755_v61, %v6709_v59 }
 0x455   : > { %6816 = vst [vmem:[%s11116_s6 + $0xc0] sm:$0xff] %v6784_v26  ;;  %v6785_v10 = vadd.f32 %v6753_v43, %v6701_v22 }
 0x456   : > { %6819 = vst [vmem:[%s11116_s6 + $0xd8] sm:$0xff] %v6787_v11 }
 0x457   : > { %6817 = vst [vmem:[%s11116_s6 + $0xc8] sm:$0xff] %v6785_v10  ;;  %v8556_v49 = vpop.f32.mrb[28].mxu1 }
 0x458   : > { %v6722_v3 = vadd.f32 %v8556_v49, %v11119_v52  ;;  %v6713_v31 = vpop.f32.mrb[29].mxu1 }
 0x459   : > { %v6714_v4 = vadd.f32 %v6713_v31, %v11105_v7  ;;  %v8557_v6 = vpop.f32.mrb[30].mxu1  ;;  %v6757_v7 = vld [vmem:[#allocation3 + $0x171] sm:$0xff] }
 0x45a   : > { %v6790_v9 = vadd.f32 %v6758_v47, %v6722_v3  ;;  %v6725_v2 = vadd.f32 %v8557_v6, %v11123_v60  ;;  %v6716_v21 = vpop.f32.mrb[31].mxu1 }
 0x45b   : > { %v6788_v27 = vadd.f32 %v6756_v58, %v6714_v4  ;;  %v6717_v52 = vadd.f32 %v6716_v21, %v11110_v30 }
 0x45c   : > { %6822 = vst [vmem:[%s11116_s6 + $0xf0] sm:$0xff] %v6790_v9  ;;  %v6791_v18 = vadd.f32 %v6759_v5, %v6725_v2 }
 0x45d   : > { %6820 = vst [vmem:[%s11116_s6 + $0xe0] sm:$0xff] %v6788_v27  ;;  %v6789_v60 = vadd.f32 %v6757_v7, %v6717_v52 }
 0x45e   : > { %6823 = vst [vmem:[%s11116_s6 + $0xf8] sm:$0xff] %v6791_v18 }
 0x45f   : > { %6821 = vst [vmem:[%s11116_s6 + $0xe8] sm:$0xff] %v6789_v60 }
 0x460   : > { %8848 = shalt.err (!%p8845_p7)
}
 0x461   : > { %s8849_s28 = scalar_lea.hbm %s11184_s16, 4096  ;;  %s8853_s24 = scalar_lea.hbm %s11237_s3, 8192 }
 0x462   : > { %p8850_p8 = scmp.ne.s32.totalorder %s11184_s16, %s8849_s28  ;;  %p8854_p1 = scmp.lt.u32.totalorder %s11184_s16, %s11237_s3 }
 0x463   : > { %p8855_p0 = scmp.lt.u32.totalorder %s8853_s24, %s8849_s28  ;;  %p8857_p6 = scmp.lt.u32.totalorder %s8849_s28, %s11184_s16 }
 0x464   : > { %p8851_p11 = pnand %p8850_p8, %p11290_p9 }
 0x465   : > { %p8856_p5 = por %p8855_p0, %p8854_p1 }
 0x466   : > { %p8852_p13 = pneg %p8851_p11 }
 0x467   : > { %p8858_p10 = por %p8857_p6, %p8856_p5 }
 0x469   : > { %p8859_p12 = pnand %p8858_p10, %p8852_p13 }
 0x46b   : > { %8862 = shalt.err (!%p8859_p12)
}
 0x46c   : > { %s8908_s5 = smov 128   ;;  %s8909_s4 = smov 8  }
 0x46d   : > { %8563 = dma.vmem_to_hbm [thread:$0]  (%p11290_p9), %s11186_s8, 4096, %s11184_s16, %s11193_s11, %s8908_s5, %s8908_s5, %s8909_s4  }
 0x46e PF: > { %p8575_p2 = scmp.ge.s32.totalorder %s8901_s15, 2  ;;  %s6853_s6 = sand.u32 1, %s8889_s12  }
 0x46f   : > { %p11291_p3 = scmp.ne.s32.totalorder %s11242_s23, 0  ;;  %s6854_s7 = scalar_lea.sflag [#allocation6], %s6853_s6 }
 0x471   : > { %p8570_p4 = pnand %p8575_p2, %p11291_p3 }
 0x473   : > { %8884 = dma.done.wait (!%p8570_p4), %s6854_s7, 4096  }
 0x474   : > { %8886 = vsyncadd (!%p8570_p4), %s6854_s7, 4294963200  ;;  %p14_p7 = scmp.ge.s32.totalorder %s8955_s18, 4   ;;  %s11292_s12 = smov %s8893_s13 }
 0x475   : > { %s11293_s13 = smov %s8897_s14  ;;  %s11294_s14 = smov %s8966_s21 }
 0x476   : > { %s11295_s15 = smov %s8955_s18  ;;  %16 = sbr.rel (!%p14_p7) target bundleno = 4 (0x4), region = 77 }
 0x47d   :  { %6859 = vsyncpa [#allocation5], 1 }
 0x47e   :  { %6861 = vsyncpa [#allocation5 + $0x1], 1 }
 0x47f   :  { %6862 = vsyncpa [#allocation6], 1 }
 0x480   :  { %6864 = vsyncpa [#allocation6 + $0x1], 1 }

</bundles_post_ra>
